<compile_context>
chip_gen: v5e
topology: v5e:2x2
jax: 0.10.0
libtpu: 0.0.40
codegen_flags: <defaults>
</compile_context>

<pallas_src>
import functools

import numpy as np
import jax
import jax.numpy as jnp
from jax.experimental import pallas as pl
from jax.experimental.pallas import tpu as pltpu


# ----------------------------------------------------------------------------
# Static index construction (mirrors the PyTorch __init__ buffers exactly).
# ----------------------------------------------------------------------------
def _mask_1d_rel_pos_index(seq_len):
    idx = np.arange(seq_len)
    return idx.reshape(1, seq_len) - idx.reshape(seq_len, 1) + seq_len - 1


def _add_cls_to_index_matrix(index, num_tokens, offset):
    index = np.asarray(index).reshape(num_tokens, num_tokens)
    new_index = np.zeros((num_tokens + 1, num_tokens + 1), dtype=index.dtype)
    new_index[1:, 1:] = index
    new_index[0, 0:] = offset
    new_index[0:, 0] = offset + 1
    new_index[0, 0] = offset + 2
    return new_index


def build_relative_position_indices(window_size):
    """Replicates the relative_position_{high,width}_index buffers."""
    Wh, Ww = window_size
    num_tokens = Wh * Ww
    h = _mask_1d_rel_pos_index(Wh).reshape(Wh, 1, Wh, 1)
    h = np.broadcast_to(h, (Wh, Ww, Wh, Ww))
    h_index = _add_cls_to_index_matrix(h, num_tokens, 2 * Wh - 1)
    w = _mask_1d_rel_pos_index(Ww).reshape(1, Ww, 1, Ww)
    w = np.broadcast_to(w, (Wh, Ww, Wh, Ww))
    w_index = _add_cls_to_index_matrix(w, num_tokens, 2 * Ww - 1)
    return h_index.astype(np.int32), w_index.astype(np.int32)


def _round_up(x, m):
    return ((x + m - 1) // m) * m


def _default_n_steps():
    """1 grid step on single-TC chips (v5e/v6e), 2 on dual-TC chips (v7x/v4/v5p)."""
    try:
        kind = jax.devices()[0].device_kind.lower()
    except Exception:
        return 1
    if any(tag in kind for tag in ("v7", "7x", "v4", "v5p")):
        return 2
    return 1


# ----------------------------------------------------------------------------
# Pallas kernel: fused "two-hot" gather-as-matmul, output in (H, N*N) layout.
# ----------------------------------------------------------------------------
def _two_hot_bias_kernel(idx_ref, th_ref, tw_ref, o_ref, tbl_ref, *, dh_offset):
    # idx_ref: (2, TM) int32 -- row 0: high index, row 1: width index + dh_offset,
    #          padded lanes are -1 (never match -> zero output).
    # th_ref:  (dh, H) f32 full extent, tw_ref: (dw, H) f32 full extent.
    # o_ref:   (H, TM) f32.
    # tbl_ref: (D_pad, H) f32 VMEM scratch (combined table).
    dh = th_ref.shape[0]
    dw = tw_ref.shape[0]
    d_p = tbl_ref.shape[0]
    tm = idx_ref.shape[1]

    # Build the combined table in VMEM at sublane-aligned row offsets.  Rows
    # [dh, dh_offset) and [dh_offset+dw, D_pad) are zero and never selected.
    # Rebuilt every grid step (a few hundred elements) so megacore/"parallel"
    # partitioning cannot observe an uninitialized scratch.
    tbl_ref[...] = jnp.zeros_like(tbl_ref)
    tbl_ref[0:dh, :] = th_ref[...].astype(tbl_ref.dtype)
    tbl_ref[dh_offset:dh_offset + dw, :] = tw_ref[...].astype(tbl_ref.dtype)

    # Two-hot selection: each output column gets exactly one 1 in the high-table
    # rows and one 1 in the (offset) width-table rows.
    iota = jax.lax.broadcasted_iota(jnp.int32, (d_p, tm), 0)
    sel = ((iota == idx_ref[0:1, :]) | (iota == idx_ref[1:2, :])).astype(jnp.float32)

    # Single MXU contraction: (H, D_pad) x (D_pad, TM) -> (H, TM).
    # precision=HIGHEST keeps the f32 table entries exact (gather + add).
    o_ref[...] = jnp.dot(
        tbl_ref[...].T, sel,
        preferred_element_type=jnp.float32,
        precision=jax.lax.Precision.HIGHEST,
    ).astype(o_ref.dtype)


# ----------------------------------------------------------------------------
# Module factory: does all static preprocessing once, returns the forward fn.
# ----------------------------------------------------------------------------
def make_decoupled_relative_position_bias(window_size, num_heads, *, n_steps=None):
    wh, ww = window_size
    dh = 2 * wh + 2
    dw = 2 * ww + 2
    dh_p = _round_up(dh, 8)             # aligned start of the width-table rows
    d_p = dh_p + _round_up(dw, 8)       # combined (padded) table depth

    h_index, w_index = build_relative_position_indices(window_size)
    n = wh * ww + 1
    m = n * n

    if n_steps is None:
        n_steps = _default_n_steps()
    n_steps = max(1, int(n_steps))
    if n_steps == 1:
        # Full-extent block: no lane padding, no post-kernel slice.
        tm, mp = m, m
    else:
        tm = _round_up(-(-m // n_steps), 128)   # lane-dense tiles, balanced
        mp = tm * n_steps

    # Static per-module preprocessing (numpy, done once — registered buffers).
    idx_np = np.full((2, mp), -1, dtype=np.int32)
    idx_np[0, :m] = h_index.reshape(-1)
    idx_np[1, :m] = w_index.reshape(-1) + dh_p
    idx = jnp.asarray(idx_np)

    kernel = functools.partial(_two_hot_bias_kernel, dh_offset=dh_p)

    call = pl.pallas_call(
        kernel,
        out_shape=jax.ShapeDtypeStruct((num_heads, mp), jnp.float32),
        grid_spec=pltpu.PrefetchScalarGridSpec(
            num_scalar_prefetch=0,
            grid=(n_steps,),
            in_specs=[
                pl.BlockSpec((2, tm), lambda i: (0, i)),
                pl.BlockSpec((dh, num_heads), lambda i: (0, 0)),
                pl.BlockSpec((dw, num_heads), lambda i: (0, 0)),
            ],
            out_specs=pl.BlockSpec((num_heads, tm), lambda i: (0, i)),
            scratch_shapes=[pltpu.VMEM((d_p, num_heads), jnp.float32)],
        ),
        compiler_params=pltpu.CompilerParams(
            dimension_semantics=("parallel",),
            vmem_limit_bytes=32 * 1024 * 1024,
        ),
        cost_estimate=pl.CostEstimate(
            flops=2 * num_heads * mp * d_p,
            transcendentals=0,
            bytes_accessed=4 * (2 * mp + (dh + dw) * num_heads + num_heads * mp),
        ),
    )

    def forward(table_high, table_width):
        out = call(idx, table_high, table_width)      # (H, mp) f32, lane-dense
        if mp == m:
            return out.reshape(num_heads, n, n)       # contiguous -> free reshape
        # TODO(synk): consumers that add this bias inside an attention kernel
        # should read the padded (H, mp) slab directly (padded lanes are exact
        # zeros) and skip this slice.
        return out[:, :m].reshape(num_heads, n, n)

    return forward


# ----------------------------------------------------------------------------
# Pure-JAX reference (matches F.embedding + add + permute exactly).
# ----------------------------------------------------------------------------
def _reference_forward(table_high, table_width, h_index, w_index):
    bias = table_high[h_index] + table_width[w_index]   # (N, N, H)
    return jnp.transpose(bias, (2, 0, 1))                # (H, N, N)


if __name__ == "__main__":
    # Small config: window 8x8 -> num_tokens 64, N = 65; 8 heads.
    window_size = (8, 8)
    num_heads = 8
    wh, ww = window_size
    dh, dw = 2 * wh + 2, 2 * ww + 2
    n = wh * ww + 1

    key = jax.random.PRNGKey(0)
    k_h, k_w = jax.random.split(key)
    # Parameters (zeros at init in the real module; random here so the check is
    # meaningful).  Plain f32 — no bf16 pre-rounding — the kernel's HIGHEST-
    # precision contraction must reproduce them exactly.
    table_high = jax.random.normal(k_h, (dh, num_heads), dtype=jnp.float32) * 0.05
    table_width = jax.random.normal(k_w, (dw, num_heads), dtype=jnp.float32) * 0.05

    forward = make_decoupled_relative_position_bias(window_size, num_heads)
    fwd = jax.jit(forward)
    out = jax.block_until_ready(fwd(table_high, table_width))

    h_index_np, w_index_np = build_relative_position_indices(window_size)
    ref = _reference_forward(table_high, table_width,
                             jnp.asarray(h_index_np), jnp.asarray(w_index_np))

    assert out.shape == (num_heads, n, n), out.shape
    max_err = float(jnp.abs(out - ref).max())
    assert jnp.allclose(out, ref, atol=1e-5, rtol=1e-5), max_err

    print("KERNEL_OK")
</pallas_src>

<mosaic_0001>
module attributes {stable_mosaic.version = 11 : i64} {
  func.func @_two_hot_bias_kernel(%arg0: i32, %arg1: memref<2x4225xi32, #tpu.memory_space<vmem>>, %arg2: memref<18x8xf32, #tpu.memory_space<vmem>>, %arg3: memref<18x8xf32, #tpu.memory_space<vmem>>, %arg4: memref<8x4225xf32, #tpu.memory_space<vmem>>, %arg5: memref<48x8xf32, #tpu.memory_space<vmem>>) attributes {dimension_semantics = [#tpu.dimension_semantics<parallel>], iteration_bounds = array<i64: 1>, scalar_prefetch = 0 : i64, scratch_operands = 1 : i64, tpu.core_type = #tpu.core_type<tc>, window_params = [{transform_indices = @transform_0, window_bounds = array<i64: 2, 4225>}, {pipeline_mode = #tpu.pipeline_mode<synchronous>, transform_indices = @transform_1, window_bounds = array<i64: 18, 8>}, {pipeline_mode = #tpu.pipeline_mode<synchronous>, transform_indices = @transform_2, window_bounds = array<i64: 18, 8>}, {transform_indices = @transform_3, window_bounds = array<i64: 8, 4225>}]} {
    %cst = arith.constant 0.000000e+00 : f32
    %0 = vector.broadcast %cst : f32 to vector<48x8xf32>
    %c0 = arith.constant 0 : index
    %c0_0 = arith.constant 0 : index
    %1 = vector.load %arg5[%c0, %c0_0] : memref<48x8xf32, #tpu.memory_space<vmem>>, vector<48x8xf32>
    tpu.vector_store %arg5[%c0, %c0_0], %0 {strides = array<i32>} : memref<48x8xf32, #tpu.memory_space<vmem>>, vector<48x8xf32>,
    %c0_1 = arith.constant 0 : index
    %c0_2 = arith.constant 0 : index
    %2 = vector.load %arg2[%c0_1, %c0_2] : memref<18x8xf32, #tpu.memory_space<vmem>>, vector<18x8xf32>
    %c0_3 = arith.constant 0 : index
    %c0_4 = arith.constant 0 : index
    %3 = vector.load %arg5[%c0_3, %c0_4] : memref<48x8xf32, #tpu.memory_space<vmem>>, vector<18x8xf32>
    tpu.vector_store %arg5[%c0_3, %c0_4], %2 {strides = array<i32>} : memref<48x8xf32, #tpu.memory_space<vmem>>, vector<18x8xf32>,
    %c0_5 = arith.constant 0 : index
    %c0_6 = arith.constant 0 : index
    %4 = vector.load %arg3[%c0_5, %c0_6] : memref<18x8xf32, #tpu.memory_space<vmem>>, vector<18x8xf32>
    %c24 = arith.constant 24 : index
    %c0_7 = arith.constant 0 : index
    %5 = vector.load %arg5[%c24, %c0_7] : memref<48x8xf32, #tpu.memory_space<vmem>>, vector<18x8xf32>
    tpu.vector_store %arg5[%c24, %c0_7], %4 {strides = array<i32>} : memref<48x8xf32, #tpu.memory_space<vmem>>, vector<18x8xf32>,
    %6 = tpu.iota {dimensions = array<i32: 0>} : vector<48x4225xi32>
    %c0_8 = arith.constant 0 : index
    %c0_9 = arith.constant 0 : index
    %7 = vector.load %arg1[%c0_8, %c0_9] : memref<2x4225xi32, #tpu.memory_space<vmem>>, vector<1x4225xi32>
    %8 = vector.broadcast %7 : vector<1x4225xi32> to vector<48x4225xi32>
    %9 = arith.cmpi eq, %6, %8 : vector<48x4225xi32>
    %c1 = arith.constant 1 : index
    %c0_10 = arith.constant 0 : index
    %10 = vector.load %arg1[%c1, %c0_10] : memref<2x4225xi32, #tpu.memory_space<vmem>>, vector<1x4225xi32>
    %11 = vector.broadcast %10 : vector<1x4225xi32> to vector<48x4225xi32>
    %12 = arith.cmpi eq, %6, %11 : vector<48x4225xi32>
    %13 = arith.ori %9, %12 : vector<48x4225xi1>
    %14 = arith.extui %13 : vector<48x4225xi1> to vector<48x4225xi32>
    %15 = arith.sitofp %14 : vector<48x4225xi32> to vector<48x4225xf32>
    %c0_11 = arith.constant 0 : index
    %c0_12 = arith.constant 0 : index
    %16 = vector.load %arg5[%c0_11, %c0_12] : memref<48x8xf32, #tpu.memory_space<vmem>>, vector<48x8xf32>
    %17 = tpu.transpose %16, [1, 0] : vector<48x8xf32> -> vector<8x48xf32>
    %cst_13 = arith.constant dense<0.000000e+00> : vector<8x4225xf32>
    %18 = tpu.matmul %17, %15, %cst_13 {dimension_numbers = #tpu.dot_dimension_numbers<[1], [0], [0], [1], [0, 0, 1, 1], [], []>, precision = #tpu.contract_precision<fp32>} : vector<8x48xf32>, vector<48x4225xf32>, vector<8x4225xf32> -> vector<8x4225xf32>
    %c0_14 = arith.constant 0 : index
    %c0_15 = arith.constant 0 : index
    %19 = vector.load %arg4[%c0_14, %c0_15] : memref<8x4225xf32, #tpu.memory_space<vmem>>, vector<8x4225xf32>
    tpu.vector_store %arg4[%c0_14, %c0_15], %18 {strides = array<i32>} : memref<8x4225xf32, #tpu.memory_space<vmem>>, vector<8x4225xf32>,
    return
  }
  func.func @transform_0(%arg0: i32) -> (i32, i32) {
    %c0_i32 = arith.constant 0 : i32
    %c0_i32_0 = arith.constant 0 : i32
    return %c0_i32, %arg0 : i32, i32
  }
  func.func @transform_1(%arg0: i32) -> (i32, i32) {
    %c0_i32 = arith.constant 0 : i32
    %c0_i32_0 = arith.constant 0 : i32
    %c0_i32_1 = arith.constant 0 : i32
    return %c0_i32, %c0_i32_0 : i32, i32
  }
  func.func @transform_2(%arg0: i32) -> (i32, i32) {
    %c0_i32 = arith.constant 0 : i32
    %c0_i32_0 = arith.constant 0 : i32
    %c0_i32_1 = arith.constant 0 : i32
    return %c0_i32, %c0_i32_0 : i32, i32
  }
  func.func @transform_3(%arg0: i32) -> (i32, i32) {
    %c0_i32 = arith.constant 0 : i32
    %c0_i32_0 = arith.constant 0 : i32
    return %c0_i32, %arg0 : i32, i32
  }
}

</mosaic_0001>

<bundles_post_ra>
// kernel: forward.1
= control target key start
LH: loop header
LB: loop body
LE: loop exit
PB: predicated region body
PF: predicated region fallthrough
CT: control target
= control target key end

     0   :  { %8 = vsyncpa [#allocation4], 0  ;;  %s9271_s15 = smov [#allocation3]   ;;  %s16359_s0 = inlined_call_operand.hbm [shape: s32[2,4225], index: 0, kind: input, shape index: {}]   ;;  %s16360_s1 = inlined_call_operand.vmem [shape: f32[18,8], index: 1, kind: input, shape index: {}]   ;;  %s16361_s2 = inlined_call_operand.vmem [shape: f32[18,8], index: 2, kind: input, shape index: {}]   ;;  %s16362_s3 = inlined_call_operand.vmem [shape: f32[8,4225], index: 3, kind: output, shape index: {}]  }
   0x1   :  { %s14_s14 = sshll.u32 %s16359_s0, 4  ;;  %s16_s16 = sshll.u32 %s9271_s15, 4  ;;  %s15_s14 = int_to_ptr.hbm [resolvable:$true] %s14_s14  ;;  %s17_s16 = int_to_ptr.vmem [resolvable:$true] %s16_s16 }
   0x2   :  { %19 = dma.hbm_to_vmem [thread:$0]  %s15_s14, 1088, %s17_s16, [#allocation4]  }
   0x3   :  { %9269 = dma.done.wait [#allocation4], 1088  }
   0x4   :  { %9270 = vsyncadd [#allocation4], 4294966208  ;;  %vm28_vm0 = vcmask 64512   ;;  %v9272_v0 = vmov 0.0   ;;  %v35_v1 = vld [vmem:[%s16360_s1] sm:$0xff]  ;;  %v36_v2 = vld [vmem:[%s16360_s1 + $0x8] sm:$0xff]  ;;  %v48_v9 = vlaneseq }
   0x5   :  { %29 = vst.msk [vmem:[#allocation2] sm:$0xff] %vm28_vm0, %v9272_v0  ;;  %v37_v3 = vld [vmem:[%s16360_s1 + $0x10] sm:$0x3]  ;;  %vm40_vm1 = vcmask 58368   ;;  %v42_v4 = vld [vmem:[%s16361_s2] sm:$0xff]  ;;  %v43_v5 = vld [vmem:[%s16361_s2 + $0x8] sm:$0xff] }
   0x6   :  { %30 = vst.msk [vmem:[#allocation2 + $0x8] sm:$0xff] %vm28_vm0, %v9272_v0  ;;  %v44_v7 = vld [vmem:[%s16361_s2 + $0x10] sm:$0x3]  ;;  %v9335_v12 = vshrl.u32 %v48_v9, 7  ;;  %v9273_v27 = vmov 1.0  }
   0x7   :  { %31 = vst.msk [vmem:[#allocation2 + $0x10] sm:$0xff] %vm28_vm0, %v9272_v0  ;;  %v9331_v10 = vld [vmem:[#allocation3] ss:$2 sm:$0xff]  ;;  %v9333_v11 = vld [vmem:[#allocation3 + $0x1] ss:$2 sm:$0xff] }
   0x8   :  { %32 = vst.msk [vmem:[#allocation2 + $0x18] sm:$0xff] %vm28_vm0, %v9272_v0  ;;  %v64_v13 = vperm.slane %v9331_v10, 0  ;;  %v312_v14 = vperm.slane %v9333_v11, 0  ;;  %v9340_v15 = vperm.slane %v9331_v10, 1  ;;  %v9343_v16 = vadd.s32 40, %v9335_v12 }
   0x9   :  { %33 = vst.msk [vmem:[#allocation2 + $0x20] sm:$0xff] %vm28_vm0, %v9272_v0  ;;  %v9346_v17 = vadd.s32 32, %v9335_v12  ;;  %v9349_v18 = vadd.s32 24, %v9335_v12  ;;  %v9352_v19 = vadd.s32 16, %v9335_v12  ;;  %v9355_v21 = vadd.s32 8, %v9335_v12 }
   0xa   :  { %34 = vst.msk [vmem:[#allocation2 + $0x28] sm:$0xff] %vm28_vm0, %v9272_v0  ;;  %vm98_vm2 = vcmp.eq.s32.totalorder %v9335_v12, %v64_v13  ;;  %vm346_vm3 = vcmp.eq.s32.totalorder %v9335_v12, %v312_v14  ;;  %v9360_v22 = vperm.slane %v9333_v11, 1  ;;  %vm268_vm4 = vcmp.eq.s32.totalorder %v9343_v16, %v64_v13 }
   0xb   :  { %38 = vst.msk [vmem:[#allocation2] sm:$0xff] %vm28_vm0, %v35_v1  ;;  %vm516_vm5 = vcmp.eq.s32.totalorder %v9343_v16, %v312_v14  ;;  %vm234_vm6 = vcmp.eq.s32.totalorder %v9346_v17, %v64_v13  ;;  %vm482_vm7 = vcmp.eq.s32.totalorder %v9346_v17, %v312_v14  ;;  %vm9366_vm8 = vmor %vm98_vm2, %vm346_vm3  ;;  %vm200_vm10 = vcmp.eq.s32.totalorder %v9349_v18, %v64_v13 }
   0xc   :  { %39 = vst.msk [vmem:[#allocation2 + $0x8] sm:$0xff] %vm28_vm0, %v36_v2  ;;  %vm9370_vm9 = vmor %vm268_vm4, %vm516_vm5  ;;  %vm448_vm11 = vcmp.eq.s32.totalorder %v9349_v18, %v312_v14  ;;  %vm166_vm12 = vcmp.eq.s32.totalorder %v9352_v19, %v64_v13  ;;  %vm414_vm13 = vcmp.eq.s32.totalorder %v9352_v19, %v312_v14  ;;  %vm132_vm15 = vcmp.eq.s32.totalorder %v9355_v21, %v64_v13 }
   0xd   :  { %41 = vst.msk [vmem:[#allocation2 + $0x10] sm:$0x3] %vm40_vm1, %v37_v3  ;;  %v8588_v25 = vsel %vm9370_vm9, 1.0, %v9272_v0  ;;  %vm9381_vm14 = vmor %vm234_vm6, %vm482_vm7  ;;  %8628 = vmatpush.msk.msra.mxu3 %vm9370_vm9, %v9273_v27  ;;  %v8418_v28 = vsel %vm9366_vm8, 1.0, %v9272_v0  ;;  %8622 = vmatpush.msk.msra.mxu0 %vm9370_vm9, %v9273_v27  ;;  %vm269_vm2 = vcmp.eq.s32.totalorder %v9343_v16, %v9340_v15  ;;  %vm517_vm4 = vcmp.eq.s32.totalorder %v9343_v16, %v9360_v22 }
   0xe   :  { %45 = vst.msk [vmem:[#allocation2 + $0x18] sm:$0xff] %vm28_vm0, %v42_v4  ;;  %v9393_v29 = vsub.f32 %v8588_v25, %v8588_v25  ;;  %v8554_v30 = vsel %vm9381_vm14, 1.0, %v9272_v0  ;;  %vm9416_vm3 = vmor %vm166_vm12, %vm414_vm13  ;;  %v9423_v35 = vsub.f32 %v8418_v28, %v8418_v28  ;;  %vm235_vm6 = vcmp.eq.s32.totalorder %v9346_v17, %v9340_v15 }
   0xf   :  { %46 = vst.msk [vmem:[#allocation2 + $0x20] sm:$0xff] %vm28_vm0, %v43_v5  ;;  %vm380_vm0 = vcmp.eq.s32.totalorder %v9355_v21, %v312_v14  ;;  %v9407_v32 = vsub.f32 %v8554_v30, %v8554_v30  ;;  %8629 = vmatpush.msk.msra.mxu3 %vm9381_vm14, %v9273_v27  ;;  %v8486_v38 = vsel %vm9416_vm3, 1.0, %v9272_v0  ;;  %8623 = vmatpush.msk.msra.mxu0 %vm9381_vm14, %v9273_v27  ;;  %vm9459_vm7 = vmor %vm269_vm2, %vm517_vm4 }
  0x10   :  { %47 = vst.msk [vmem:[#allocation2 + $0x28] sm:$0x3] %vm40_vm1, %v44_v7  ;;  %vm9398_vm1 = vmor %vm200_vm10, %vm448_vm11  ;;  %v1247_v36 = vand.u32 4294901760, %v9393_v29  ;;  %1298 = vmatpush.msra.mxu2 %v9393_v29  ;;  %v9448_v41 = vsub.f32 %v8486_v38, %v8486_v38  ;;  %vm483_vm10 = vcmp.eq.s32.totalorder %v9346_v17, %v9360_v22  ;;  %v8589_v51 = vsel %vm9459_vm7, 1.0, %v9272_v0 }
  0x11   :  { %v8520_v33 = vsel %vm9398_vm1, 1.0, %v9272_v0  ;;  %vm9438_vm5 = vmor %vm132_vm15, %vm380_vm0  ;;  %v1253_v40 = vand.u32 4294901760, %v9407_v32  ;;  %8630 = vmatpush.msk.msra.mxu3 %vm9398_vm1, %v9273_v27  ;;  %8624 = vmatpush.msk.msra.mxu0 %vm9398_vm1, %v9273_v27  ;;  %v1277_v55 = vand.u32 4294901760, %v9423_v35  ;;  %v9501_v58 = vsub.f32 %v8589_v51, %v8589_v51 }
  0x12   :  { %v1162_v6 = vld [vmem:[#allocation2] sm:$0xff]  ;;  %v9429_v37 = vsub.f32 %v8520_v33, %v8520_v33  ;;  %v8452_v42 = vsel %vm9438_vm5, 1.0, %v9272_v0  ;;  %v1248_v45 = vsub.f32 %v9393_v29, %v1247_v36  ;;  %1301 = vmatpush.msra.mxu2 %v9407_v32  ;;  %v1265_v49 = vand.u32 4294901760, %v9448_v41  ;;  %vm9483_vm11 = vmor %vm235_vm6, %vm483_vm10 }
  0x13   :  { %1168 = vxpose.xlu0.b32.start [1/6] (short) (narrow) %v1162_v6, 8  ;;  %v1163_v8 = vld [vmem:[#allocation2 + $0x8] sm:$0xff]  ;;  %v9468_v47 = vsub.f32 %v8452_v42, %v8452_v42  ;;  %v1254_v48 = vsub.f32 %v9407_v32, %v1253_v40  ;;  %8631 = vmatpush.msk.msra.mxu3 %vm9416_vm3, %v9273_v27  ;;  %v8555_v61 = vsel %vm9483_vm11, 1.0, %v9272_v0  ;;  %v1458_v62 = vand.u32 4294901760, %v9501_v58 }
  0x14   :  { %v1164_v20 = vld [vmem:[#allocation2 + $0x10] sm:$0xff]  ;;  %v1259_v46 = vand.u32 4294901760, %v9429_v37  ;;  %v1249_v52 = vand.u32 4294901760, %v1248_v45  ;;  %1304 = vmatpush.msra.mxu2 %v9429_v37  ;;  %8625 = vmatpush.msk.msra.mxu0 %vm9416_vm3, %v9273_v27  ;;  %v1266_v57 = vsub.f32 %v9448_v41, %v1265_v49  ;;  %v9515_v63 = vsub.f32 %v8555_v61, %v8555_v61 }
  0x15   :  { %v1165_v44 = vld [vmem:[#allocation2 + $0x18] sm:$0xff]  ;;  %v1271_v54 = vand.u32 4294901760, %v9468_v47  ;;  %v1255_v56 = vand.u32 4294901760, %v1254_v48  ;;  %8632 = vmatpush.msk.msra.mxu3 %vm9438_vm5, %v9273_v27  ;;  %v1278_v2 = vsub.f32 %v9423_v35, %v1277_v55  ;;  %v1459_v3 = vsub.f32 %v9501_v58, %v1458_v62 }
  0x16   :  { %v1260_v53 = vsub.f32 %v9429_v37, %v1259_v46  ;;  %1250 = vmatpush.msra.mxu1 %v1249_v52  ;;  %1307 = vmatpush.msra.mxu2 %v9448_v41  ;;  %v1267_v1 = vand.u32 4294901760, %v1266_v57  ;;  %v1464_v4 = vand.u32 4294901760, %v9515_v63  ;;  %v1166_v5 = vld [vmem:[#allocation2 + $0x20] sm:$0xff]  ;;  %vm201_vm12 = vcmp.eq.s32.totalorder %v9349_v18, %v9340_v15 }
  0x17   :  { %v1272_v60 = vsub.f32 %v9468_v47, %v1271_v54  ;;  %8633 = vmatpush.msk.msra.mxu3 %vm9366_vm8, %v9273_v27  ;;  %8626 = vmatpush.msk.msra.mxu0 %vm9438_vm5, %v9273_v27  ;;  %v1460_v7 = vand.u32 4294901760, %v1459_v3  ;;  %vm449_vm13 = vcmp.eq.s32.totalorder %v9349_v18, %v9360_v22  ;;  %v1279_v9 = vand.u32 4294901760, %v1278_v2 }
  0x18   :  { %v1261_v59 = vand.u32 4294901760, %v1260_v53  ;;  %1256 = vmatpush.msra.mxu1 %v1255_v56  ;;  %1310 = vmatpush.msra.mxu2 %v9468_v47  ;;  %vm9540_vm15 = vmor %vm201_vm12, %vm449_vm13  ;;  %vm347_vm4 = vcmp.eq.s32.totalorder %v9335_v12, %v9360_v22  ;;  %v314_v47 = vperm.slane %v9333_v11, 2 }
  0x19   :  { %8627 = vmatpush.msk.msra.mxu0 %vm9366_vm8, %v9273_v27  ;;  %v1273_v6 = vand.u32 4294901760, %v1272_v60  ;;  %1461 = vmatpush.msrb.mxu3 %v1460_v7  ;;  %v8521_v24 = vsel %vm9540_vm15, 1.0, %v9272_v0 }
  0x1a   :  { %1262 = vmatpush.msra.mxu1 %v1261_v59  ;;  %1313 = vmatpush.msra.mxu2 %v9423_v35  ;;  %v9578_v26 = vsub.f32 %v8521_v24, %v8521_v24  ;;  %vm518_vm10 = vcmp.eq.s32.totalorder %v9343_v16, %v314_v47 }
  0x1b   :  { %1169 = vxpose.xlu0.b32.cont [2/6] (short) (narrow) %v1163_v8, 8  ;;  %v1465_v8 = vsub.f32 %v9515_v63, %v1464_v4  ;;  %1362 = vmatpush.msrb.mxu0 %v1247_v36 }
  0x1c   :  { %8640 = vmatpush.msk.msrb.mxu2 %vm9459_vm7, %v9273_v27  ;;  %1268 = vmatpush.msra.mxu1 %v1267_v1  ;;  %v1470_v28 = vand.u32 4294901760, %v9578_v26 }
  0x1d   :  { %v1466_v13 = vand.u32 4294901760, %v1465_v8  ;;  %1366 = vmatpush.msrb.mxu0 %v1253_v40 }
  0x1e   :  { %8641 = vmatpush.msk.msrb.mxu2 %vm9483_vm11, %v9273_v27  ;;  %1274 = vmatpush.msra.mxu1 %v1273_v6  ;;  %v1471_v31 = vsub.f32 %v9578_v26, %v1470_v28 }
  0x1f   :  { %1467 = vmatpush.msrb.mxu3 %v1466_v13  ;;  %1370 = vmatpush.msrb.mxu0 %v1259_v46  ;;  %v66_v46 = vperm.slane %v9331_v10, 2 }
  0x20   :  { %8642 = vmatpush.msk.msrb.mxu2 %vm9540_vm15, %v9273_v27  ;;  %1280 = vmatpush.msra.mxu1 %v1279_v9  ;;  %v1472_v35 = vand.u32 4294901760, %v1471_v31  ;;  %v9735_v31 = vperm.slane %v9331_v10, 3 }
  0x21   :  { %1374 = vmatpush.msrb.mxu0 %v1265_v49  ;;  %vm270_vm6 = vcmp.eq.s32.totalorder %v9343_v16, %v66_v46  ;;  %vm236_vm13 = vcmp.eq.s32.totalorder %v9346_v17, %v66_v46 }
  0x22   :  { %8634 = vmatpush.msk.msrb.mxu1 %vm9370_vm9, %v9273_v27  ;;  %vm167_vm9 = vcmp.eq.s32.totalorder %v9352_v19, %v9340_v15  ;;  %1473 = vmatpush.msrb.mxu3 %v1472_v35  ;;  %vm9640_vm12 = vmor %vm270_vm6, %vm518_vm10  ;;  %vm168_vm6 = vcmp.eq.s32.totalorder %v9352_v19, %v66_v46  ;;  %vm416_vm10 = vcmp.eq.s32.totalorder %v9352_v19, %v314_v47 }
  0x23   :  { %1170 = vxpose.xlu0.b32.cont [3/6] (short) (narrow) %v1164_v20, 8  ;;  %v1167_v20 = vld [vmem:[#allocation2 + $0x28] sm:$0xff]  ;;  %1378 = vmatpush.msrb.mxu0 %v1271_v54  ;;  %v8590_v49 = vsel %vm9640_vm12, 1.0, %v9272_v0 }
  0x24   :  { %8635 = vmatpush.msk.msrb.mxu1 %vm9381_vm14, %v9273_v27  ;;  %vm415_vm14 = vcmp.eq.s32.totalorder %v9352_v19, %v9360_v22 }
  0x25   :  { %1382 = vmatpush.msrb.mxu0 %v1277_v55  ;;  %vm9574_vm0 = vmor %vm167_vm9, %vm415_vm14  ;;  %vm484_vm9 = vcmp.eq.s32.totalorder %v9346_v17, %v314_v47  ;;  %vm202_vm14 = vcmp.eq.s32.totalorder %v9349_v18, %v66_v46  ;;  %v9661_v55 = vsub.f32 %v8590_v49, %v8590_v49 }
  0x26   :  { %8636 = vmatpush.msk.msrb.mxu1 %vm9398_vm1, %v9273_v27  ;;  %8643 = vmatpush.msk.msrb.mxu2 %vm9574_vm0, %v9273_v27  ;;  %vm381_vm1 = vcmp.eq.s32.totalorder %v9355_v21, %v9360_v22  ;;  %v8487_v23 = vsel %vm9574_vm0, 1.0, %v9272_v0 }
  0x27   :  { %v9595_v30 = vsub.f32 %v8487_v23, %v8487_v23  ;;  %v1669_v2 = vand.u32 4294901760, %v9661_v55 }
  0x28   :  { %8637 = vmatpush.msk.msrb.mxu1 %vm9416_vm3, %v9273_v27  ;;  %vm99_vm3 = vcmp.eq.s32.totalorder %v9335_v12, %v9340_v15 }
  0x29   :  { %v1476_v32 = vand.u32 4294901760, %v9595_v30  ;;  %v1670_v13 = vsub.f32 %v9661_v55, %v1669_v2 }
  0x2a   :  { %8638 = vmatpush.msk.msrb.mxu1 %vm9438_vm5, %v9273_v27  ;;  %vm9608_vm5 = vmor %vm99_vm3, %vm347_vm4 }
  0x2b   :  { %1171 = vxpose.xlu0.b32.cont [4/6] (short) (narrow) %v1165_v44, 8  ;;  %v1477_v36 = vsub.f32 %v9595_v30, %v1476_v32  ;;  %v8419_v22 = vsel %vm9608_vm5, 1.0, %v9272_v0  ;;  %vm9651_vm3 = vmor %vm236_vm13, %vm484_vm9  ;;  %vm134_vm9 = vcmp.eq.s32.totalorder %v9355_v21, %v66_v46  ;;  %v1671_v50 = vand.u32 4294901760, %v1670_v13 }
  0x2c   :  { %8639 = vmatpush.msk.msrb.mxu1 %vm9366_vm8, %v9273_v27  ;;  %vm133_vm8 = vcmp.eq.s32.totalorder %v9355_v21, %v9340_v15  ;;  %v9626_v37 = vsub.f32 %v8419_v22, %v8419_v22  ;;  %v8556_v56 = vsel %vm9651_vm3, 1.0, %v9272_v0  ;;  %vm9671_vm13 = vmor %vm168_vm6, %vm416_vm10  ;;  %vm348_vm6 = vcmp.eq.s32.totalorder %v9335_v12, %v314_v47 }
  0x2d   :  { %vm9591_vm2 = vmor %vm133_vm8, %vm381_vm1  ;;  %v1478_v38 = vand.u32 4294901760, %v1477_v36  ;;  %vm450_vm8 = vcmp.eq.s32.totalorder %v9349_v18, %v314_v47  ;;  %vm1200_vm1 = vcmask 392192   ;;  %v9681_v1 = vsub.f32 %v8556_v56, %v8556_v56 }
  0x2e   :  { %8644 = vmatpush.msk.msrb.mxu2 %vm9591_vm2, %v9273_v27  ;;  %v8453_v34 = vsel %vm9591_vm2, 1.0, %v9272_v0  ;;  %v1488_v40 = vand.u32 4294901760, %v9626_v37  ;;  %vm9655_vm4 = vmor %vm202_vm14, %vm450_vm8  ;;  %vm382_vm14 = vcmp.eq.s32.totalorder %v9355_v21, %v314_v47  ;;  %v8488_v6 = vsel %vm9671_vm13, 1.0, %v9272_v0 }
  0x2f   :  { %v9621_v15 = vsub.f32 %v8453_v34, %v8453_v34  ;;  %1479 = vmatpush.msrb.mxu3 %v1478_v38  ;;  %v8522_v59 = vsel %vm9655_vm4, 1.0, %v9272_v0  ;;  %vm9696_vm8 = vmor %vm134_vm9, %vm382_vm14  ;;  %v1675_v9 = vand.u32 4294901760, %v9681_v1  ;;  %v9738_v34 = vperm.slane %v9333_v11, 3 }
  0x30   :  { %8645 = vmatpush.msk.msrb.mxu2 %vm9608_vm5, %v9273_v27  ;;  %v1489_v42 = vsub.f32 %v9626_v37, %v1488_v40  ;;  %v9687_v3 = vsub.f32 %v8522_v59, %v8522_v59  ;;  %vm237_vm9 = vcmp.eq.s32.totalorder %v9346_v17, %v9735_v31 }
  0x31   :  { %v1482_v39 = vand.u32 4294901760, %v9621_v15  ;;  %v1676_v43 = vsub.f32 %v9681_v1, %v1675_v9  ;;  %vm485_vm14 = vcmp.eq.s32.totalorder %v9346_v17, %v9738_v34 }
  0x32   :  { %v1490_v45 = vand.u32 4294901760, %v1489_v42 }
  0x33   :  { %1172 = vxpose.xlu0.b32.cont [5/6] (short) (narrow) %v1166_v5, 8  ;;  %v1483_v41 = vsub.f32 %v9621_v15, %v1482_v39 }
  0x35   :  { %v1484_v44 = vand.u32 4294901760, %v1483_v41 }
  0x37   :  { %1485 = vmatpush.msrb.mxu3 %v1484_v44 }
  0x39   :  { %1491 = vmatpush.msrb.mxu3 %v1490_v45 }
  0x3b   :  { %1173 = vxpose.xlu0.b32.end [6/6] (short) (narrow) %v1167_v20, 8  ;;  %v9719_v20 = vsub.f32 %v8488_v6, %v8488_v6 }
  0xb7   :  { %v1184_v53 = vpop.trf.xlu0 }
  0xb8   :  { %v1202_v54 = vsel %vm1200_vm1, %v1184_v53, 0  ;;  %vm100_vm1 = vcmp.eq.s32.totalorder %v9335_v12, %v66_v46 }
  0xb9   :  { %v9666_v57 = vand.u32 4294901760, %v1202_v54  ;;  %vm9724_vm10 = vmor %vm100_vm1, %vm348_vm6  ;;  %vm203_vm1 = vcmp.eq.s32.totalorder %v9349_v18, %v9735_v31  ;;  %vm451_vm6 = vcmp.eq.s32.totalorder %v9349_v18, %v9738_v34 }
  0xba   :  { %v8420_v36 = vsel %vm9724_vm10, 1.0, %v9272_v0 }
  0xbb   :  { %v9678_v61 = vsub.f32 %v1202_v54, %v9666_v57  ;;  %1282 = vmatmul.f32.vlgmr.msra.gmra.mxu1 %v9666_v57 }
  0xbc   :  { %8646 = vmatpush.msk.msra.mxu1 %vm9459_vm7, %v9273_v27 }
  0xbd   :  { %1316 = vmatmul.f32.vlgmr.msra.gmra.mxu2 %v9678_v61  ;;  %v9691_v5 = vand.u32 4294901760, %v9678_v61 }
  0xbe   :  { %8647 = vmatpush.msk.msra.mxu1 %vm9483_vm11, %v9273_v27  ;;  %1573 = vmatpush.msra.mxu2 %v1458_v62  ;;  %v8454_v62 = vsel %vm9696_vm8, 1.0, %v9272_v0 }
  0xbf   :  { %1345 = vmatmul.f32.vlgmr.msra.gmra.mxu3 %v9691_v5  ;;  %v1229_v8 = vsub.f32 %v9678_v61, %v9691_v5  ;;  %v9752_v35 = vsub.f32 %v8454_v62, %v8454_v62 }
  0xc0   :  { %8648 = vmatpush.msk.msra.mxu1 %vm9540_vm15, %v9273_v27  ;;  %1577 = vmatpush.msra.mxu2 %v1464_v4  ;;  %v1681_v4 = vand.u32 4294901760, %v9687_v3 }
  0xc1   :  { %8652 = vmatpush.msk.msra.mxu3 %vm9459_vm7, %v9273_v27  ;;  %v9731_v23 = vand.u32 4294901760, %v1229_v8  ;;  %vm271_vm7 = vcmp.eq.s32.totalorder %v9343_v16, %v9735_v31  ;;  %v1693_v38 = vand.u32 4294901760, %v9752_v35 }
  0xc2   :  { %8649 = vmatpush.msk.msra.mxu1 %vm9574_vm0, %v9273_v27  ;;  %1581 = vmatpush.msra.mxu2 %v1470_v28  ;;  %v1687_v28 = vand.u32 4294901760, %v9719_v20  ;;  %v1682_v22 = vsub.f32 %v9687_v3, %v1681_v4 }
  0xc3   :  { %8653 = vmatpush.msk.msra.mxu3 %vm9483_vm11, %v9273_v27  ;;  %1231 = vmatmul.f32.vlgmr.msra.gmra.mxu0 %v9731_v23  ;;  %vm519_vm11 = vcmp.eq.s32.totalorder %v9343_v16, %v9738_v34 }
  0xc4   :  { %1411 = vmatmul.f32.vlgmr.msrb.gmra.mxu1 %v9666_v57  ;;  %1509 = vmatpush.msra.mxu0 %v9501_v58  ;;  %v9776_v58 = vsub.f32 %v8420_v36, %v8420_v36  ;;  %v1683_v41 = vand.u32 4294901760, %v1682_v22  ;;  %v9924_v36 = vperm.slane %v9333_v11, 4 }
  0xc5   :  { %8650 = vmatpush.msk.msra.mxu1 %vm9591_vm2, %v9273_v27  ;;  %1585 = vmatpush.msra.mxu2 %v1476_v32  ;;  %v1677_v32 = vand.u32 4294901760, %v1676_v43  ;;  %v9921_v43 = vperm.slane %v9331_v10, 4 }
  0xc6   :  { %8654 = vmatpush.msk.msra.mxu3 %vm9540_vm15, %v9273_v27  ;;  %1442 = vmatmul.f32.vlgmr.msrb.gmra.mxu2 %v9731_v23  ;;  %vm9795_vm15 = vmor %vm271_vm7, %vm519_vm11  ;;  %v1699_v25 = vand.u32 4294901760, %v9776_v58  ;;  %vm169_vm7 = vcmp.eq.s32.totalorder %v9352_v19, %v9735_v31 }
  0xc7   :  { %1512 = vmatpush.msra.mxu0 %v9515_v63  ;;  %8651 = vmatpush.msk.msra.mxu1 %vm9608_vm5, %v9273_v27  ;;  %v1688_v63 = vsub.f32 %v9719_v20, %v1687_v28  ;;  %vm9833_vm11 = vmor %vm203_vm1, %vm451_vm6  ;;  %vm101_vm1 = vcmp.eq.s32.totalorder %v9335_v12, %v9735_v31  ;;  %vm349_vm6 = vcmp.eq.s32.totalorder %v9335_v12, %v9738_v34 }
  0xc8   :  { %1589 = vmatpush.msra.mxu2 %v1482_v39  ;;  %8655 = vmatpush.msk.msra.mxu3 %vm9574_vm0, %v9273_v27  ;;  %vm9804_vm0 = vmor %vm237_vm9, %vm485_vm14  ;;  %vm135_vm9 = vcmp.eq.s32.totalorder %v9355_v21, %v9735_v31  ;;  %vm383_vm14 = vcmp.eq.s32.totalorder %v9355_v21, %v9738_v34  ;;  %v8523_v49 = vsel %vm9833_vm11, 1.0, %v9272_v0 }
  0xc9   :  { %1672 = vmatpush.msrb.mxu1 %v1671_v50  ;;  %1493 = vmatmul.f32.vlgmr.msrb.gmra.mxu3 %v9666_v57  ;;  %v1689_v42 = vand.u32 4294901760, %v1688_v63  ;;  %v8557_v29 = vsel %vm9804_vm0, 1.0, %v9272_v0 }
  0xca   :  { %1515 = vmatpush.msra.mxu0 %v9578_v26  ;;  %1593 = vmatpush.msra.mxu2 %v1488_v40  ;;  %v1694_v26 = vsub.f32 %v9752_v35, %v1693_v38  ;;  %v8591_v40 = vsel %vm9795_vm15, 1.0, %v9272_v0  ;;  %v9857_v47 = vsub.f32 %v8557_v29, %v8557_v29 }
  0xcb   :  { %8656 = vmatpush.msk.msra.mxu3 %vm9591_vm2, %v9273_v27  ;;  %1678 = vmatpush.msrb.mxu1 %v1677_v32  ;;  %vm417_vm2 = vcmp.eq.s32.totalorder %v9352_v19, %v9738_v34  ;;  %v9844_v33 = vsub.f32 %v8591_v40, %v8591_v40 }
  0xcc   :  { %1720 = vmatpush.msrb.mxu2 %v9661_v55  ;;  %1518 = vmatpush.msra.mxu0 %v9595_v30  ;;  %v1700_v30 = vsub.f32 %v9776_v58, %v1699_v25  ;;  %v1695_v45 = vand.u32 4294901760, %v1694_v26  ;;  %v1886_v6 = vand.u32 4294901760, %v9857_v47 }
  0xcd   :  { %8657 = vmatpush.msk.msra.mxu3 %vm9608_vm5, %v9273_v27  ;;  %1684 = vmatpush.msrb.mxu1 %v1683_v41  ;;  %vm9848_vm5 = vmor %vm169_vm7, %vm417_vm2  ;;  %v1880_v53 = vand.u32 4294901760, %v9844_v33 }
  0xce   :  { %1723 = vmatpush.msrb.mxu2 %v9681_v1  ;;  %1384 = vmatmul.f32.vlgmr.msrb.gmra.mxu0 %v9666_v57  ;;  %v8489_v54 = vsel %vm9848_vm5, 1.0, %v9272_v0  ;;  %vm9879_vm7 = vmor %vm135_vm9, %vm383_vm14  ;;  %v1887_v50 = vsub.f32 %v9857_v47, %v1886_v6  ;;  %vm520_vm9 = vcmp.eq.s32.totalorder %v9343_v16, %v9924_v36  ;;  %vm486_vm14 = vcmp.eq.s32.totalorder %v9346_v17, %v9924_v36 }
  0xcf   :  { %8664 = vmatpush.msk.msrb.mxu3 %vm9640_vm12, %v9273_v27  ;;  %1556 = vmatmul.f32.vlgmr.msra.gmra.mxu1 %v9691_v5  ;;  %vm9888_vm2 = vmor %vm101_vm1, %vm349_vm6  ;;  %v9901_v8 = vsub.f32 %v8489_v54, %v8489_v54  ;;  %v8455_v13 = vsel %vm9879_vm7, 1.0, %v9272_v0  ;;  %v1881_v62 = vsub.f32 %v9844_v33, %v1880_v53  ;;  %vm204_vm6 = vcmp.eq.s32.totalorder %v9349_v18, %v9921_v43 }
  0xd0   :  { %1521 = vmatpush.msra.mxu0 %v9621_v15  ;;  %1690 = vmatpush.msrb.mxu1 %v1689_v42  ;;  %v1701_v15 = vand.u32 4294901760, %v1700_v30  ;;  %v8421_v31 = vsel %vm9888_vm2, 1.0, %v9272_v0  ;;  %v9933_v48 = vsub.f32 %v8455_v13, %v8455_v13  ;;  %v1888_v51 = vand.u32 4294901760, %v1887_v50 }
  0xd1   :  { %1726 = vmatpush.msrb.mxu2 %v9687_v3  ;;  %8665 = vmatpush.msk.msrb.mxu3 %vm9651_vm3, %v9273_v27  ;;  %v1898_v22 = vand.u32 4294901760, %v9901_v8  ;;  %v9940_v32 = vsub.f32 %v8421_v31, %v8421_v31  ;;  %v1882_v63 = vand.u32 4294901760, %v1881_v62 }
  0xd2   :  { %1524 = vmatpush.msra.mxu0 %v9626_v37  ;;  %1595 = vmatmul.f32.vlgmr.msra.gmra.mxu2 %v9666_v57  ;;  %v9886_v37 = vsub.f32 %v8523_v49, %v8523_v49  ;;  %v1904_v26 = vand.u32 4294901760, %v9933_v48 }
  0xd3   :  { %1696 = vmatpush.msrb.mxu1 %v1695_v45  ;;  %1729 = vmatpush.msrb.mxu2 %v9719_v20  ;;  %v1899_v40 = vsub.f32 %v9901_v8, %v1898_v22  ;;  %v1910_v42 = vand.u32 4294901760, %v9940_v32  ;;  %v10107_v20 = vperm.slane %v9333_v11, 5 }
  0xd4   :  { %8658 = vmatpush.msk.msrb.mxu0 %vm9640_vm12, %v9273_v27  ;;  %8666 = vmatpush.msk.msrb.mxu3 %vm9655_vm4, %v9273_v27  ;;  %v1892_v34 = vand.u32 4294901760, %v9886_v37  ;;  %v1905_v30 = vsub.f32 %v9933_v48, %v1904_v26 }
  0xd5   :  { %1622 = vmatmul.f32.vlgmr.msra.gmra.mxu3 %v9666_v57  ;;  %1702 = vmatpush.msrb.mxu1 %v1701_v15  ;;  %v1900_v60 = vand.u32 4294901760, %v1899_v40  ;;  %v1911_v49 = vsub.f32 %v9940_v32, %v1910_v42 }
  0xd6   :  { %8659 = vmatpush.msk.msrb.mxu0 %vm9651_vm3, %v9273_v27  ;;  %1732 = vmatpush.msrb.mxu2 %v9752_v35  ;;  %v1893_v41 = vsub.f32 %v9886_v37, %v1892_v34 }
  0xd7   :  { %8667 = vmatpush.msk.msrb.mxu3 %vm9671_vm13, %v9273_v27  ;;  %8670 = vmatpush.msk.msra.mxu1 %vm9640_vm12, %v9273_v27  ;;  %vm272_vm12 = vcmp.eq.s32.totalorder %v9343_v16, %v9921_v43  ;;  %v1912_v1 = vand.u32 4294901760, %v1911_v49 }
  0xd8   :  { %8660 = vmatpush.msk.msrb.mxu0 %vm9655_vm4, %v9273_v27  ;;  %1735 = vmatpush.msrb.mxu2 %v9776_v58  ;;  %v1894_v29 = vand.u32 4294901760, %v1893_v41 }
  0xd9   :  { %8668 = vmatpush.msk.msrb.mxu3 %vm9696_vm8, %v9273_v27  ;;  %1527 = vmatmul.f32.vlgmr.msra.gmra.mxu0 %v9678_v61 }
  0xda   :  { %1704 = vmatmul.f32.vlgmr.msrb.gmra.mxu1 %v9666_v57  ;;  %8676 = vmatpush.msk.msra.mxu2 %vm9795_vm15, %v9273_v27 }
  0xdb   :  { %8671 = vmatpush.msk.msra.mxu1 %vm9651_vm3, %v9273_v27  ;;  %8661 = vmatpush.msk.msrb.mxu0 %vm9671_vm13, %v9273_v27  ;;  %vm238_vm3 = vcmp.eq.s32.totalorder %v9346_v17, %v9921_v43 }
  0xdc   :  { %8669 = vmatpush.msk.msrb.mxu3 %vm9724_vm10, %v9273_v27  ;;  %1738 = vmatmul.f32.vlgmr.msrb.gmra.mxu2 %v9678_v61  ;;  %vm9995_vm1 = vmor %vm238_vm3, %vm486_vm14  ;;  %vm136_vm3 = vcmp.eq.s32.totalorder %v9355_v21, %v9921_v43  ;;  %vm384_vm14 = vcmp.eq.s32.totalorder %v9355_v21, %v9924_v36 }
  0xdd   :  { %8672 = vmatpush.msk.msra.mxu1 %vm9655_vm4, %v9273_v27  ;;  %8677 = vmatpush.msk.msra.mxu2 %vm9804_vm0, %v9273_v27  ;;  %vm9981_vm4 = vmor %vm272_vm12, %vm520_vm9  ;;  %vm170_vm12 = vcmp.eq.s32.totalorder %v9352_v19, %v9921_v43  ;;  %v8558_v7 = vsel %vm9995_vm1, 1.0, %v9272_v0 }
  0xde   :  { %1883 = vmatpush.msra.mxu3 %v1882_v63  ;;  %8662 = vmatpush.msk.msrb.mxu0 %vm9696_vm8, %v9273_v27  ;;  %v8592_v15 = vsel %vm9981_vm4, 1.0, %v9272_v0  ;;  %v10056_v24 = vsub.f32 %v8558_v7, %v8558_v7  ;;  %v10104_v63 = vperm.slane %v9331_v10, 5 }
  0xdf   :  { %1767 = vmatmul.f32.vlgmr.msrb.gmra.mxu3 %v9691_v5  ;;  %8673 = vmatpush.msk.msra.mxu1 %vm9671_vm13, %v9273_v27  ;;  %vm452_vm13 = vcmp.eq.s32.totalorder %v9349_v18, %v9924_v36  ;;  %v10037_v54 = vsub.f32 %v8592_v15, %v8592_v15 }
  0xe0   :  { %8678 = vmatpush.msk.msra.mxu2 %vm9833_vm11, %v9273_v27  ;;  %1889 = vmatpush.msra.mxu3 %v1888_v51  ;;  %vm10028_vm9 = vmor %vm204_vm6, %vm452_vm13  ;;  %vm350_vm13 = vcmp.eq.s32.totalorder %v9335_v12, %v9924_v36 }
  0xe1   :  { %8663 = vmatpush.msk.msrb.mxu0 %vm9724_vm10, %v9273_v27  ;;  %8674 = vmatpush.msk.msra.mxu1 %vm9696_vm8, %v9273_v27  ;;  %vm418_vm8 = vcmp.eq.s32.totalorder %v9352_v19, %v9924_v36  ;;  %v8524_v13 = vsel %vm10028_vm9, 1.0, %v9272_v0  ;;  %v2097_v36 = vand.u32 4294901760, %v10056_v24 }
  0xe2   :  { %8679 = vmatpush.msk.msra.mxu2 %vm9848_vm5, %v9273_v27  ;;  %1895 = vmatpush.msra.mxu3 %v1894_v29  ;;  %vm10049_vm6 = vmor %vm170_vm12, %vm418_vm8  ;;  %v10085_v31 = vsub.f32 %v8524_v13, %v8524_v13 }
  0xe3   :  { %1784 = vmatpush.msra.mxu0 %v1669_v2  ;;  %8675 = vmatpush.msk.msra.mxu1 %vm9724_vm10, %v9273_v27  ;;  %v1906_v2 = vand.u32 4294901760, %v1905_v30  ;;  %vm102_vm10 = vcmp.eq.s32.totalorder %v9335_v12, %v9921_v43  ;;  %vm10071_vm12 = vmor %vm136_vm3, %vm384_vm14  ;;  %v8490_v62 = vsel %vm10049_vm6, 1.0, %v9272_v0  ;;  %v2098_v35 = vsub.f32 %v10056_v24, %v2097_v36 }
  0xe4   :  { %1653 = vmatmul.f32.vlgmr.msrb.gmra.mxu0 %v9731_v23  ;;  %8680 = vmatpush.msk.msra.mxu2 %vm9879_vm7, %v9273_v27  ;;  %vm10087_vm8 = vmor %vm102_vm10, %vm350_vm13  ;;  %v8456_v50 = vsel %vm10071_vm12, 1.0, %v9272_v0  ;;  %vm239_vm3 = vcmp.eq.s32.totalorder %v9346_v17, %v10104_v63  ;;  %vm487_vm14 = vcmp.eq.s32.totalorder %v9346_v17, %v10107_v20  ;;  %vm205_vm10 = vcmp.eq.s32.totalorder %v9349_v18, %v10104_v63 }
  0xe5   :  { %1788 = vmatpush.msra.mxu0 %v1675_v9  ;;  %1901 = vmatpush.msra.mxu3 %v1900_v60  ;;  %v8422_v41 = vsel %vm10087_vm8, 1.0, %v9272_v0  ;;  %v10126_v51 = vsub.f32 %v8456_v50, %v8456_v50  ;;  %v2099_v44 = vand.u32 4294901760, %v2098_v35  ;;  %vm453_vm13 = vcmp.eq.s32.totalorder %v9349_v18, %v10107_v20 }
  0xe6   :  { %1833 = vmatmul.f32.vlgmr.msra.gmra.mxu1 %v9666_v57  ;;  %8681 = vmatpush.msk.msra.mxu2 %vm9888_vm2, %v9273_v27  ;;  %v10142_v14 = vsub.f32 %v8422_v41, %v8422_v41  ;;  %v10302_v35 = vperm.slane %v9331_v10, 6 }
  0xe7   :  { %1792 = vmatpush.msra.mxu0 %v1681_v4  ;;  %8682 = vmatpush.msk.msrb.mxu1 %vm9795_vm15, %v9273_v27  ;;  %v2091_v4 = vand.u32 4294901760, %v10037_v54  ;;  %v2115_v39 = vand.u32 4294901760, %v10126_v51 }
  0xe8   :  { %1907 = vmatpush.msra.mxu3 %v1906_v2  ;;  %1864 = vmatmul.f32.vlgmr.msra.gmra.mxu2 %v9731_v23 }
  0xe9   :  { %8683 = vmatpush.msk.msrb.mxu1 %vm9804_vm0, %v9273_v27  ;;  %1995 = vmatpush.msrb.mxu2 %v1880_v53  ;;  %v10101_v53 = vsub.f32 %v8490_v62, %v8490_v62 }
  0xea   :  { %1796 = vmatpush.msra.mxu0 %v1687_v28  ;;  %1913 = vmatpush.msra.mxu3 %v1912_v1  ;;  %v2092_v28 = vsub.f32 %v10037_v54, %v2091_v4 }
  0xeb   :  { %1915 = vmatmul.f32.vlgmr.msra.gmra.mxu3 %v9666_v57  ;;  %8684 = vmatpush.msk.msrb.mxu1 %vm9833_vm11, %v9273_v27 }
  0xec   :  { %1999 = vmatpush.msrb.mxu2 %v1886_v6  ;;  %8688 = vmatpush.msk.msrb.mxu3 %vm9795_vm15, %v9273_v27  ;;  %v2103_v6 = vand.u32 4294901760, %v10085_v31  ;;  %vm273_vm15 = vcmp.eq.s32.totalorder %v9343_v16, %v10104_v63  ;;  %v2093_v58 = vand.u32 4294901760, %v2092_v28 }
  0xed   :  { %1800 = vmatpush.msra.mxu0 %v1693_v38  ;;  %8685 = vmatpush.msk.msrb.mxu1 %vm9848_vm5, %v9273_v27  ;;  %v2109_v38 = vand.u32 4294901760, %v10101_v53 }
  0xee   :  { %2003 = vmatpush.msrb.mxu2 %v1892_v34  ;;  %8689 = vmatpush.msk.msrb.mxu3 %vm9804_vm0, %v9273_v27  ;;  %vm521_vm0 = vcmp.eq.s32.totalorder %v9343_v16, %v10107_v20 }
  0xef   :  { %1804 = vmatpush.msra.mxu0 %v1699_v25  ;;  %8686 = vmatpush.msk.msrb.mxu1 %vm9879_vm7, %v9273_v27  ;;  %v2104_v25 = vsub.f32 %v10085_v31, %v2103_v6  ;;  %v2110_v34 = vsub.f32 %v10101_v53, %v2109_v38 }
  0xf0   :  { %1806 = vmatmul.f32.vlgmr.msra.gmra.mxu0 %v9666_v57  ;;  %2007 = vmatpush.msrb.mxu2 %v1898_v22  ;;  %v2121_v22 = vand.u32 4294901760, %v10142_v14 }
  0xf1   :  { %1931 = vmatpush.msrb.mxu0 %v9844_v33  ;;  %8690 = vmatpush.msk.msrb.mxu3 %vm9833_vm11, %v9273_v27  ;;  %vm10168_vm11 = vmor %vm273_vm15, %vm521_vm0  ;;  %vm171_vm0 = vcmp.eq.s32.totalorder %v9352_v19, %v10104_v63 }
  0xf2   :  { %8687 = vmatpush.msk.msrb.mxu1 %vm9888_vm2, %v9273_v27  ;;  %2011 = vmatpush.msrb.mxu2 %v1904_v26  ;;  %vm10187_vm15 = vmor %vm239_vm3, %vm487_vm14  ;;  %v2116_v26 = vsub.f32 %v10126_v51, %v2115_v39  ;;  %v8593_v40 = vsel %vm10168_vm11, 1.0, %v9272_v0  ;;  %vm419_vm3 = vcmp.eq.s32.totalorder %v9352_v19, %v10107_v20  ;;  %v2122_v56 = vsub.f32 %v10142_v14, %v2121_v22 }
  0xf3   :  { %1934 = vmatpush.msrb.mxu0 %v9857_v47  ;;  %8691 = vmatpush.msk.msrb.mxu3 %vm9848_vm5, %v9273_v27  ;;  %v2105_v47 = vand.u32 4294901760, %v2104_v25  ;;  %vm10202_vm5 = vmor %vm205_vm10, %vm453_vm13  ;;  %v8559_v29 = vsel %vm10187_vm15, 1.0, %v9272_v0  ;;  %v10221_v30 = vsub.f32 %v8593_v40, %v8593_v40  ;;  %vm385_vm14 = vcmp.eq.s32.totalorder %v9355_v21, %v10107_v20 }
  0xf4   :  { %1978 = vmatmul.f32.vlgmr.msrb.gmra.mxu1 %v9691_v5  ;;  %2015 = vmatpush.msrb.mxu2 %v1910_v42  ;;  %v2117_v60 = vand.u32 4294901760, %v2116_v26  ;;  %v10245_v49 = vsub.f32 %v8559_v29, %v8559_v29  ;;  %vm103_vm13 = vcmp.eq.s32.totalorder %v9335_v12, %v10104_v63  ;;  %v2123_v7 = vand.u32 4294901760, %v2122_v56 }
  0xf5   :  { %2094 = vmatpush.msra.mxu1 %v2093_v58  ;;  %1937 = vmatpush.msrb.mxu0 %v9886_v37  ;;  %v2111_v37 = vand.u32 4294901760, %v2110_v34  ;;  %v10305_v58 = vperm.slane %v9333_v11, 6 }
  0xf6   :  { %8692 = vmatpush.msk.msrb.mxu3 %vm9879_vm7, %v9273_v27  ;;  %2017 = vmatmul.f32.vlgmr.msrb.gmra.mxu2 %v9666_v57  ;;  %vm137_vm7 = vcmp.eq.s32.totalorder %v9355_v21, %v10104_v63  ;;  %v2308_v13 = vand.u32 4294901760, %v10245_v49 }
  0xf7   :  { %2100 = vmatpush.msra.mxu1 %v2099_v44  ;;  %2142 = vmatpush.msra.mxu2 %v10037_v54  ;;  %vm10248_vm10 = vmor %vm137_vm7, %vm385_vm14  ;;  %vm522_vm7 = vcmp.eq.s32.totalorder %v9343_v16, %v10305_v58  ;;  %vm240_vm14 = vcmp.eq.s32.totalorder %v9346_v17, %v10302_v35 }
  0xf8   :  { %1940 = vmatpush.msrb.mxu0 %v9901_v8  ;;  %8693 = vmatpush.msk.msrb.mxu3 %vm9888_vm2, %v9273_v27  ;;  %v8525_v8 = vsel %vm10202_vm5, 1.0, %v9272_v0  ;;  %vm10237_vm2 = vmor %vm171_vm0, %vm419_vm3  ;;  %vm351_vm0 = vcmp.eq.s32.totalorder %v9335_v12, %v10107_v20  ;;  %v8457_v62 = vsel %vm10248_vm10, 1.0, %v9272_v0  ;;  %v2309_v25 = vsub.f32 %v10245_v49, %v2308_v13 }
  0xf9   :  { %2044 = vmatmul.f32.vlgmr.msrb.gmra.mxu3 %v9666_v57  ;;  %2106 = vmatpush.msra.mxu1 %v2105_v47  ;;  %v10261_v2 = vsub.f32 %v8525_v8, %v8525_v8  ;;  %v8491_v1 = vsel %vm10237_vm2, 1.0, %v9272_v0  ;;  %vm10273_vm3 = vmor %vm103_vm13, %vm351_vm0  ;;  %v10296_v28 = vsub.f32 %v8457_v62, %v8457_v62  ;;  %vm206_vm13 = vcmp.eq.s32.totalorder %v9349_v18, %v10302_v35 }
  0xfa   :  { %2145 = vmatpush.msra.mxu2 %v10056_v24  ;;  %8700 = vmatpush.msk.msra.mxu3 %vm9981_vm4, %v9273_v27  ;;  %v8423_v41 = vsel %vm10273_vm3, 1.0, %v9272_v0  ;;  %v2310_v45 = vand.u32 4294901760, %v2309_v25  ;;  %vm454_vm0 = vcmp.eq.s32.totalorder %v9349_v18, %v10305_v58 }
  0xfb   :  { %1943 = vmatpush.msrb.mxu0 %v9933_v48  ;;  %2112 = vmatpush.msra.mxu1 %v2111_v37  ;;  %v2302_v48 = vand.u32 4294901760, %v10221_v30  ;;  %v2314_v20 = vand.u32 4294901760, %v10261_v2  ;;  %v10323_v44 = vsub.f32 %v8423_v41, %v8423_v41  ;;  %v2326_v34 = vand.u32 4294901760, %v10296_v28 }
  0xfc   :  { %2148 = vmatpush.msra.mxu2 %v10085_v31  ;;  %8701 = vmatpush.msk.msra.mxu3 %vm9995_vm1, %v9273_v27 }
  0xfd   :  { %1946 = vmatpush.msrb.mxu0 %v9940_v32  ;;  %2118 = vmatpush.msra.mxu1 %v2117_v60  ;;  %v10283_v32 = vsub.f32 %v8491_v1, %v8491_v1  ;;  %v2303_v63 = vsub.f32 %v10221_v30, %v2302_v48  ;;  %v2315_v52 = vsub.f32 %v10261_v2, %v2314_v20  ;;  %v2332_v26 = vand.u32 4294901760, %v10323_v44 }
  0xfe   :  { %1949 = vmatmul.f32.vlgmr.msrb.gmra.mxu0 %v9678_v61  ;;  %2151 = vmatpush.msra.mxu2 %v10101_v53  ;;  %v2327_v37 = vsub.f32 %v10296_v28, %v2326_v34  ;;  %v9237_v53 = vld [vmem:[#allocation3] ss:$2 sm:$0xff] }
  0xff   :  { %8694 = vmatpush.msk.msra.mxu0 %vm9981_vm4, %v9273_v27  ;;  %8702 = vmatpush.msk.msra.mxu3 %vm10028_vm9, %v9273_v27  ;;  %v2320_v10 = vand.u32 4294901760, %v10283_v32  ;;  %v2304_v11 = vand.u32 4294901760, %v2303_v63  ;;  %v2316_v55 = vand.u32 4294901760, %v2315_v52  ;;  %v2333_v3 = vsub.f32 %v10323_v44, %v2332_v26 }
 0x100   :  { %2124 = vmatpush.msra.mxu1 %v2123_v7  ;;  %2154 = vmatpush.msra.mxu2 %v10126_v51  ;;  %v2328_v60 = vand.u32 4294901760, %v2327_v37 }
 0x101   :  { %8695 = vmatpush.msk.msra.mxu0 %vm9995_vm1, %v9273_v27  ;;  %8703 = vmatpush.msk.msra.mxu3 %vm10049_vm6, %v9273_v27  ;;  %v2321_v47 = vsub.f32 %v10283_v32, %v2320_v10  ;;  %v2334_v43 = vand.u32 4294901760, %v2333_v3 }
 0x102   :  { %2126 = vmatmul.f32.vlgmr.msra.gmra.mxu1 %v9666_v57  ;;  %2157 = vmatpush.msra.mxu2 %v10142_v14 }
 0x103   :  { %8706 = vmatpush.msk.msrb.mxu1 %vm9981_vm4, %v9273_v27  ;;  %8696 = vmatpush.msk.msra.mxu0 %vm10028_vm9, %v9273_v27  ;;  %vm274_vm4 = vcmp.eq.s32.totalorder %v9343_v16, %v10302_v35  ;;  %v2322_v9 = vand.u32 4294901760, %v2321_v47 }
 0x104   :  { %8704 = vmatpush.msk.msra.mxu3 %vm10071_vm12, %v9273_v27  ;;  %2160 = vmatmul.f32.vlgmr.msra.gmra.mxu2 %v9678_v61 }
 0x105   :  { %8707 = vmatpush.msk.msrb.mxu1 %vm9995_vm1, %v9273_v27  ;;  %8712 = vmatpush.msk.msrb.mxu2 %vm10168_vm11, %v9273_v27  ;;  %vm10356_vm1 = vmor %vm274_vm4, %vm522_vm7  ;;  %vm420_vm4 = vcmp.eq.s32.totalorder %v9352_v19, %v10305_v58 }
 0x106   :  { %8697 = vmatpush.msk.msra.mxu0 %vm10049_vm6, %v9273_v27  ;;  %8705 = vmatpush.msk.msra.mxu3 %vm10087_vm8, %v9273_v27  ;;  %v8594_v56 = vsel %vm10356_vm1, 1.0, %v9272_v0  ;;  %vm10409_vm7 = vmor %vm206_vm13, %vm454_vm0  ;;  %vm104_vm0 = vcmp.eq.s32.totalorder %v9335_v12, %v10302_v35 }
 0x107   :  { %2189 = vmatmul.f32.vlgmr.msra.gmra.mxu3 %v9691_v5  ;;  %8708 = vmatpush.msk.msrb.mxu1 %vm10028_vm9, %v9273_v27  ;;  %vm488_vm9 = vcmp.eq.s32.totalorder %v9346_v17, %v10305_v58  ;;  %v10419_v7 = vsub.f32 %v8594_v56, %v8594_v56  ;;  %v8526_v1 = vsel %vm10409_vm7, 1.0, %v9272_v0 }
 0x108   :  { %8713 = vmatpush.msk.msrb.mxu2 %vm10187_vm15, %v9273_v27  ;;  %2305 = vmatpush.msrb.mxu3 %v2304_v11 }
 0x109   :  { %8698 = vmatpush.msk.msra.mxu0 %vm10071_vm12, %v9273_v27  ;;  %8709 = vmatpush.msk.msrb.mxu1 %vm10049_vm6, %v9273_v27  ;;  %vm10389_vm6 = vmor %vm240_vm14, %vm488_vm9  ;;  %vm138_vm14 = vcmp.eq.s32.totalorder %v9355_v21, %v10302_v35  ;;  %vm386_vm9 = vcmp.eq.s32.totalorder %v9355_v21, %v10305_v58  ;;  %v2513_v62 = vand.u32 4294901760, %v10419_v7 }
 0x10a   :  { %8714 = vmatpush.msk.msrb.mxu2 %vm10202_vm5, %v9273_v27  ;;  %2311 = vmatpush.msrb.mxu3 %v2310_v45  ;;  %v8560_v54 = vsel %vm10389_vm6, 1.0, %v9272_v0  ;;  %vm10448_vm13 = vmor %vm138_vm14, %vm386_vm9 }
 0x10b   :  { %8699 = vmatpush.msk.msra.mxu0 %vm10087_vm8, %v9273_v27  ;;  %8710 = vmatpush.msk.msrb.mxu1 %vm10071_vm12, %v9273_v27  ;;  %vm172_vm12 = vcmp.eq.s32.totalorder %v9352_v19, %v10302_v35  ;;  %v10446_v24 = vsub.f32 %v8560_v54, %v8560_v54  ;;  %v8458_v63 = vsel %vm10448_vm13, 1.0, %v9272_v0  ;;  %v2514_v11 = vsub.f32 %v10419_v7, %v2513_v62 }
 0x10c   :  { %2075 = vmatmul.f32.vlgmr.msra.gmra.mxu0 %v9731_v23  ;;  %8715 = vmatpush.msk.msrb.mxu2 %vm10237_vm2, %v9273_v27  ;;  %v10502_v45 = vsub.f32 %v8458_v63, %v8458_v63 }
 0x10d   :  { %2206 = vmatpush.msrb.mxu0 %v2091_v4  ;;  %2317 = vmatpush.msrb.mxu3 %v2316_v55  ;;  %v2515_v14 = vand.u32 4294901760, %v2514_v11 }
 0x10e   :  { %8711 = vmatpush.msk.msrb.mxu1 %vm10087_vm8, %v9273_v27  ;;  %8716 = vmatpush.msk.msrb.mxu2 %vm10248_vm10, %v9273_v27  ;;  %vm10430_vm8 = vmor %vm172_vm12, %vm420_vm4  ;;  %vm352_vm12 = vcmp.eq.s32.totalorder %v9335_v12, %v10305_v58  ;;  %v9238_v58 = vld [vmem:[#allocation3 + $0x1] ss:$2 sm:$0xff] }
 0x10f   :  { %2210 = vmatpush.msrb.mxu0 %v2097_v36  ;;  %2323 = vmatpush.msrb.mxu3 %v2322_v9  ;;  %v8492_v31 = vsel %vm10430_vm8, 1.0, %v9272_v0  ;;  %vm10473_vm4 = vmor %vm104_vm0, %vm352_vm12  ;;  %v10486_v25 = vperm.slane %v9238_v58, 7 }
 0x110   :  { %2255 = vmatmul.f32.vlgmr.msrb.gmra.mxu1 %v9666_v57  ;;  %8717 = vmatpush.msk.msrb.mxu2 %vm10273_vm3, %v9273_v27  ;;  %v10482_v35 = vsub.f32 %v8492_v31, %v8492_v31  ;;  %v8424_v33 = vsel %vm10473_vm4, 1.0, %v9272_v0 }
 0x111   :  { %8718 = vmatpush.msk.msra.mxu1 %vm10168_vm11, %v9273_v27  ;;  %2214 = vmatpush.msrb.mxu0 %v2103_v6  ;;  %v10466_v6 = vsub.f32 %v8526_v1, %v8526_v1  ;;  %vm523_vm14 = vcmp.eq.s32.totalorder %v9343_v16, %v10486_v25  ;;  %vm489_vm9 = vcmp.eq.s32.totalorder %v9346_v17, %v10486_v25 }
 0x112   :  { %2329 = vmatpush.msrb.mxu3 %v2328_v60  ;;  %2286 = vmatmul.f32.vlgmr.msrb.gmra.mxu2 %v9731_v23 }
 0x113   :  { %8719 = vmatpush.msk.msra.mxu1 %vm10187_vm15, %v9273_v27  ;;  %2417 = vmatpush.msra.mxu2 %v2302_v48  ;;  %v2519_v48 = vand.u32 4294901760, %v10446_v24  ;;  %v2525_v52 = vand.u32 4294901760, %v10466_v6 }
 0x114   :  { %2218 = vmatpush.msrb.mxu0 %v2109_v38  ;;  %2335 = vmatpush.msrb.mxu3 %v2334_v43  ;;  %v10484_v38 = vperm.slane %v9237_v53, 7  ;;  %v10664_v53 = vld [vmem:[#allocation3 + $0x10] ss:$2 sm:$0xff] }
 0x115   :  { %2337 = vmatmul.f32.vlgmr.msrb.gmra.mxu3 %v9666_v57  ;;  %8720 = vmatpush.msk.msra.mxu1 %vm10202_vm5, %v9273_v27  ;;  %v2520_v51 = vsub.f32 %v10446_v24, %v2519_v48  ;;  %v2526_v46 = vsub.f32 %v10466_v6, %v2525_v52 }
 0x116   :  { %2421 = vmatpush.msra.mxu2 %v2308_v13  ;;  %8724 = vmatpush.msk.msra.mxu3 %vm10168_vm11, %v9273_v27  ;;  %vm275_vm11 = vcmp.eq.s32.totalorder %v9343_v16, %v10484_v38  ;;  %v2537_v13 = vand.u32 4294901760, %v10502_v45  ;;  %vm207_vm12 = vcmp.eq.s32.totalorder %v9349_v18, %v10484_v38 }
 0x117   :  { %2222 = vmatpush.msrb.mxu0 %v2115_v39  ;;  %8721 = vmatpush.msk.msra.mxu1 %vm10237_vm2, %v9273_v27  ;;  %v2531_v39 = vand.u32 4294901760, %v10482_v35  ;;  %v2527_v59 = vand.u32 4294901760, %v2526_v46 }
 0x118   :  { %2425 = vmatpush.msra.mxu2 %v2314_v20  ;;  %8725 = vmatpush.msk.msra.mxu3 %vm10187_vm15, %v9273_v27  ;;  %vm241_vm15 = vcmp.eq.s32.totalorder %v9346_v17, %v10484_v38 }
 0x119   :  { %2226 = vmatpush.msrb.mxu0 %v2121_v22  ;;  %8722 = vmatpush.msk.msra.mxu1 %vm10248_vm10, %v9273_v27  ;;  %v10528_v22 = vsub.f32 %v8424_v33, %v8424_v33  ;;  %v2532_v20 = vsub.f32 %v10482_v35, %v2531_v39  ;;  %vm10562_vm0 = vmor %vm241_vm15, %vm489_vm9  ;;  %vm139_vm9 = vcmp.eq.s32.totalorder %v9355_v21, %v10484_v38 }
 0x11a   :  { %2228 = vmatmul.f32.vlgmr.msrb.gmra.mxu0 %v9666_v57  ;;  %2429 = vmatpush.msra.mxu2 %v2320_v10 }
 0x11b   :  { %2353 = vmatpush.msra.mxu0 %v10221_v30  ;;  %8726 = vmatpush.msk.msra.mxu3 %vm10202_vm5, %v9273_v27  ;;  %vm10547_vm5 = vmor %vm275_vm11, %vm523_vm14  ;;  %v2521_v30 = vand.u32 4294901760, %v2520_v51  ;;  %v2543_v10 = vand.u32 4294901760, %v10528_v22  ;;  %vm173_vm11 = vcmp.eq.s32.totalorder %v9352_v19, %v10484_v38  ;;  %vm421_vm14 = vcmp.eq.s32.totalorder %v9352_v19, %v10486_v25 }
 0x11c   :  { %8723 = vmatpush.msk.msra.mxu1 %vm10273_vm3, %v9273_v27  ;;  %2433 = vmatpush.msra.mxu2 %v2326_v34  ;;  %v8595_v47 = vsel %vm10547_vm5, 1.0, %v9272_v0  ;;  %vm10606_vm15 = vmor %vm173_vm11, %vm421_vm14 }
 0x11d   :  { %2356 = vmatpush.msra.mxu0 %v10245_v49  ;;  %8727 = vmatpush.msk.msra.mxu3 %vm10237_vm2, %v9273_v27  ;;  %vm455_vm2 = vcmp.eq.s32.totalorder %v9349_v18, %v10486_v25  ;;  %v2538_v49 = vsub.f32 %v10502_v45, %v2537_v13  ;;  %v2544_v55 = vsub.f32 %v10528_v22, %v2543_v10  ;;  %v8493_v54 = vsel %vm10606_vm15, 1.0, %v9272_v0 }
 0x11e   :  { %2400 = vmatmul.f32.vlgmr.msra.gmra.mxu1 %v9691_v5  ;;  %2437 = vmatpush.msra.mxu2 %v2332_v26  ;;  %v8561_v26 = vsel %vm10562_vm0, 1.0, %v9272_v0  ;;  %v10603_v37 = vsub.f32 %v8595_v47, %v8595_v47 }
 0x11f   :  { %2516 = vmatpush.msrb.mxu1 %v2515_v14  ;;  %2359 = vmatpush.msra.mxu0 %v10261_v2  ;;  %v2533_v2 = vand.u32 4294901760, %v2532_v20  ;;  %v2539_v9 = vand.u32 4294901760, %v2538_v49  ;;  %v10618_v50 = vsub.f32 %v8561_v26, %v8561_v26  ;;  %v2545_v3 = vand.u32 4294901760, %v2544_v55 }
 0x120   :  { %8728 = vmatpush.msk.msra.mxu3 %vm10248_vm10, %v9273_v27  ;;  %2439 = vmatmul.f32.vlgmr.msra.gmra.mxu2 %v9666_v57  ;;  %vm10592_vm10 = vmor %vm207_vm12, %vm455_vm2  ;;  %vm105_vm12 = vcmp.eq.s32.totalorder %v9335_v12, %v10484_v38  ;;  %vm353_vm2 = vcmp.eq.s32.totalorder %v9335_v12, %v10486_v25  ;;  %v2724_v60 = vand.u32 4294901760, %v10603_v37  ;;  %v10666_v38 = vld [vmem:[#allocation3 + $0x11] ss:$2 sm:$0xff]  ;;  %v10690_v14 = vperm.slane %v10664_v53, 0 }
 0x121   :  { %2522 = vmatpush.msrb.mxu1 %v2521_v30  ;;  %2564 = vmatpush.msrb.mxu2 %v10419_v7  ;;  %vm10646_vm14 = vmor %vm105_vm12, %vm353_vm2  ;;  %v2730_v31 = vand.u32 4294901760, %v10618_v50  ;;  %v10693_v46 = vperm.slane %v10666_v38, 0 }
 0x122   :  { %2362 = vmatpush.msra.mxu0 %v10283_v32  ;;  %8729 = vmatpush.msk.msra.mxu3 %vm10273_vm3, %v9273_v27  ;;  %vm387_vm3 = vcmp.eq.s32.totalorder %v9355_v21, %v10486_v25  ;;  %v8527_v32 = vsel %vm10592_vm10, 1.0, %v9272_v0  ;;  %v2725_v58 = vsub.f32 %v10603_v37, %v2724_v60  ;;  %v8425_v25 = vsel %vm10646_vm14, 1.0, %v9272_v0 }
 0x123   :  { %2466 = vmatmul.f32.vlgmr.msra.gmra.mxu3 %v9666_v57  ;;  %2528 = vmatpush.msrb.mxu1 %v2527_v59  ;;  %vm10639_vm11 = vmor %vm139_vm9, %vm387_vm3  ;;  %v2731_v33 = vsub.f32 %v10618_v50, %v2730_v31  ;;  %v10702_v20 = vsub.f32 %v8425_v25, %v8425_v25  ;;  %vm242_vm9 = vcmp.eq.s32.totalorder %v9346_v17, %v10690_v14 }
 0x124   :  { %2567 = vmatpush.msrb.mxu2 %v10446_v24  ;;  %8736 = vmatpush.msk.msrb.mxu3 %vm10356_vm1, %v9273_v27  ;;  %v8459_v63 = vsel %vm10639_vm11, 1.0, %v9272_v0  ;;  %v2726_v59 = vand.u32 4294901760, %v2725_v58  ;;  %vm490_vm3 = vcmp.eq.s32.totalorder %v9346_v17, %v10693_v46  ;;  %vm456_vm2 = vcmp.eq.s32.totalorder %v9349_v18, %v10693_v46 }
 0x125   :  { %2365 = vmatpush.msra.mxu0 %v10296_v28  ;;  %2534 = vmatpush.msrb.mxu1 %v2533_v2  ;;  %v10644_v28 = vsub.f32 %v8527_v32, %v8527_v32  ;;  %v10687_v51 = vsub.f32 %v8459_v63, %v8459_v63  ;;  %v2732_v49 = vand.u32 4294901760, %v2731_v33  ;;  %v2754_v2 = vand.u32 4294901760, %v10702_v20  ;;  %vm10759_vm12 = vmor %vm242_vm9, %vm490_vm3 }
 0x126   :  { %2570 = vmatpush.msrb.mxu2 %v10466_v6  ;;  %8737 = vmatpush.msk.msrb.mxu3 %vm10389_vm6, %v9273_v27  ;;  %v8562_v36 = vsel %vm10759_vm12, 1.0, %v9272_v0  ;;  %vm140_vm9 = vcmp.eq.s32.totalorder %v9355_v21, %v10690_v14  ;;  %vm388_vm3 = vcmp.eq.s32.totalorder %v9355_v21, %v10693_v46 }
 0x127   :  { %2368 = vmatpush.msra.mxu0 %v10323_v44  ;;  %2540 = vmatpush.msrb.mxu1 %v2539_v9  ;;  %v10659_v44 = vsub.f32 %v8493_v54, %v8493_v54  ;;  %v2736_v11 = vand.u32 4294901760, %v10644_v28  ;;  %v2748_v29 = vand.u32 4294901760, %v10687_v51  ;;  %v2755_v32 = vsub.f32 %v10702_v20, %v2754_v2 }
 0x128   :  { %2371 = vmatmul.f32.vlgmr.msra.gmra.mxu0 %v9678_v61  ;;  %2573 = vmatpush.msrb.mxu2 %v10482_v35  ;;  %v10821_v58 = vsub.f32 %v8562_v36, %v8562_v36  ;;  %v10874_v35 = vperm.slane %v10666_v38, 1 }
 0x129   :  { %8730 = vmatpush.msk.msrb.mxu0 %vm10356_vm1, %v9273_v27  ;;  %8738 = vmatpush.msk.msrb.mxu3 %vm10409_vm7, %v9273_v27  ;;  %v2742_v30 = vand.u32 4294901760, %v10659_v44  ;;  %v2737_v40 = vsub.f32 %v10644_v28, %v2736_v11  ;;  %v2749_v55 = vsub.f32 %v10687_v51, %v2748_v29  ;;  %v2756_v7 = vand.u32 4294901760, %v2755_v32 }
 0x12a   :  { %2546 = vmatpush.msrb.mxu1 %v2545_v3  ;;  %2576 = vmatpush.msrb.mxu2 %v10502_v45 }
 0x12b   :  { %8731 = vmatpush.msk.msrb.mxu0 %vm10389_vm6, %v9273_v27  ;;  %8739 = vmatpush.msk.msrb.mxu3 %vm10430_vm8, %v9273_v27  ;;  %v2743_v47 = vsub.f32 %v10659_v44, %v2742_v30  ;;  %v2738_v8 = vand.u32 4294901760, %v2737_v40  ;;  %v2750_v63 = vand.u32 4294901760, %v2749_v55 }
 0x12c   :  { %2548 = vmatmul.f32.vlgmr.msrb.gmra.mxu1 %v9666_v57  ;;  %2579 = vmatpush.msrb.mxu2 %v10528_v22 }
 0x12d   :  { %8742 = vmatpush.msk.msra.mxu1 %vm10356_vm1, %v9273_v27  ;;  %8732 = vmatpush.msk.msrb.mxu0 %vm10409_vm7, %v9273_v27  ;;  %vm276_vm1 = vcmp.eq.s32.totalorder %v9343_v16, %v10690_v14  ;;  %v2744_v4 = vand.u32 4294901760, %v2743_v47 }
 0x12e   :  { %8740 = vmatpush.msk.msrb.mxu3 %vm10448_vm13, %v9273_v27  ;;  %2582 = vmatmul.f32.vlgmr.msrb.gmra.mxu2 %v9678_v61 }
 0x12f   :  { %8743 = vmatpush.msk.msra.mxu1 %vm10389_vm6, %v9273_v27  ;;  %8748 = vmatpush.msk.msra.mxu2 %vm10547_vm5, %v9273_v27  ;;  %vm524_vm6 = vcmp.eq.s32.totalorder %v9343_v16, %v10693_v46 }
 0x130   :  { %8733 = vmatpush.msk.msrb.mxu0 %vm10430_vm8, %v9273_v27  ;;  %8741 = vmatpush.msk.msrb.mxu3 %vm10473_vm4, %v9273_v27 }
 0x131   :  { %2611 = vmatmul.f32.vlgmr.msrb.gmra.mxu3 %v9691_v5  ;;  %8744 = vmatpush.msk.msra.mxu1 %vm10409_vm7, %v9273_v27  ;;  %vm10749_vm7 = vmor %vm276_vm1, %vm524_vm6  ;;  %vm174_vm1 = vcmp.eq.s32.totalorder %v9352_v19, %v10690_v14 }
 0x132   :  { %8749 = vmatpush.msk.msra.mxu2 %vm10562_vm0, %v9273_v27  ;;  %2727 = vmatpush.msra.mxu3 %v2726_v59  ;;  %v8596_v3 = vsel %vm10749_vm7, 1.0, %v9272_v0  ;;  %v10871_v59 = vperm.slane %v10664_v53, 1 }
 0x133   :  { %8734 = vmatpush.msk.msrb.mxu0 %vm10448_vm13, %v9273_v27  ;;  %8745 = vmatpush.msk.msra.mxu1 %vm10430_vm8, %v9273_v27  ;;  %vm208_vm8 = vcmp.eq.s32.totalorder %v9349_v18, %v10690_v14 }
 0x134   :  { %8750 = vmatpush.msk.msra.mxu2 %vm10592_vm10, %v9273_v27  ;;  %2733 = vmatpush.msra.mxu3 %v2732_v49  ;;  %vm10792_vm6 = vmor %vm208_vm8, %vm456_vm2  ;;  %vm106_vm8 = vcmp.eq.s32.totalorder %v9335_v12, %v10690_v14  ;;  %vm354_vm2 = vcmp.eq.s32.totalorder %v9335_v12, %v10693_v46  ;;  %v2941_v14 = vand.u32 4294901760, %v10821_v58 }
 0x135   :  { %8735 = vmatpush.msk.msrb.mxu0 %vm10473_vm4, %v9273_v27  ;;  %8746 = vmatpush.msk.msra.mxu1 %vm10448_vm13, %v9273_v27  ;;  %vm422_vm13 = vcmp.eq.s32.totalorder %v9352_v19, %v10693_v46  ;;  %v8528_v24 = vsel %vm10792_vm6, 1.0, %v9272_v0 }
 0x136   :  { %2497 = vmatmul.f32.vlgmr.msrb.gmra.mxu0 %v9731_v23  ;;  %8751 = vmatpush.msk.msra.mxu2 %vm10606_vm15, %v9273_v27  ;;  %v2942_v45 = vsub.f32 %v10821_v58, %v2941_v14 }
 0x137   :  { %2628 = vmatpush.msra.mxu0 %v2513_v62  ;;  %2739 = vmatpush.msra.mxu3 %v2738_v8  ;;  %v10808_v62 = vsub.f32 %v8596_v3, %v8596_v3 }
 0x138   :  { %8747 = vmatpush.msk.msra.mxu1 %vm10473_vm4, %v9273_v27  ;;  %8752 = vmatpush.msk.msra.mxu2 %vm10639_vm11, %v9273_v27  ;;  %vm10813_vm4 = vmor %vm174_vm1, %vm422_vm13  ;;  %v2943_v47 = vand.u32 4294901760, %v2942_v45 }
 0x139   :  { %2632 = vmatpush.msra.mxu0 %v2519_v48  ;;  %2745 = vmatpush.msra.mxu3 %v2744_v4  ;;  %vm10838_vm1 = vmor %vm140_vm9, %vm388_vm3  ;;  %v8494_v25 = vsel %vm10813_vm4, 1.0, %v9272_v0  ;;  %v2935_v6 = vand.u32 4294901760, %v10808_v62  ;;  %vm243_vm9 = vcmp.eq.s32.totalorder %v9346_v17, %v10871_v59  ;;  %vm491_vm3 = vcmp.eq.s32.totalorder %v9346_v17, %v10874_v35 }
 0x13a   :  { %2677 = vmatmul.f32.vlgmr.msra.gmra.mxu1 %v9666_v57  ;;  %8753 = vmatpush.msk.msra.mxu2 %vm10646_vm14, %v9273_v27  ;;  %vm10854_vm13 = vmor %vm106_vm8, %vm354_vm2  ;;  %v8460_v46 = vsel %vm10838_vm1, 1.0, %v9272_v0  ;;  %vm457_vm2 = vcmp.eq.s32.totalorder %v9349_v18, %v10874_v35 }
 0x13b   :  { %8754 = vmatpush.msk.msrb.mxu1 %vm10547_vm5, %v9273_v27  ;;  %2636 = vmatpush.msra.mxu0 %v2525_v52  ;;  %v10852_v52 = vsub.f32 %v8528_v24, %v8528_v24  ;;  %v2936_v40 = vsub.f32 %v10808_v62, %v2935_v6  ;;  %v10893_v49 = vsub.f32 %v8460_v46, %v8460_v46  ;;  %vm10956_vm8 = vmor %vm243_vm9, %vm491_vm3 }
 0x13c   :  { %2751 = vmatpush.msra.mxu3 %v2750_v63  ;;  %2708 = vmatmul.f32.vlgmr.msra.gmra.mxu2 %v9731_v23  ;;  %vm141_vm9 = vcmp.eq.s32.totalorder %v9355_v21, %v10871_v59  ;;  %vm389_vm3 = vcmp.eq.s32.totalorder %v9355_v21, %v10874_v35 }
 0x13d   :  { %8755 = vmatpush.msk.msrb.mxu1 %vm10562_vm0, %v9273_v27  ;;  %2839 = vmatpush.msrb.mxu2 %v2724_v60  ;;  %v10868_v60 = vsub.f32 %v8494_v25, %v8494_v25  ;;  %v2937_v22 = vand.u32 4294901760, %v2936_v40  ;;  %v2959_v34 = vand.u32 4294901760, %v10893_v49 }
 0x13e   :  { %2640 = vmatpush.msra.mxu0 %v2531_v39  ;;  %2757 = vmatpush.msra.mxu3 %v2756_v7  ;;  %v8426_v39 = vsel %vm10854_vm13, 1.0, %v9272_v0 }
 0x13f   :  { %2759 = vmatmul.f32.vlgmr.msra.gmra.mxu3 %v9666_v57  ;;  %8756 = vmatpush.msk.msrb.mxu1 %vm10592_vm10, %v9273_v27  ;;  %v10909_v42 = vsub.f32 %v8426_v39, %v8426_v39 }
 0x140   :  { %2843 = vmatpush.msrb.mxu2 %v2730_v31  ;;  %8760 = vmatpush.msk.msrb.mxu3 %vm10547_vm5, %v9273_v27  ;;  %v2947_v31 = vand.u32 4294901760, %v10852_v52  ;;  %vm277_vm5 = vcmp.eq.s32.totalorder %v9343_v16, %v10871_v59  ;;  %v1317_v32 = vpop.f32.mrf.mxu2 }
 0x141   :  { %2644 = vmatpush.msra.mxu0 %v2537_v13  ;;  %8757 = vmatpush.msk.msrb.mxu1 %vm10606_vm15, %v9273_v27  ;;  %v2953_v13 = vand.u32 4294901760, %v10868_v60 }
 0x142   :  { %2847 = vmatpush.msrb.mxu2 %v2736_v11  ;;  %8761 = vmatpush.msk.msrb.mxu3 %vm10562_vm0, %v9273_v27  ;;  %vm525_vm0 = vcmp.eq.s32.totalorder %v9343_v16, %v10874_v35  ;;  %v1283_v11 = vpop.f32.mrf.mxu1  ;;  %v1346_v63 = vpop.f32.mrf.mxu3 }
 0x143   :  { %2648 = vmatpush.msra.mxu0 %v2543_v10  ;;  %8758 = vmatpush.msk.msrb.mxu1 %vm10639_vm11, %v9273_v27  ;;  %v2948_v10 = vsub.f32 %v10852_v52, %v2947_v31  ;;  %v2954_v8 = vsub.f32 %v10868_v60, %v2953_v13 }
 0x144   :  { %2650 = vmatmul.f32.vlgmr.msra.gmra.mxu0 %v9666_v57  ;;  %2851 = vmatpush.msrb.mxu2 %v2742_v30  ;;  %v1232_v30 = vpop.f32.mrf.mxu0 }
 0x145   :  { %2775 = vmatpush.msrb.mxu0 %v10603_v37  ;;  %8762 = vmatpush.msk.msrb.mxu3 %vm10592_vm10, %v9273_v27  ;;  %vm10938_vm10 = vmor %vm277_vm5, %vm525_vm0  ;;  %v1284_v37 = vadd.f32 %v1283_v11, %v1232_v30  ;;  %v2949_v56 = vand.u32 4294901760, %v2948_v10  ;;  %vm175_vm5 = vcmp.eq.s32.totalorder %v9352_v19, %v10871_v59  ;;  %vm423_vm0 = vcmp.eq.s32.totalorder %v9352_v19, %v10874_v35 }
 0x146   :  { %8759 = vmatpush.msk.msrb.mxu1 %vm10646_vm14, %v9273_v27  ;;  %2855 = vmatpush.msrb.mxu2 %v2748_v29  ;;  %v2965_v29 = vand.u32 4294901760, %v10909_v42  ;;  %v8597_v4 = vsel %vm10938_vm10, 1.0, %v9272_v0  ;;  %v2955_v3 = vand.u32 4294901760, %v2954_v8 }
 0x147   :  { %2778 = vmatpush.msrb.mxu0 %v10618_v50  ;;  %8763 = vmatpush.msk.msrb.mxu3 %vm10606_vm15, %v9273_v27  ;;  %vm209_vm15 = vcmp.eq.s32.totalorder %v9349_v18, %v10871_v59  ;;  %v2960_v50 = vsub.f32 %v10893_v49, %v2959_v34  ;;  %v11003_v7 = vsub.f32 %v8597_v4, %v8597_v4 }
 0x148   :  { %2822 = vmatmul.f32.vlgmr.msrb.gmra.mxu1 %v9691_v5  ;;  %2859 = vmatpush.msrb.mxu2 %v2754_v2  ;;  %v1318_v2 = vadd.f32 %v1317_v32, %v1284_v37  ;;  %v2966_v43 = vsub.f32 %v10909_v42, %v2965_v29 }
 0x149   :  { %2938 = vmatpush.msra.mxu1 %v2937_v22  ;;  %2781 = vmatpush.msrb.mxu0 %v10644_v28  ;;  %v8563_v28 = vsel %vm10956_vm8, 1.0, %v9272_v0  ;;  %v2961_v24 = vand.u32 4294901760, %v2960_v50  ;;  %v3146_v22 = vand.u32 4294901760, %v11003_v7 }
 0x14a   :  { %8764 = vmatpush.msk.msrb.mxu3 %vm10639_vm11, %v9273_v27  ;;  %2861 = vmatmul.f32.vlgmr.msrb.gmra.mxu2 %v9666_v57  ;;  %vm10995_vm11 = vmor %vm209_vm15, %vm457_vm2  ;;  %v11010_v25 = vsub.f32 %v8563_v28, %v8563_v28  ;;  %vm107_vm15 = vcmp.eq.s32.totalorder %v9335_v12, %v10871_v59  ;;  %vm355_vm2 = vcmp.eq.s32.totalorder %v9335_v12, %v10874_v35  ;;  %v2967_v45 = vand.u32 4294901760, %v2966_v43  ;;  %v1412_v30 = vpop.f32.mrf.mxu1  ;;  %v1443_v35 = vpop.f32.mrf.mxu2 }
 0x14b   :  { %2944 = vmatpush.msra.mxu1 %v2943_v47  ;;  %2986 = vmatpush.msra.mxu2 %v10808_v62  ;;  %v1347_v46 = vadd.f32 %v1346_v63, %v1318_v2  ;;  %v11104_v43 = vperm.slane %v10666_v38, 2 }
 0x14c   :  { %2784 = vmatpush.msrb.mxu0 %v10659_v44  ;;  %8765 = vmatpush.msk.msrb.mxu3 %vm10646_vm14, %v9273_v27  ;;  %vm11018_vm14 = vmor %vm175_vm5, %vm423_vm0  ;;  %v8529_v44 = vsel %vm10995_vm11, 1.0, %v9272_v0  ;;  %v1385_v40 = vpop.f32.mrf.mxu0  ;;  %v1494_v28 = vpop.f32.mrf.mxu3 }
 0x14d   :  { %2888 = vmatmul.f32.vlgmr.msrb.gmra.mxu3 %v9666_v57  ;;  %2950 = vmatpush.msra.mxu1 %v2949_v56  ;;  %vm11037_vm5 = vmor %vm141_vm9, %vm389_vm3  ;;  %v1386_v10 = vadd.f32 %v1385_v40, %v1347_v46  ;;  %v11050_v11 = vsub.f32 %v8529_v44, %v8529_v44  ;;  %v3147_v56 = vsub.f32 %v11003_v7, %v3146_v22 }
 0x14e   :  { %2989 = vmatpush.msra.mxu2 %v10821_v58  ;;  %8772 = vmatpush.msk.msra.mxu3 %vm10749_vm7, %v9273_v27  ;;  %vm11058_vm0 = vmor %vm107_vm15, %vm355_vm2  ;;  %v8461_v47 = vsel %vm11037_vm5, 1.0, %v9272_v0  ;;  %v1495_v46 = vadd.f32 %v1494_v28, %v1443_v35  ;;  %vm492_vm3 = vcmp.eq.s32.totalorder %v9346_v17, %v11104_v43  ;;  %vm458_vm2 = vcmp.eq.s32.totalorder %v9349_v18, %v11104_v43 }
 0x14f   :  { %2787 = vmatpush.msrb.mxu0 %v10687_v51  ;;  %2956 = vmatpush.msra.mxu1 %v2955_v3  ;;  %v8495_v51 = vsel %vm11018_vm14, 1.0, %v9272_v0  ;;  %v1413_v8 = vadd.f32 %v1412_v30, %v1386_v10  ;;  %v8427_v50 = vsel %vm11058_vm0, 1.0, %v9272_v0  ;;  %v3158_v4 = vand.u32 4294901760, %v11050_v11 }
 0x150   :  { %2992 = vmatpush.msra.mxu2 %v10852_v52  ;;  %8773 = vmatpush.msk.msra.mxu3 %vm10759_vm12, %v9273_v27  ;;  %v11074_v59 = vsub.f32 %v8495_v51, %v8495_v51  ;;  %v11093_v32 = vsub.f32 %v8461_v47, %v8461_v47  ;;  %v11101_v3 = vperm.slane %v10664_v53, 2  ;;  %v3148_v44 = vand.u32 4294901760, %v3147_v56 }
 0x151   :  { %2790 = vmatpush.msrb.mxu0 %v10702_v20  ;;  %2962 = vmatpush.msra.mxu1 %v2961_v24  ;;  %v3152_v20 = vand.u32 4294901760, %v11010_v25  ;;  %8378 = vst [vmem:[%s16362_s3] sm:$0xff] %v1413_v8  ;;  %v11113_v24 = vsub.f32 %v8427_v50, %v8427_v50  ;;  %v3159_v26 = vsub.f32 %v11050_v11, %v3158_v4 }
 0x152   :  { %2793 = vmatmul.f32.vlgmr.msrb.gmra.mxu0 %v9678_v61  ;;  %2995 = vmatpush.msra.mxu2 %v10868_v60  ;;  %v3164_v63 = vand.u32 4294901760, %v11074_v59  ;;  %v3170_v40 = vand.u32 4294901760, %v11093_v32  ;;  %v1557_v47 = vpop.f32.mrf.mxu1  ;;  %vm244_vm9 = vcmp.eq.s32.totalorder %v9346_v17, %v11101_v3  ;;  %vm210_vm15 = vcmp.eq.s32.totalorder %v9349_v18, %v11101_v3 }
 0x153   :  { %8766 = vmatpush.msk.msra.mxu0 %vm10749_vm7, %v9273_v27  ;;  %8774 = vmatpush.msk.msra.mxu3 %vm10792_vm6, %v9273_v27  ;;  %v3153_v2 = vsub.f32 %v11010_v25, %v3152_v20  ;;  %v3176_v30 = vand.u32 4294901760, %v11113_v24  ;;  %v3160_v8 = vand.u32 4294901760, %v3159_v26  ;;  %v11306_v60 = vperm.slane %v10666_v38, 3 }
 0x154   :  { %2968 = vmatpush.msra.mxu1 %v2967_v45  ;;  %2998 = vmatpush.msra.mxu2 %v10893_v49  ;;  %v3165_v10 = vsub.f32 %v11074_v59, %v3164_v63  ;;  %v3171_v35 = vsub.f32 %v11093_v32, %v3170_v40 }
 0x155   :  { %8767 = vmatpush.msk.msra.mxu0 %vm10759_vm12, %v9273_v27  ;;  %8775 = vmatpush.msk.msra.mxu3 %vm10813_vm4, %v9273_v27  ;;  %v3154_v9 = vand.u32 4294901760, %v3153_v2  ;;  %v1596_v50 = vpop.f32.mrf.mxu2 }
 0x156   :  { %2970 = vmatmul.f32.vlgmr.msra.gmra.mxu1 %v9666_v57  ;;  %3001 = vmatpush.msra.mxu2 %v10909_v42  ;;  %v1528_v45 = vpop.f32.mrf.mxu0  ;;  %v3166_v2 = vand.u32 4294901760, %v3165_v10  ;;  %v3172_v62 = vand.u32 4294901760, %v3171_v35 }
 0x157   :  { %8778 = vmatpush.msk.msrb.mxu1 %vm10749_vm7, %v9273_v27  ;;  %8768 = vmatpush.msk.msra.mxu0 %vm10792_vm6, %v9273_v27  ;;  %vm278_vm7 = vcmp.eq.s32.totalorder %v9343_v16, %v11101_v3  ;;  %v1529_v51 = vadd.f32 %v1528_v45, %v1495_v46 }
 0x158   :  { %8776 = vmatpush.msk.msra.mxu3 %vm10838_vm1, %v9273_v27  ;;  %3004 = vmatmul.f32.vlgmr.msra.gmra.mxu2 %v9678_v61  ;;  %v1623_v46 = vpop.f32.mrf.mxu3 }
 0x159   :  { %8779 = vmatpush.msk.msrb.mxu1 %vm10759_vm12, %v9273_v27  ;;  %8784 = vmatpush.msk.msrb.mxu2 %vm10938_vm10, %v9273_v27  ;;  %vm526_vm12 = vcmp.eq.s32.totalorder %v9343_v16, %v11104_v43  ;;  %v1558_v54 = vadd.f32 %v1557_v47, %v1529_v51 }
 0x15a   :  { %8769 = vmatpush.msk.msra.mxu0 %vm10813_vm4, %v9273_v27  ;;  %8777 = vmatpush.msk.msra.mxu3 %vm10854_vm13, %v9273_v27  ;;  %v1705_v47 = vpop.f32.mrf.mxu1 }
 0x15b   :  { %3033 = vmatmul.f32.vlgmr.msra.gmra.mxu3 %v9691_v5  ;;  %8780 = vmatpush.msk.msrb.mxu1 %vm10792_vm6, %v9273_v27  ;;  %vm11169_vm6 = vmor %vm278_vm7, %vm526_vm12  ;;  %v1597_v28 = vadd.f32 %v1596_v50, %v1558_v54  ;;  %vm176_vm7 = vcmp.eq.s32.totalorder %v9352_v19, %v11101_v3 }
 0x15c   :  { %8785 = vmatpush.msk.msrb.mxu2 %vm10956_vm8, %v9273_v27  ;;  %3149 = vmatpush.msrb.mxu3 %v3148_v44  ;;  %v3177_v44 = vsub.f32 %v11113_v24, %v3176_v30  ;;  %v8598_v26 = vsel %vm11169_vm6, 1.0, %v9272_v0  ;;  %vm11215_vm12 = vmor %vm210_vm15, %vm458_vm2  ;;  %vm108_vm15 = vcmp.eq.s32.totalorder %v9335_v12, %v11101_v3  ;;  %vm356_vm2 = vcmp.eq.s32.totalorder %v9335_v12, %v11104_v43 }
 0x15d   :  { %8770 = vmatpush.msk.msra.mxu0 %vm10838_vm1, %v9273_v27  ;;  %8781 = vmatpush.msk.msrb.mxu1 %vm10813_vm4, %v9273_v27  ;;  %vm11176_vm4 = vmor %vm244_vm9, %vm492_vm3  ;;  %v1624_v48 = vadd.f32 %v1623_v46, %v1597_v28  ;;  %vm142_vm9 = vcmp.eq.s32.totalorder %v9355_v21, %v11101_v3  ;;  %vm390_vm3 = vcmp.eq.s32.totalorder %v9355_v21, %v11104_v43  ;;  %v11303_v28 = vperm.slane %v10664_v53, 3 }
 0x15e   :  { %8786 = vmatpush.msk.msrb.mxu2 %vm10995_vm11, %v9273_v27  ;;  %3155 = vmatpush.msrb.mxu3 %v3154_v9  ;;  %v8564_v45 = vsel %vm11176_vm4, 1.0, %v9272_v0  ;;  %v11234_v33 = vsub.f32 %v8598_v26, %v8598_v26 }
 0x15f   :  { %8771 = vmatpush.msk.msra.mxu0 %vm10854_vm13, %v9273_v27  ;;  %8782 = vmatpush.msk.msrb.mxu1 %vm10838_vm1, %v9273_v27  ;;  %vm424_vm1 = vcmp.eq.s32.totalorder %v9352_v19, %v11104_v43  ;;  %8379 = vst [vmem:[%s16362_s3 + $0x8] sm:$0xff] %v1624_v48  ;;  %v11250_v58 = vsub.f32 %v8564_v45, %v8564_v45 }
 0x160   :  { %2919 = vmatmul.f32.vlgmr.msra.gmra.mxu0 %v9731_v23  ;;  %8787 = vmatpush.msk.msrb.mxu2 %vm11018_vm14, %v9273_v27 }
 0x161   :  { %3050 = vmatpush.msrb.mxu0 %v2935_v6  ;;  %3161 = vmatpush.msrb.mxu3 %v3160_v8  ;;  %v3178_v6 = vand.u32 4294901760, %v3177_v44  ;;  %v1654_v10 = vpop.f32.mrf.mxu0  ;;  %v3363_v35 = vand.u32 4294901760, %v11250_v58 }
 0x162   :  { %8783 = vmatpush.msk.msrb.mxu1 %vm10854_vm13, %v9273_v27  ;;  %8788 = vmatpush.msk.msrb.mxu2 %vm11037_vm5, %v9273_v27  ;;  %vm11242_vm13 = vmor %vm176_vm7, %vm424_vm1  ;;  %v1706_v52 = vadd.f32 %v1705_v47, %v1654_v10  ;;  %v1768_v55 = vpop.f32.mrf.mxu3 }
 0x163   :  { %3054 = vmatpush.msrb.mxu0 %v2941_v14  ;;  %3167 = vmatpush.msrb.mxu3 %v3166_v2  ;;  %v8530_v14 = vsel %vm11215_vm12, 1.0, %v9272_v0  ;;  %vm11270_vm7 = vmor %vm142_vm9, %vm390_vm3  ;;  %v8496_v8 = vsel %vm11242_vm13, 1.0, %v9272_v0  ;;  %v3364_v49 = vsub.f32 %v11250_v58, %v3363_v35  ;;  %vm245_vm9 = vcmp.eq.s32.totalorder %v9346_v17, %v11303_v28 }
 0x164   :  { %3099 = vmatmul.f32.vlgmr.msrb.gmra.mxu1 %v9666_v57  ;;  %8789 = vmatpush.msk.msrb.mxu2 %vm11058_vm0, %v9273_v27  ;;  %v11284_v3 = vsub.f32 %v8530_v14, %v8530_v14  ;;  %vm11286_vm1 = vmor %vm108_vm15, %vm356_vm2  ;;  %v8462_v50 = vsel %vm11270_vm7, 1.0, %v9272_v0  ;;  %vm493_vm3 = vcmp.eq.s32.totalorder %v9346_v17, %v11306_v60  ;;  %vm459_vm2 = vcmp.eq.s32.totalorder %v9349_v18, %v11306_v60 }
 0x165   :  { %8790 = vmatpush.msk.msra.mxu1 %vm10938_vm10, %v9273_v27  ;;  %3058 = vmatpush.msrb.mxu0 %v2947_v31  ;;  %v3357_v31 = vand.u32 4294901760, %v11234_v33  ;;  %v8428_v2 = vsel %vm11286_vm1, 1.0, %v9272_v0  ;;  %v11325_v15 = vsub.f32 %v8462_v50, %v8462_v50  ;;  %v3365_v45 = vand.u32 4294901760, %v3364_v49  ;;  %vm11390_vm15 = vmor %vm245_vm9, %vm493_vm3 }
 0x166   :  { %3173 = vmatpush.msrb.mxu3 %v3172_v62  ;;  %3130 = vmatmul.f32.vlgmr.msrb.gmra.mxu2 %v9731_v23  ;;  %v3369_v46 = vand.u32 4294901760, %v11284_v3  ;;  %v11341_v26 = vsub.f32 %v8428_v2, %v8428_v2  ;;  %v1834_v62 = vpop.f32.mrf.mxu1  ;;  %v8565_v47 = vsel %vm11390_vm15, 1.0, %v9272_v0  ;;  %vm391_vm3 = vcmp.eq.s32.totalorder %v9355_v21, %v11306_v60 }
 0x167   :  { %8791 = vmatpush.msk.msra.mxu1 %vm10956_vm8, %v9273_v27  ;;  %3261 = vmatpush.msra.mxu2 %v3146_v22  ;;  %v11300_v22 = vsub.f32 %v8496_v8, %v8496_v8 }
 0x168   :  { %3062 = vmatpush.msrb.mxu0 %v2953_v13  ;;  %3179 = vmatpush.msrb.mxu3 %v3178_v6  ;;  %v1739_v13 = vpop.f32.mrf.mxu2 }
 0x169   :  { %3181 = vmatmul.f32.vlgmr.msrb.gmra.mxu3 %v9666_v57  ;;  %8792 = vmatpush.msk.msra.mxu1 %vm10995_vm11, %v9273_v27  ;;  %v1740_v44 = vadd.f32 %v1739_v13, %v1706_v52  ;;  %v11444_v13 = vsub.f32 %v8565_v47, %v8565_v47  ;;  %v11539_v47 = vperm.slane %v10666_v38, 4 }
 0x16a   :  { %3265 = vmatpush.msra.mxu2 %v3152_v20  ;;  %8796 = vmatpush.msk.msra.mxu3 %vm10938_vm10, %v9273_v27  ;;  %v3358_v20 = vsub.f32 %v11234_v33, %v3357_v31  ;;  %vm279_vm10 = vcmp.eq.s32.totalorder %v9343_v16, %v11303_v28 }
 0x16b   :  { %3066 = vmatpush.msrb.mxu0 %v2959_v34  ;;  %8793 = vmatpush.msk.msra.mxu1 %vm11018_vm14, %v9273_v27  ;;  %v3375_v34 = vand.u32 4294901760, %v11300_v22  ;;  %v1769_v42 = vadd.f32 %v1768_v55, %v1740_v44 }
 0x16c   :  { %3269 = vmatpush.msra.mxu2 %v3158_v4  ;;  %8797 = vmatpush.msk.msra.mxu3 %vm10956_vm8, %v9273_v27  ;;  %vm527_vm8 = vcmp.eq.s32.totalorder %v9343_v16, %v11306_v60  ;;  %v3370_v4 = vsub.f32 %v11284_v3, %v3369_v46 }
 0x16d   :  { %3070 = vmatpush.msrb.mxu0 %v2965_v29  ;;  %8794 = vmatpush.msk.msra.mxu1 %vm11037_vm5, %v9273_v27  ;;  %v3359_v29 = vand.u32 4294901760, %v3358_v20  ;;  %v1807_v48 = vpop.f32.mrf.mxu0 }
 0x16e   :  { %3072 = vmatmul.f32.vlgmr.msrb.gmra.mxu0 %v9666_v57  ;;  %3273 = vmatpush.msra.mxu2 %v3164_v63  ;;  %v3381_v63 = vand.u32 4294901760, %v11325_v15  ;;  %v3371_v10 = vand.u32 4294901760, %v3370_v4  ;;  %v1916_v44 = vpop.f32.mrf.mxu3 }
 0x16f   :  { %3197 = vmatpush.msra.mxu0 %v11003_v7  ;;  %8798 = vmatpush.msk.msra.mxu3 %vm10995_vm11, %v9273_v27  ;;  %vm11373_vm11 = vmor %vm279_vm10, %vm527_vm8  ;;  %v1808_v7 = vadd.f32 %v1807_v48, %v1769_v42  ;;  %vm177_vm10 = vcmp.eq.s32.totalorder %v9352_v19, %v11303_v28  ;;  %vm425_vm8 = vcmp.eq.s32.totalorder %v9352_v19, %v11306_v60 }
 0x170   :  { %8795 = vmatpush.msk.msra.mxu1 %vm11058_vm0, %v9273_v27  ;;  %3277 = vmatpush.msra.mxu2 %v3170_v40  ;;  %v3376_v40 = vsub.f32 %v11300_v22, %v3375_v34  ;;  %v3382_v14 = vsub.f32 %v11325_v15, %v3381_v63  ;;  %vm11449_vm9 = vmor %vm177_vm10, %vm425_vm8  ;;  %v1865_v2 = vpop.f32.mrf.mxu2 }
 0x171   :  { %3200 = vmatpush.msra.mxu0 %v11010_v25  ;;  %8799 = vmatpush.msk.msra.mxu3 %vm11018_vm14, %v9273_v27  ;;  %v3387_v25 = vand.u32 4294901760, %v11341_v26  ;;  %vm211_vm14 = vcmp.eq.s32.totalorder %v9349_v18, %v11303_v28  ;;  %v1835_v1 = vadd.f32 %v1834_v62, %v1808_v7  ;;  %v8497_v55 = vsel %vm11449_vm9, 1.0, %v9272_v0 }
 0x172   :  { %3244 = vmatmul.f32.vlgmr.msra.gmra.mxu1 %v9691_v5  ;;  %3281 = vmatpush.msra.mxu2 %v3176_v30  ;;  %v8599_v30 = vsel %vm11373_vm11, 1.0, %v9272_v0  ;;  %v3377_v39 = vand.u32 4294901760, %v3376_v40  ;;  %v3383_v50 = vand.u32 4294901760, %v3382_v14 }
 0x173   :  { %3360 = vmatpush.msrb.mxu1 %v3359_v29  ;;  %3203 = vmatpush.msra.mxu0 %v11050_v11  ;;  %8380 = vst [vmem:[%s16362_s3 + $0x10] sm:$0xff] %v1835_v1  ;;  %v3388_v8 = vsub.f32 %v11341_v26, %v3387_v25  ;;  %v11441_v52 = vsub.f32 %v8599_v30, %v8599_v30  ;;  %v3574_v29 = vand.u32 4294901760, %v11444_v13  ;;  %v11536_v30 = vperm.slane %v10664_v53, 4 }
 0x174   :  { %8800 = vmatpush.msk.msra.mxu3 %vm11037_vm5, %v9273_v27  ;;  %3283 = vmatmul.f32.vlgmr.msra.gmra.mxu2 %v9666_v57  ;;  %vm11430_vm5 = vmor %vm211_vm14, %vm459_vm2  ;;  %vm109_vm14 = vcmp.eq.s32.totalorder %v9335_v12, %v11303_v28  ;;  %vm357_vm2 = vcmp.eq.s32.totalorder %v9335_v12, %v11306_v60  ;;  %v11509_v60 = vsub.f32 %v8497_v55, %v8497_v55 }
 0x175   :  { %3366 = vmatpush.msrb.mxu1 %v3365_v45  ;;  %3408 = vmatpush.msrb.mxu2 %v11234_v33  ;;  %v8531_v37 = vsel %vm11430_vm5, 1.0, %v9272_v0  ;;  %v3389_v20 = vand.u32 4294901760, %v3388_v8  ;;  %v3568_v49 = vand.u32 4294901760, %v11441_v52  ;;  %vm11497_vm8 = vmor %vm109_vm14, %vm357_vm2  ;;  %v3575_v62 = vsub.f32 %v11444_v13, %v3574_v29 }
 0x176   :  { %3206 = vmatpush.msra.mxu0 %v11074_v59  ;;  %8801 = vmatpush.msk.msra.mxu3 %vm11058_vm0, %v9273_v27  ;;  %vm143_vm0 = vcmp.eq.s32.totalorder %v9355_v21, %v11303_v28  ;;  %v11488_v42 = vsub.f32 %v8531_v37, %v8531_v37  ;;  %v8429_v45 = vsel %vm11497_vm8, 1.0, %v9272_v0  ;;  %v3586_v8 = vand.u32 4294901760, %v11509_v60 }
 0x177   :  { %3310 = vmatmul.f32.vlgmr.msra.gmra.mxu3 %v9666_v57  ;;  %3372 = vmatpush.msrb.mxu1 %v3371_v10  ;;  %vm11483_vm10 = vmor %vm143_vm0, %vm391_vm3  ;;  %v3569_v7 = vsub.f32 %v11441_v52, %v3568_v49  ;;  %v1979_v10 = vpop.f32.mrf.mxu1  ;;  %v3576_v56 = vand.u32 4294901760, %v3575_v62  ;;  %vm246_vm0 = vcmp.eq.s32.totalorder %v9346_v17, %v11536_v30  ;;  %vm494_vm3 = vcmp.eq.s32.totalorder %v9346_v17, %v11539_v47 }
 0x178   :  { %3411 = vmatpush.msrb.mxu2 %v11250_v58  ;;  %8808 = vmatpush.msk.msrb.mxu3 %vm11169_vm6, %v9273_v27  ;;  %v8463_v28 = vsel %vm11483_vm10, 1.0, %v9272_v0  ;;  %v3580_v1 = vand.u32 4294901760, %v11488_v42  ;;  %v3587_v55 = vsub.f32 %v11509_v60, %v3586_v8  ;;  %vm11611_vm14 = vmor %vm246_vm0, %vm494_vm3  ;;  %vm460_vm2 = vcmp.eq.s32.totalorder %v9349_v18, %v11539_v47 }
 0x179   :  { %3209 = vmatpush.msra.mxu0 %v11093_v32  ;;  %3378 = vmatpush.msrb.mxu1 %v3377_v39  ;;  %v11533_v14 = vsub.f32 %v8463_v28, %v8463_v28  ;;  %v2018_v37 = vpop.f32.mrf.mxu2  ;;  %v3570_v53 = vand.u32 4294901760, %v3569_v7  ;;  %v8566_v54 = vsel %vm11611_vm14, 1.0, %v9272_v0  ;;  %vm144_vm0 = vcmp.eq.s32.totalorder %v9355_v21, %v11536_v30 }
 0x17a   :  { %3414 = vmatpush.msrb.mxu2 %v11284_v3  ;;  %8809 = vmatpush.msk.msrb.mxu3 %vm11176_vm4, %v9273_v27  ;;  %v3588_v7 = vand.u32 4294901760, %v3587_v55  ;;  %vm392_vm3 = vcmp.eq.s32.totalorder %v9355_v21, %v11539_v47  ;;  %v11673_v58 = vsub.f32 %v8566_v54, %v8566_v54 }
 0x17b   :  { %3212 = vmatpush.msra.mxu0 %v11113_v24  ;;  %3384 = vmatpush.msrb.mxu1 %v3383_v50  ;;  %v1917_v24 = vadd.f32 %v1916_v44, %v1865_v2  ;;  %v1950_v48 = vpop.f32.mrf.mxu0  ;;  %v11548_v50 = vsub.f32 %v8429_v45, %v8429_v45  ;;  %v3581_v2 = vsub.f32 %v11488_v42, %v3580_v1  ;;  %v3592_v41 = vand.u32 4294901760, %v11533_v14 }
 0x17c   :  { %3215 = vmatmul.f32.vlgmr.msra.gmra.mxu0 %v9678_v61  ;;  %3417 = vmatpush.msrb.mxu2 %v11300_v22  ;;  %v2045_v44 = vpop.f32.mrf.mxu3 }
 0x17d   :  { %8802 = vmatpush.msk.msrb.mxu0 %vm11169_vm6, %v9273_v27  ;;  %8810 = vmatpush.msk.msrb.mxu3 %vm11215_vm12, %v9273_v27  ;;  %v1951_v40 = vadd.f32 %v1950_v48, %v1917_v24  ;;  %v3598_v24 = vand.u32 4294901760, %v11548_v50  ;;  %v3582_v9 = vand.u32 4294901760, %v3581_v2  ;;  %v3593_v48 = vsub.f32 %v11533_v14, %v3592_v41 }
 0x17e   :  { %3390 = vmatpush.msrb.mxu1 %v3389_v20  ;;  %3420 = vmatpush.msrb.mxu2 %v11325_v15 }
 0x17f   :  { %8803 = vmatpush.msk.msrb.mxu0 %vm11176_vm4, %v9273_v27  ;;  %8811 = vmatpush.msk.msrb.mxu3 %vm11242_vm13, %v9273_v27  ;;  %v1980_v39 = vadd.f32 %v1979_v10, %v1951_v40  ;;  %v3599_v45 = vsub.f32 %v11548_v50, %v3598_v24  ;;  %v3594_v10 = vand.u32 4294901760, %v3593_v48 }
 0x180   :  { %3392 = vmatmul.f32.vlgmr.msrb.gmra.mxu1 %v9666_v57  ;;  %3423 = vmatpush.msrb.mxu2 %v11341_v26 }
 0x181   :  { %8814 = vmatpush.msk.msra.mxu1 %vm11169_vm6, %v9273_v27  ;;  %8804 = vmatpush.msk.msrb.mxu0 %vm11215_vm12, %v9273_v27  ;;  %v2019_v38 = vadd.f32 %v2018_v37, %v1980_v39  ;;  %vm280_vm6 = vcmp.eq.s32.totalorder %v9343_v16, %v11536_v30  ;;  %v3600_v33 = vand.u32 4294901760, %v3599_v45  ;;  %v2127_v37 = vpop.f32.mrf.mxu1 }
 0x182   :  { %8812 = vmatpush.msk.msrb.mxu3 %vm11270_vm7, %v9273_v27  ;;  %3426 = vmatmul.f32.vlgmr.msrb.gmra.mxu2 %v9678_v61 }
 0x183   :  { %8815 = vmatpush.msk.msra.mxu1 %vm11176_vm4, %v9273_v27  ;;  %8820 = vmatpush.msk.msra.mxu2 %vm11373_vm11, %v9273_v27  ;;  %vm528_vm4 = vcmp.eq.s32.totalorder %v9343_v16, %v11539_v47  ;;  %v2046_v20 = vadd.f32 %v2045_v44, %v2019_v38 }
 0x184   :  { %8805 = vmatpush.msk.msrb.mxu0 %vm11242_vm13, %v9273_v27  ;;  %8813 = vmatpush.msk.msrb.mxu3 %vm11286_vm1, %v9273_v27 }
 0x185   :  { %3455 = vmatmul.f32.vlgmr.msrb.gmra.mxu3 %v9691_v5  ;;  %8816 = vmatpush.msk.msra.mxu1 %vm11215_vm12, %v9273_v27  ;;  %8381 = vst [vmem:[%s16362_s3 + $0x18] sm:$0xff] %v2046_v20  ;;  %vm11601_vm12 = vmor %vm280_vm6, %vm528_vm4  ;;  %vm178_vm6 = vcmp.eq.s32.totalorder %v9352_v19, %v11536_v30  ;;  %v11725_v20 = vld [vmem:[#allocation3 + $0x10] ss:$2 sm:$0xff] }
 0x186   :  { %8821 = vmatpush.msk.msra.mxu2 %vm11390_vm15, %v9273_v27  ;;  %3571 = vmatpush.msra.mxu3 %v3570_v53  ;;  %v8600_v40 = vsel %vm11601_vm12, 1.0, %v9272_v0  ;;  %v11728_v22 = vperm.slane %v11725_v20, 5 }
 0x187   :  { %8806 = vmatpush.msk.msrb.mxu0 %vm11270_vm7, %v9273_v27  ;;  %8817 = vmatpush.msk.msra.mxu1 %vm11242_vm13, %v9273_v27  ;;  %vm212_vm13 = vcmp.eq.s32.totalorder %v9349_v18, %v11536_v30  ;;  %v2161_v44 = vpop.f32.mrf.mxu2 }
 0x188   :  { %8822 = vmatpush.msk.msra.mxu2 %vm11430_vm5, %v9273_v27  ;;  %3577 = vmatpush.msra.mxu3 %v3576_v56  ;;  %vm11644_vm4 = vmor %vm212_vm13, %vm460_vm2  ;;  %vm110_vm13 = vcmp.eq.s32.totalorder %v9335_v12, %v11536_v30  ;;  %vm358_vm2 = vcmp.eq.s32.totalorder %v9335_v12, %v11539_v47  ;;  %v3785_v56 = vand.u32 4294901760, %v11673_v58 }
 0x189   :  { %8807 = vmatpush.msk.msrb.mxu0 %vm11286_vm1, %v9273_v27  ;;  %8818 = vmatpush.msk.msra.mxu1 %vm11270_vm7, %v9273_v27  ;;  %vm426_vm7 = vcmp.eq.s32.totalorder %v9352_v19, %v11539_v47  ;;  %v2076_v39 = vpop.f32.mrf.mxu0 }
 0x18a   :  { %3341 = vmatmul.f32.vlgmr.msrb.gmra.mxu0 %v9731_v23  ;;  %8823 = vmatpush.msk.msra.mxu2 %vm11449_vm9, %v9273_v27  ;;  %v2128_v3 = vadd.f32 %v2127_v37, %v2076_v39  ;;  %v3786_v15 = vsub.f32 %v11673_v58, %v3785_v56  ;;  %v2190_v6 = vpop.f32.mrf.mxu3 }
 0x18b   :  { %3472 = vmatpush.msra.mxu0 %v3357_v31  ;;  %3583 = vmatpush.msra.mxu3 %v3582_v9  ;;  %v11660_v31 = vsub.f32 %v8600_v40, %v8600_v40 }
 0x18c   :  { %8819 = vmatpush.msk.msra.mxu1 %vm11286_vm1, %v9273_v27  ;;  %8824 = vmatpush.msk.msra.mxu2 %vm11483_vm10, %v9273_v27  ;;  %vm11665_vm1 = vmor %vm178_vm6, %vm426_vm7  ;;  %v2162_v48 = vadd.f32 %v2161_v44, %v2128_v3  ;;  %v3787_v54 = vand.u32 4294901760, %v3786_v15 }
 0x18d   :  { %3476 = vmatpush.msra.mxu0 %v3363_v35  ;;  %3589 = vmatpush.msra.mxu3 %v3588_v7  ;;  %v8532_v35 = vsel %vm11644_vm4, 1.0, %v9272_v0  ;;  %vm11693_vm6 = vmor %vm144_vm0, %vm392_vm3  ;;  %v8498_v38 = vsel %vm11665_vm1, 1.0, %v9272_v0  ;;  %vm247_vm0 = vcmp.eq.s32.totalorder %v9346_v17, %v11728_v22 }
 0x18e   :  { %3521 = vmatmul.f32.vlgmr.msra.gmra.mxu1 %v9666_v57  ;;  %8825 = vmatpush.msk.msra.mxu2 %vm11497_vm8, %v9273_v27  ;;  %v11707_v30 = vsub.f32 %v8532_v35, %v8532_v35  ;;  %vm11709_vm7 = vmor %vm110_vm13, %vm358_vm2  ;;  %v8464_v2 = vsel %vm11693_vm6, 1.0, %v9272_v0  ;;  %v2191_v26 = vadd.f32 %v2190_v6, %v2162_v48 }
 0x18f   :  { %8826 = vmatpush.msk.msrb.mxu1 %vm11373_vm11, %v9273_v27  ;;  %3480 = vmatpush.msra.mxu0 %v3369_v46  ;;  %v3779_v46 = vand.u32 4294901760, %v11660_v31  ;;  %v8430_v9 = vsel %vm11709_vm7, 1.0, %v9272_v0  ;;  %v11752_v36 = vsub.f32 %v8464_v2, %v8464_v2 }
 0x190   :  { %3595 = vmatpush.msra.mxu3 %v3594_v10  ;;  %3552 = vmatmul.f32.vlgmr.msra.gmra.mxu2 %v9731_v23  ;;  %v3791_v7 = vand.u32 4294901760, %v11707_v30  ;;  %v11768_v45 = vsub.f32 %v8430_v9, %v8430_v9  ;;  %v2256_v10 = vpop.f32.mrf.mxu1 }
 0x191   :  { %8827 = vmatpush.msk.msrb.mxu1 %vm11390_vm15, %v9273_v27  ;;  %3683 = vmatpush.msrb.mxu2 %v3568_v49  ;;  %v11723_v49 = vsub.f32 %v8498_v38, %v8498_v38 }
 0x192   :  { %3484 = vmatpush.msra.mxu0 %v3375_v34  ;;  %3601 = vmatpush.msra.mxu3 %v3600_v33  ;;  %v11730_v34 = vld [vmem:[#allocation3 + $0x11] ss:$2 sm:$0xff] }
 0x193   :  { %3603 = vmatmul.f32.vlgmr.msra.gmra.mxu3 %v9666_v57  ;;  %8828 = vmatpush.msk.msrb.mxu1 %vm11430_vm5, %v9273_v27  ;;  %v11733_v55 = vperm.slane %v11730_v34, 5 }
 0x194   :  { %3687 = vmatpush.msrb.mxu2 %v3574_v29  ;;  %8832 = vmatpush.msk.msrb.mxu3 %vm11373_vm11, %v9273_v27  ;;  %v3780_v29 = vsub.f32 %v11660_v31, %v3779_v46  ;;  %vm281_vm11 = vcmp.eq.s32.totalorder %v9343_v16, %v11728_v22 }
 0x195   :  { %3488 = vmatpush.msra.mxu0 %v3381_v63  ;;  %8829 = vmatpush.msk.msrb.mxu1 %vm11449_vm9, %v9273_v27  ;;  %v3797_v63 = vand.u32 4294901760, %v11723_v49  ;;  %vm495_vm3 = vcmp.eq.s32.totalorder %v9346_v17, %v11733_v55  ;;  %vm461_vm2 = vcmp.eq.s32.totalorder %v9349_v18, %v11733_v55  ;;  %v2287_v9 = vpop.f32.mrf.mxu2 }
 0x196   :  { %3691 = vmatpush.msrb.mxu2 %v3580_v1  ;;  %8833 = vmatpush.msk.msrb.mxu3 %vm11390_vm15, %v9273_v27  ;;  %vm529_vm15 = vcmp.eq.s32.totalorder %v9343_v16, %v11733_v55  ;;  %v3792_v1 = vsub.f32 %v11707_v30, %v3791_v7  ;;  %vm11817_vm13 = vmor %vm247_vm0, %vm495_vm3  ;;  %vm393_vm3 = vcmp.eq.s32.totalorder %v9355_v21, %v11733_v55 }
 0x197   :  { %3492 = vmatpush.msra.mxu0 %v3387_v25  ;;  %8830 = vmatpush.msk.msrb.mxu1 %vm11483_vm10, %v9273_v27  ;;  %v3781_v25 = vand.u32 4294901760, %v3780_v29  ;;  %v2229_v40 = vpop.f32.mrf.mxu0  ;;  %v8567_v37 = vsel %vm11817_vm13, 1.0, %v9272_v0 }
 0x198   :  { %3494 = vmatmul.f32.vlgmr.msra.gmra.mxu0 %v9666_v57  ;;  %3695 = vmatpush.msrb.mxu2 %v3586_v8  ;;  %v3803_v8 = vand.u32 4294901760, %v11752_v36  ;;  %v3793_v39 = vand.u32 4294901760, %v3792_v1  ;;  %v11871_v44 = vsub.f32 %v8567_v37, %v8567_v37  ;;  %v2338_v48 = vpop.f32.mrf.mxu3  ;;  %v11966_v37 = vperm.slane %v11730_v34, 6 }
 0x199   :  { %3619 = vmatpush.msrb.mxu0 %v11441_v52  ;;  %8834 = vmatpush.msk.msrb.mxu3 %vm11430_vm5, %v9273_v27  ;;  %vm11800_vm5 = vmor %vm281_vm11, %vm529_vm15  ;;  %v2230_v52 = vadd.f32 %v2229_v40, %v2191_v26  ;;  %vm179_vm11 = vcmp.eq.s32.totalorder %v9352_v19, %v11728_v22  ;;  %vm427_vm15 = vcmp.eq.s32.totalorder %v9352_v19, %v11733_v55 }
 0x19a   :  { %8831 = vmatpush.msk.msrb.mxu1 %vm11497_vm8, %v9273_v27  ;;  %3699 = vmatpush.msrb.mxu2 %v3592_v41  ;;  %v3798_v41 = vsub.f32 %v11723_v49, %v3797_v63  ;;  %v3804_v35 = vsub.f32 %v11752_v36, %v3803_v8  ;;  %vm11876_vm0 = vmor %vm179_vm11, %vm427_vm15 }
 0x19b   :  { %3622 = vmatpush.msrb.mxu0 %v11444_v13  ;;  %8835 = vmatpush.msk.msrb.mxu3 %vm11449_vm9, %v9273_v27  ;;  %v3809_v13 = vand.u32 4294901760, %v11768_v45  ;;  %vm213_vm9 = vcmp.eq.s32.totalorder %v9349_v18, %v11728_v22  ;;  %v2257_v59 = vadd.f32 %v2256_v10, %v2230_v52  ;;  %v8499_v6 = vsel %vm11876_vm0, 1.0, %v9272_v0 }
 0x19c   :  { %3666 = vmatmul.f32.vlgmr.msrb.gmra.mxu1 %v9691_v5  ;;  %3703 = vmatpush.msrb.mxu2 %v3598_v24  ;;  %v8601_v24 = vsel %vm11800_vm5, 1.0, %v9272_v0  ;;  %v3799_v32 = vand.u32 4294901760, %v3798_v41  ;;  %v3805_v2 = vand.u32 4294901760, %v3804_v35 }
 0x19d   :  { %3782 = vmatpush.msra.mxu1 %v3781_v25  ;;  %3625 = vmatpush.msrb.mxu0 %v11488_v42  ;;  %8382 = vst [vmem:[%s16362_s3 + $0x20] sm:$0xff] %v2257_v59  ;;  %v3810_v38 = vsub.f32 %v11768_v45, %v3809_v13  ;;  %v11868_v3 = vsub.f32 %v8601_v24, %v8601_v24  ;;  %v3996_v25 = vand.u32 4294901760, %v11871_v44  ;;  %v11963_v24 = vperm.slane %v11725_v20, 6 }
 0x19e   :  { %8836 = vmatpush.msk.msrb.mxu3 %vm11483_vm10, %v9273_v27  ;;  %3705 = vmatmul.f32.vlgmr.msrb.gmra.mxu2 %v9666_v57  ;;  %vm11857_vm10 = vmor %vm213_vm9, %vm461_vm2  ;;  %vm111_vm9 = vcmp.eq.s32.totalorder %v9335_v12, %v11728_v22  ;;  %vm359_vm2 = vcmp.eq.s32.totalorder %v9335_v12, %v11733_v55  ;;  %v11936_v55 = vsub.f32 %v8499_v6, %v8499_v6 }
 0x19f   :  { %3788 = vmatpush.msra.mxu1 %v3787_v54  ;;  %3830 = vmatpush.msra.mxu2 %v11660_v31  ;;  %v8533_v4 = vsel %vm11857_vm10, 1.0, %v9272_v0  ;;  %v3811_v29 = vand.u32 4294901760, %v3810_v38  ;;  %v3990_v15 = vand.u32 4294901760, %v11868_v3  ;;  %vm11924_vm15 = vmor %vm111_vm9, %vm359_vm2  ;;  %v3997_v10 = vsub.f32 %v11871_v44, %v3996_v25 }
 0x1a0   :  { %3628 = vmatpush.msrb.mxu0 %v11509_v60  ;;  %8837 = vmatpush.msk.msrb.mxu3 %vm11497_vm8, %v9273_v27  ;;  %vm145_vm8 = vcmp.eq.s32.totalorder %v9355_v21, %v11728_v22  ;;  %v11915_v26 = vsub.f32 %v8533_v4, %v8533_v4  ;;  %v8431_v54 = vsel %vm11924_vm15, 1.0, %v9272_v0  ;;  %v4008_v38 = vand.u32 4294901760, %v11936_v55 }
 0x1a1   :  { %3732 = vmatmul.f32.vlgmr.msrb.gmra.mxu3 %v9666_v57  ;;  %3794 = vmatpush.msra.mxu1 %v3793_v39  ;;  %vm11910_vm11 = vmor %vm145_vm8, %vm393_vm3  ;;  %v3991_v52 = vsub.f32 %v11868_v3, %v3990_v15  ;;  %v2401_v39 = vpop.f32.mrf.mxu1  ;;  %v3998_v28 = vand.u32 4294901760, %v3997_v10  ;;  %vm248_vm8 = vcmp.eq.s32.totalorder %v9346_v17, %v11963_v24  ;;  %vm496_vm3 = vcmp.eq.s32.totalorder %v9346_v17, %v11966_v37 }
 0x1a2   :  { %3833 = vmatpush.msra.mxu2 %v11673_v58  ;;  %8844 = vmatpush.msk.msra.mxu3 %vm11601_vm12, %v9273_v27  ;;  %v8465_v22 = vsel %vm11910_vm11, 1.0, %v9272_v0  ;;  %v4002_v59 = vand.u32 4294901760, %v11915_v26  ;;  %vm12038_vm9 = vmor %vm248_vm8, %vm496_vm3  ;;  %vm462_vm2 = vcmp.eq.s32.totalorder %v9349_v18, %v11966_v37  ;;  %vm146_vm8 = vcmp.eq.s32.totalorder %v9355_v21, %v11963_v24 }
 0x1a3   :  { %3631 = vmatpush.msrb.mxu0 %v11533_v14  ;;  %3800 = vmatpush.msra.mxu1 %v3799_v32  ;;  %v11960_v35 = vsub.f32 %v8465_v22, %v8465_v22  ;;  %v2440_v4 = vpop.f32.mrf.mxu2  ;;  %v4009_v22 = vsub.f32 %v11936_v55, %v4008_v38  ;;  %v8568_v53 = vsel %vm12038_vm9, 1.0, %v9272_v0  ;;  %vm394_vm3 = vcmp.eq.s32.totalorder %v9355_v21, %v11966_v37 }
 0x1a4   :  { %3836 = vmatpush.msra.mxu2 %v11707_v30  ;;  %8845 = vmatpush.msk.msra.mxu3 %vm11611_vm14, %v9273_v27  ;;  %v12100_v58 = vsub.f32 %v8568_v53, %v8568_v53 }
 0x1a5   :  { %3634 = vmatpush.msrb.mxu0 %v11548_v50  ;;  %3806 = vmatpush.msra.mxu1 %v3805_v2  ;;  %v2339_v50 = vadd.f32 %v2338_v48, %v2287_v9  ;;  %v2372_v40 = vpop.f32.mrf.mxu0  ;;  %v11975_v2 = vsub.f32 %v8431_v54, %v8431_v54  ;;  %v3992_v9 = vand.u32 4294901760, %v3991_v52  ;;  %v4014_v51 = vand.u32 4294901760, %v11960_v35 }
 0x1a6   :  { %3637 = vmatmul.f32.vlgmr.msrb.gmra.mxu0 %v9678_v61  ;;  %3839 = vmatpush.msra.mxu2 %v11723_v49  ;;  %v2467_v6 = vpop.f32.mrf.mxu3  ;;  %v12156_v49 = vperm.slane %v11730_v34, 7 }
 0x1a7   :  { %8838 = vmatpush.msk.msra.mxu0 %vm11601_vm12, %v9273_v27  ;;  %8846 = vmatpush.msk.msra.mxu3 %vm11644_vm4, %v9273_v27  ;;  %v2373_v41 = vadd.f32 %v2372_v40, %v2339_v50  ;;  %v4020_v40 = vand.u32 4294901760, %v11975_v2  ;;  %v4015_v54 = vsub.f32 %v11960_v35, %v4014_v51 }
 0x1a8   :  { %3812 = vmatpush.msra.mxu1 %v3811_v29  ;;  %3842 = vmatpush.msra.mxu2 %v11752_v36  ;;  %v4003_v29 = vsub.f32 %v11915_v26, %v4002_v59 }
 0x1a9   :  { %8839 = vmatpush.msk.msra.mxu0 %vm11611_vm14, %v9273_v27  ;;  %8847 = vmatpush.msk.msra.mxu3 %vm11665_vm1, %v9273_v27  ;;  %v2402_v32 = vadd.f32 %v2401_v39, %v2373_v41  ;;  %v4010_v41 = vand.u32 4294901760, %v4009_v22  ;;  %v4021_v10 = vsub.f32 %v11975_v2, %v4020_v40 }
 0x1aa   :  { %3814 = vmatmul.f32.vlgmr.msra.gmra.mxu1 %v9666_v57  ;;  %3845 = vmatpush.msra.mxu2 %v11768_v45  ;;  %v4004_v62 = vand.u32 4294901760, %v4003_v29 }
 0x1ab   :  { %8850 = vmatpush.msk.msrb.mxu1 %vm11601_vm12, %v9273_v27  ;;  %8840 = vmatpush.msk.msra.mxu0 %vm11644_vm4, %v9273_v27  ;;  %v2441_v48 = vadd.f32 %v2440_v4, %v2402_v32  ;;  %vm282_vm12 = vcmp.eq.s32.totalorder %v9343_v16, %v11963_v24  ;;  %v4016_v4 = vand.u32 4294901760, %v4015_v54  ;;  %v4022_v31 = vand.u32 4294901760, %v4021_v10 }
 0x1ac   :  { %8848 = vmatpush.msk.msra.mxu3 %vm11693_vm6, %v9273_v27  ;;  %3848 = vmatmul.f32.vlgmr.msra.gmra.mxu2 %v9678_v61 }
 0x1ad   :  { %8851 = vmatpush.msk.msrb.mxu1 %vm11611_vm14, %v9273_v27  ;;  %8856 = vmatpush.msk.msrb.mxu2 %vm11800_vm5, %v9273_v27  ;;  %vm530_vm14 = vcmp.eq.s32.totalorder %v9343_v16, %v11966_v37  ;;  %v2468_v50 = vadd.f32 %v2467_v6, %v2441_v48  ;;  %v2549_v48 = vpop.f32.mrf.mxu1  ;;  %v4207_v6 = vand.u32 4294901760, %v12100_v58 }
 0x1ae   :  { %8841 = vmatpush.msk.msra.mxu0 %vm11665_vm1, %v9273_v27  ;;  %8849 = vmatpush.msk.msra.mxu3 %vm11709_vm7, %v9273_v27 }
 0x1af   :  { %3877 = vmatmul.f32.vlgmr.msra.gmra.mxu3 %v9691_v5  ;;  %8852 = vmatpush.msk.msrb.mxu1 %vm11644_vm4, %v9273_v27  ;;  %8383 = vst [vmem:[%s16362_s3 + $0x28] sm:$0xff] %v2468_v50  ;;  %vm12028_vm4 = vmor %vm282_vm12, %vm530_vm14  ;;  %vm180_vm12 = vcmp.eq.s32.totalorder %v9352_v19, %v11963_v24  ;;  %v4208_v36 = vsub.f32 %v12100_v58, %v4207_v6 }
 0x1b0   :  { %8857 = vmatpush.msk.msrb.mxu2 %vm11817_vm13, %v9273_v27  ;;  %3993 = vmatpush.msrb.mxu3 %v3992_v9  ;;  %v8602_v39 = vsel %vm12028_vm4, 1.0, %v9272_v0 }
 0x1b1   :  { %8842 = vmatpush.msk.msra.mxu0 %vm11693_vm6, %v9273_v27  ;;  %8853 = vmatpush.msk.msrb.mxu1 %vm11665_vm1, %v9273_v27  ;;  %vm214_vm1 = vcmp.eq.s32.totalorder %v9349_v18, %v11963_v24  ;;  %v2583_v22 = vpop.f32.mrf.mxu2  ;;  %v4209_v10 = vand.u32 4294901760, %v4208_v36 }
 0x1b2   :  { %8858 = vmatpush.msk.msrb.mxu2 %vm11857_vm10, %v9273_v27  ;;  %3999 = vmatpush.msrb.mxu3 %v3998_v28  ;;  %vm12071_vm14 = vmor %vm214_vm1, %vm462_vm2  ;;  %vm112_vm1 = vcmp.eq.s32.totalorder %v9335_v12, %v11963_v24  ;;  %vm360_vm2 = vcmp.eq.s32.totalorder %v9335_v12, %v11966_v37 }
 0x1b3   :  { %8843 = vmatpush.msk.msra.mxu0 %vm11709_vm7, %v9273_v27  ;;  %8854 = vmatpush.msk.msrb.mxu1 %vm11693_vm6, %v9273_v27  ;;  %vm428_vm6 = vcmp.eq.s32.totalorder %v9352_v19, %v11966_v37  ;;  %v2498_v9 = vpop.f32.mrf.mxu0 }
 0x1b4   :  { %3763 = vmatmul.f32.vlgmr.msra.gmra.mxu0 %v9731_v23  ;;  %8859 = vmatpush.msk.msrb.mxu2 %vm11876_vm0, %v9273_v27  ;;  %v2550_v30 = vadd.f32 %v2549_v48, %v2498_v9  ;;  %v2612_v33 = vpop.f32.mrf.mxu3 }
 0x1b5   :  { %3894 = vmatpush.msrb.mxu0 %v3779_v46  ;;  %4005 = vmatpush.msrb.mxu3 %v4004_v62  ;;  %v12087_v46 = vsub.f32 %v8602_v39, %v8602_v39  ;;  %v12153_v62 = vperm.slane %v11725_v20, 7 }
 0x1b6   :  { %8855 = vmatpush.msk.msrb.mxu1 %vm11709_vm7, %v9273_v27  ;;  %8860 = vmatpush.msk.msrb.mxu2 %vm11910_vm11, %v9273_v27  ;;  %vm12092_vm7 = vmor %vm180_vm12, %vm428_vm6  ;;  %v2584_v54 = vadd.f32 %v2583_v22, %v2550_v30 }
 0x1b7   :  { %3898 = vmatpush.msrb.mxu0 %v3785_v56  ;;  %4011 = vmatpush.msrb.mxu3 %v4010_v41  ;;  %v8534_v56 = vsel %vm12071_vm14, 1.0, %v9272_v0  ;;  %vm12120_vm12 = vmor %vm146_vm8, %vm394_vm3  ;;  %v8500_v29 = vsel %vm12092_vm7, 1.0, %v9272_v0  ;;  %vm249_vm8 = vcmp.eq.s32.totalorder %v9346_v17, %v12153_v62  ;;  %vm497_vm3 = vcmp.eq.s32.totalorder %v9346_v17, %v12156_v49  ;;  %v2678_v39 = vpop.f32.mrf.mxu1 }
 0x1b8   :  { %3943 = vmatmul.f32.vlgmr.msrb.gmra.mxu1 %v9666_v57  ;;  %8861 = vmatpush.msk.msrb.mxu2 %vm11924_vm15, %v9273_v27  ;;  %v12134_v24 = vsub.f32 %v8534_v56, %v8534_v56  ;;  %vm12136_vm6 = vmor %vm112_vm1, %vm360_vm2  ;;  %v8466_v50 = vsel %vm12120_vm12, 1.0, %v9272_v0  ;;  %v2613_v45 = vadd.f32 %v2612_v33, %v2584_v54  ;;  %vm463_vm2 = vcmp.eq.s32.totalorder %v9349_v18, %v12156_v49 }
 0x1b9   :  { %8862 = vmatpush.msk.msra.mxu1 %vm11800_vm5, %v9273_v27  ;;  %3902 = vmatpush.msrb.mxu0 %v3791_v7  ;;  %v4201_v7 = vand.u32 4294901760, %v12087_v46  ;;  %v12175_v11 = vsub.f32 %v8466_v50, %v8466_v50  ;;  %vm12240_vm1 = vmor %vm249_vm8, %vm497_vm3  ;;  %vm395_vm3 = vcmp.eq.s32.totalorder %v9355_v21, %v12156_v49 }
 0x1ba   :  { %4017 = vmatpush.msrb.mxu3 %v4016_v4  ;;  %3974 = vmatmul.f32.vlgmr.msrb.gmra.mxu2 %v9731_v23  ;;  %v4213_v34 = vand.u32 4294901760, %v12134_v24  ;;  %v8569_v9 = vsel %vm12240_vm1, 1.0, %v9272_v0 }
 0x1bb   :  { %8863 = vmatpush.msk.msra.mxu1 %vm11817_vm13, %v9273_v27  ;;  %4105 = vmatpush.msra.mxu2 %v3990_v15  ;;  %v12150_v15 = vsub.f32 %v8500_v29, %v8500_v29  ;;  %v4202_v20 = vsub.f32 %v12087_v46, %v4201_v7  ;;  %v12294_v30 = vsub.f32 %v8569_v9, %v8569_v9 }
 0x1bc   :  { %3906 = vmatpush.msrb.mxu0 %v3797_v63  ;;  %4023 = vmatpush.msrb.mxu3 %v4022_v31  ;;  %v8432_v63 = vsel %vm12136_vm6, 1.0, %v9272_v0 }
 0x1bd   :  { %4025 = vmatmul.f32.vlgmr.msrb.gmra.mxu3 %v9666_v57  ;;  %8864 = vmatpush.msk.msra.mxu1 %vm11857_vm10, %v9273_v27  ;;  %v4418_v33 = vand.u32 4294901760, %v12294_v30 }
 0x1be   :  { %4109 = vmatpush.msra.mxu2 %v3996_v25  ;;  %8868 = vmatpush.msk.msra.mxu3 %vm11800_vm5, %v9273_v27  ;;  %v12191_v25 = vsub.f32 %v8432_v63, %v8432_v63  ;;  %vm283_vm5 = vcmp.eq.s32.totalorder %v9343_v16, %v12153_v62 }
 0x1bf   :  { %3910 = vmatpush.msrb.mxu0 %v3803_v8  ;;  %8865 = vmatpush.msk.msra.mxu1 %vm11876_vm0, %v9273_v27  ;;  %v4219_v8 = vand.u32 4294901760, %v12150_v15  ;;  %v2709_v50 = vpop.f32.mrf.mxu2 }
 0x1c0   :  { %4113 = vmatpush.msra.mxu2 %v4002_v59  ;;  %8869 = vmatpush.msk.msra.mxu3 %vm11817_vm13, %v9273_v27  ;;  %vm531_vm13 = vcmp.eq.s32.totalorder %v9343_v16, %v12156_v49  ;;  %v4214_v59 = vsub.f32 %v12134_v24, %v4213_v34 }
 0x1c1   :  { %3914 = vmatpush.msrb.mxu0 %v3809_v13  ;;  %8866 = vmatpush.msk.msra.mxu1 %vm11910_vm11, %v9273_v27  ;;  %v4203_v13 = vand.u32 4294901760, %v4202_v20  ;;  %v2651_v41 = vpop.f32.mrf.mxu0 }
 0x1c2   :  { %3916 = vmatmul.f32.vlgmr.msrb.gmra.mxu0 %v9666_v57  ;;  %4117 = vmatpush.msra.mxu2 %v4008_v38  ;;  %v4225_v38 = vand.u32 4294901760, %v12175_v11  ;;  %v4215_v4 = vand.u32 4294901760, %v4214_v59  ;;  %v2760_v22 = vpop.f32.mrf.mxu3  ;;  %v12366_v59 = vld [vmem:[#allocation3 + $0x21] ss:$2 sm:$0xff] }
 0x1c3   :  { %4041 = vmatpush.msra.mxu0 %v11868_v3  ;;  %8870 = vmatpush.msk.msra.mxu3 %vm11857_vm10, %v9273_v27  ;;  %vm12223_vm10 = vmor %vm283_vm5, %vm531_vm13  ;;  %v2652_v3 = vadd.f32 %v2651_v41, %v2613_v45  ;;  %vm181_vm5 = vcmp.eq.s32.totalorder %v9352_v19, %v12153_v62  ;;  %vm429_vm13 = vcmp.eq.s32.totalorder %v9352_v19, %v12156_v49  ;;  %v12393_v9 = vperm.slane %v12366_v59, 0 }
 0x1c4   :  { %8867 = vmatpush.msk.msra.mxu1 %vm11924_vm15, %v9273_v27  ;;  %4121 = vmatpush.msra.mxu2 %v4014_v51  ;;  %v4220_v51 = vsub.f32 %v12150_v15, %v4219_v8  ;;  %v4226_v31 = vsub.f32 %v12175_v11, %v4225_v38  ;;  %vm12299_vm8 = vmor %vm181_vm5, %vm429_vm13 }
 0x1c5   :  { %4044 = vmatpush.msra.mxu0 %v11871_v44  ;;  %8871 = vmatpush.msk.msra.mxu3 %vm11876_vm0, %v9273_v27  ;;  %v4231_v44 = vand.u32 4294901760, %v12191_v25  ;;  %vm215_vm0 = vcmp.eq.s32.totalorder %v9349_v18, %v12153_v62  ;;  %v2679_v60 = vadd.f32 %v2678_v39, %v2652_v3  ;;  %v8501_v20 = vsel %vm12299_vm8, 1.0, %v9272_v0 }
 0x1c6   :  { %4088 = vmatmul.f32.vlgmr.msra.gmra.mxu1 %v9691_v5  ;;  %4125 = vmatpush.msra.mxu2 %v4020_v40  ;;  %v8603_v40 = vsel %vm12223_vm10, 1.0, %v9272_v0  ;;  %v4221_v14 = vand.u32 4294901760, %v4220_v51  ;;  %v4227_v29 = vand.u32 4294901760, %v4226_v31  ;;  %v4419_v39 = vsub.f32 %v12294_v30, %v4418_v33 }
 0x1c7   :  { %4204 = vmatpush.msrb.mxu1 %v4203_v13  ;;  %4047 = vmatpush.msra.mxu0 %v11915_v26  ;;  %8384 = vst [vmem:[%s16362_s3 + $0x30] sm:$0xff] %v2679_v60  ;;  %v4232_v56 = vsub.f32 %v12191_v25, %v4231_v44  ;;  %v12291_v48 = vsub.f32 %v8603_v40, %v8603_v40  ;;  %v12364_v13 = vld [vmem:[#allocation3 + $0x20] ss:$2 sm:$0xff] }
 0x1c8   :  { %8872 = vmatpush.msk.msra.mxu3 %vm11910_vm11, %v9273_v27  ;;  %4127 = vmatmul.f32.vlgmr.msra.gmra.mxu2 %v9666_v57  ;;  %vm12280_vm11 = vmor %vm215_vm0, %vm463_vm2  ;;  %vm113_vm0 = vcmp.eq.s32.totalorder %v9335_v12, %v12153_v62  ;;  %vm361_vm2 = vcmp.eq.s32.totalorder %v9335_v12, %v12156_v49  ;;  %v12359_v49 = vsub.f32 %v8501_v20, %v8501_v20  ;;  %v12390_v40 = vperm.slane %v12364_v13, 0 }
 0x1c9   :  { %4210 = vmatpush.msrb.mxu1 %v4209_v10  ;;  %4252 = vmatpush.msrb.mxu2 %v12087_v46  ;;  %v8535_v1 = vsel %vm12280_vm11, 1.0, %v9272_v0  ;;  %v4233_v63 = vand.u32 4294901760, %v4232_v56  ;;  %v4412_v54 = vand.u32 4294901760, %v12291_v48  ;;  %vm12347_vm13 = vmor %vm113_vm0, %vm361_vm2  ;;  %v4420_v52 = vand.u32 4294901760, %v4419_v39 }
 0x1ca   :  { %4050 = vmatpush.msra.mxu0 %v11936_v55  ;;  %8873 = vmatpush.msk.msra.mxu3 %vm11924_vm15, %v9273_v27  ;;  %vm147_vm15 = vcmp.eq.s32.totalorder %v9355_v21, %v12153_v62  ;;  %v12338_v36 = vsub.f32 %v8535_v1, %v8535_v1  ;;  %v8433_v10 = vsel %vm12347_vm13, 1.0, %v9272_v0  ;;  %v4430_v56 = vand.u32 4294901760, %v12359_v49 }
 0x1cb   :  { %4154 = vmatmul.f32.vlgmr.msra.gmra.mxu3 %v9666_v57  ;;  %4216 = vmatpush.msrb.mxu1 %v4215_v4  ;;  %vm12333_vm5 = vmor %vm147_vm15, %vm395_vm3  ;;  %v4413_v3 = vsub.f32 %v12291_v48, %v4412_v54  ;;  %v2823_v4 = vpop.f32.mrf.mxu1  ;;  %vm250_vm15 = vcmp.eq.s32.totalorder %v9346_v17, %v12390_v40  ;;  %vm498_vm3 = vcmp.eq.s32.totalorder %v9346_v17, %v12393_v9 }
 0x1cc   :  { %4255 = vmatpush.msrb.mxu2 %v12100_v58  ;;  %8880 = vmatpush.msk.msrb.mxu3 %vm12028_vm4, %v9273_v27  ;;  %v8467_v62 = vsel %vm12333_vm5, 1.0, %v9272_v0  ;;  %v4424_v60 = vand.u32 4294901760, %v12338_v36  ;;  %vm12465_vm0 = vmor %vm250_vm15, %vm498_vm3  ;;  %vm464_vm2 = vcmp.eq.s32.totalorder %v9349_v18, %v12393_v9  ;;  %vm148_vm15 = vcmp.eq.s32.totalorder %v9355_v21, %v12390_v40 }
 0x1cd   :  { %4053 = vmatpush.msra.mxu0 %v11960_v35  ;;  %4222 = vmatpush.msrb.mxu1 %v4221_v14  ;;  %v12387_v31 = vsub.f32 %v8467_v62, %v8467_v62  ;;  %v2862_v1 = vpop.f32.mrf.mxu2  ;;  %v4431_v62 = vsub.f32 %v12359_v49, %v4430_v56  ;;  %v8570_v28 = vsel %vm12465_vm0, 1.0, %v9272_v0  ;;  %vm396_vm3 = vcmp.eq.s32.totalorder %v9355_v21, %v12393_v9 }
 0x1ce   :  { %4258 = vmatpush.msrb.mxu2 %v12134_v24  ;;  %8881 = vmatpush.msk.msrb.mxu3 %vm12038_vm9, %v9273_v27  ;;  %v12527_v58 = vsub.f32 %v8570_v28, %v8570_v28 }
 0x1cf   :  { %4056 = vmatpush.msra.mxu0 %v11975_v2  ;;  %4228 = vmatpush.msrb.mxu1 %v4227_v29  ;;  %v2761_v2 = vadd.f32 %v2760_v22, %v2709_v50  ;;  %v2794_v41 = vpop.f32.mrf.mxu0  ;;  %v12402_v29 = vsub.f32 %v8433_v10, %v8433_v10  ;;  %v4414_v50 = vand.u32 4294901760, %v4413_v3  ;;  %v4436_v43 = vand.u32 4294901760, %v12387_v31 }
 0x1d0   :  { %4059 = vmatmul.f32.vlgmr.msra.gmra.mxu0 %v9678_v61  ;;  %4261 = vmatpush.msrb.mxu2 %v12150_v15  ;;  %v2889_v20 = vpop.f32.mrf.mxu3  ;;  %v12583_v15 = vperm.slane %v12366_v59, 1 }
 0x1d1   :  { %8874 = vmatpush.msk.msrb.mxu0 %vm12028_vm4, %v9273_v27  ;;  %8882 = vmatpush.msk.msrb.mxu3 %vm12071_vm14, %v9273_v27  ;;  %v2795_v51 = vadd.f32 %v2794_v41, %v2761_v2  ;;  %v4442_v41 = vand.u32 4294901760, %v12402_v29  ;;  %v4437_v10 = vsub.f32 %v12387_v31, %v4436_v43 }
 0x1d2   :  { %4234 = vmatpush.msrb.mxu1 %v4233_v63  ;;  %4264 = vmatpush.msrb.mxu2 %v12175_v11  ;;  %v4425_v63 = vsub.f32 %v12338_v36, %v4424_v60 }
 0x1d3   :  { %8875 = vmatpush.msk.msrb.mxu0 %vm12038_vm9, %v9273_v27  ;;  %8883 = vmatpush.msk.msrb.mxu3 %vm12092_vm7, %v9273_v27  ;;  %v2824_v14 = vadd.f32 %v2823_v4, %v2795_v51  ;;  %v4432_v51 = vand.u32 4294901760, %v4431_v62  ;;  %v4443_v39 = vsub.f32 %v12402_v29, %v4442_v41 }
 0x1d4   :  { %4236 = vmatmul.f32.vlgmr.msrb.gmra.mxu1 %v9666_v57  ;;  %4267 = vmatpush.msrb.mxu2 %v12191_v25  ;;  %v4426_v32 = vand.u32 4294901760, %v4425_v63 }
 0x1d5   :  { %8886 = vmatpush.msk.msra.mxu1 %vm12028_vm4, %v9273_v27  ;;  %8876 = vmatpush.msk.msrb.mxu0 %vm12071_vm14, %v9273_v27  ;;  %v2863_v22 = vadd.f32 %v2862_v1, %v2824_v14  ;;  %vm284_vm4 = vcmp.eq.s32.totalorder %v9343_v16, %v12390_v40  ;;  %v4438_v1 = vand.u32 4294901760, %v4437_v10  ;;  %v4444_v46 = vand.u32 4294901760, %v4443_v39 }
 0x1d6   :  { %8884 = vmatpush.msk.msrb.mxu3 %vm12120_vm12, %v9273_v27  ;;  %4270 = vmatmul.f32.vlgmr.msrb.gmra.mxu2 %v9678_v61 }
 0x1d7   :  { %8887 = vmatpush.msk.msra.mxu1 %vm12038_vm9, %v9273_v27  ;;  %8892 = vmatpush.msk.msra.mxu2 %vm12223_vm10, %v9273_v27  ;;  %vm532_vm9 = vcmp.eq.s32.totalorder %v9343_v16, %v12393_v9  ;;  %v2890_v2 = vadd.f32 %v2889_v20, %v2863_v22  ;;  %v2971_v22 = vpop.f32.mrf.mxu1  ;;  %v4629_v20 = vand.u32 4294901760, %v12527_v58 }
 0x1d8   :  { %8877 = vmatpush.msk.msrb.mxu0 %vm12092_vm7, %v9273_v27  ;;  %8885 = vmatpush.msk.msrb.mxu3 %vm12136_vm6, %v9273_v27 }
 0x1d9   :  { %4299 = vmatmul.f32.vlgmr.msrb.gmra.mxu3 %v9691_v5  ;;  %8888 = vmatpush.msk.msra.mxu1 %vm12071_vm14, %v9273_v27  ;;  %8385 = vst [vmem:[%s16362_s3 + $0x38] sm:$0xff] %v2890_v2  ;;  %vm12455_vm14 = vmor %vm284_vm4, %vm532_vm9  ;;  %vm182_vm4 = vcmp.eq.s32.totalorder %v9352_v19, %v12390_v40  ;;  %v4630_v11 = vsub.f32 %v12527_v58, %v4629_v20 }
 0x1da   :  { %8893 = vmatpush.msk.msra.mxu2 %vm12240_vm1, %v9273_v27  ;;  %4415 = vmatpush.msra.mxu3 %v4414_v50  ;;  %v8604_v4 = vsel %vm12455_vm14, 1.0, %v9272_v0 }
 0x1db   :  { %8878 = vmatpush.msk.msrb.mxu0 %vm12120_vm12, %v9273_v27  ;;  %8889 = vmatpush.msk.msra.mxu1 %vm12092_vm7, %v9273_v27  ;;  %vm216_vm7 = vcmp.eq.s32.totalorder %v9349_v18, %v12390_v40  ;;  %v3005_v62 = vpop.f32.mrf.mxu2  ;;  %v4631_v28 = vand.u32 4294901760, %v4630_v11 }
 0x1dc   :  { %8894 = vmatpush.msk.msra.mxu2 %vm12280_vm11, %v9273_v27  ;;  %4421 = vmatpush.msra.mxu3 %v4420_v52  ;;  %vm12498_vm9 = vmor %vm216_vm7, %vm464_vm2  ;;  %vm114_vm7 = vcmp.eq.s32.totalorder %v9335_v12, %v12390_v40  ;;  %vm362_vm2 = vcmp.eq.s32.totalorder %v9335_v12, %v12393_v9 }
 0x1dd   :  { %8879 = vmatpush.msk.msrb.mxu0 %vm12136_vm6, %v9273_v27  ;;  %8890 = vmatpush.msk.msra.mxu1 %vm12120_vm12, %v9273_v27  ;;  %vm430_vm12 = vcmp.eq.s32.totalorder %v9352_v19, %v12393_v9  ;;  %v2920_v50 = vpop.f32.mrf.mxu0 }
 0x1de   :  { %4185 = vmatmul.f32.vlgmr.msrb.gmra.mxu0 %v9731_v23  ;;  %8895 = vmatpush.msk.msra.mxu2 %vm12299_vm8, %v9273_v27  ;;  %v2972_v24 = vadd.f32 %v2971_v22, %v2920_v50  ;;  %v3034_v53 = vpop.f32.mrf.mxu3 }
 0x1df   :  { %4316 = vmatpush.msra.mxu0 %v4201_v7  ;;  %4427 = vmatpush.msra.mxu3 %v4426_v32  ;;  %v12514_v7 = vsub.f32 %v8604_v4, %v8604_v4  ;;  %v12580_v32 = vperm.slane %v12364_v13, 1 }
 0x1e0   :  { %8891 = vmatpush.msk.msra.mxu1 %vm12136_vm6, %v9273_v27  ;;  %8896 = vmatpush.msk.msra.mxu2 %vm12333_vm5, %v9273_v27  ;;  %vm12519_vm6 = vmor %vm182_vm4, %vm430_vm12  ;;  %v3006_v10 = vadd.f32 %v3005_v62, %v2972_v24 }
 0x1e1   :  { %4320 = vmatpush.msra.mxu0 %v4207_v6  ;;  %4433 = vmatpush.msra.mxu3 %v4432_v51  ;;  %v8536_v6 = vsel %vm12498_vm9, 1.0, %v9272_v0  ;;  %vm12547_vm4 = vmor %vm148_vm15, %vm396_vm3  ;;  %v8502_v63 = vsel %vm12519_vm6, 1.0, %v9272_v0  ;;  %vm251_vm15 = vcmp.eq.s32.totalorder %v9346_v17, %v12580_v32  ;;  %vm499_vm3 = vcmp.eq.s32.totalorder %v9346_v17, %v12583_v15 }
 0x1e2   :  { %4365 = vmatmul.f32.vlgmr.msra.gmra.mxu1 %v9666_v57  ;;  %8897 = vmatpush.msk.msra.mxu2 %vm12347_vm13, %v9273_v27  ;;  %v12561_v40 = vsub.f32 %v8536_v6, %v8536_v6  ;;  %vm12563_vm12 = vmor %vm114_vm7, %vm362_vm2  ;;  %v8468_v2 = vsel %vm12547_vm4, 1.0, %v9272_v0  ;;  %v3035_v25 = vadd.f32 %v3034_v53, %v3006_v10  ;;  %vm465_vm2 = vcmp.eq.s32.totalorder %v9349_v18, %v12583_v15 }
 0x1e3   :  { %8898 = vmatpush.msk.msrb.mxu1 %vm12223_vm10, %v9273_v27  ;;  %4324 = vmatpush.msra.mxu0 %v4213_v34  ;;  %v4623_v34 = vand.u32 4294901760, %v12514_v7  ;;  %v12602_v42 = vsub.f32 %v8468_v2, %v8468_v2  ;;  %vm12667_vm7 = vmor %vm251_vm15, %vm499_vm3  ;;  %vm397_vm3 = vcmp.eq.s32.totalorder %v9355_v21, %v12583_v15 }
 0x1e4   :  { %4439 = vmatpush.msra.mxu3 %v4438_v1  ;;  %4396 = vmatmul.f32.vlgmr.msra.gmra.mxu2 %v9731_v23  ;;  %v4635_v51 = vand.u32 4294901760, %v12561_v40  ;;  %v3100_v1 = vpop.f32.mrf.mxu1  ;;  %v8571_v22 = vsel %vm12667_vm7, 1.0, %v9272_v0 }
 0x1e5   :  { %8899 = vmatpush.msk.msrb.mxu1 %vm12240_vm1, %v9273_v27  ;;  %4527 = vmatpush.msrb.mxu2 %v4412_v54  ;;  %v12577_v54 = vsub.f32 %v8502_v63, %v8502_v63  ;;  %v12721_v62 = vsub.f32 %v8571_v22, %v8571_v22  ;;  %v12816_v22 = vperm.slane %v12366_v59, 2 }
 0x1e6   :  { %4328 = vmatpush.msra.mxu0 %v4219_v8  ;;  %4445 = vmatpush.msra.mxu3 %v4444_v46  ;;  %v8434_v8 = vsel %vm12563_vm12, 1.0, %v9272_v0 }
 0x1e7   :  { %4447 = vmatmul.f32.vlgmr.msra.gmra.mxu3 %v9666_v57  ;;  %8900 = vmatpush.msk.msrb.mxu1 %vm12280_vm11, %v9273_v27  ;;  %v12618_v39 = vsub.f32 %v8434_v8, %v8434_v8 }
 0x1e8   :  { %4531 = vmatpush.msrb.mxu2 %v4418_v33  ;;  %8904 = vmatpush.msk.msrb.mxu3 %vm12223_vm10, %v9273_v27  ;;  %v4624_v33 = vsub.f32 %v12514_v7, %v4623_v34  ;;  %vm285_vm10 = vcmp.eq.s32.totalorder %v9343_v16, %v12580_v32 }
 0x1e9   :  { %4332 = vmatpush.msra.mxu0 %v4225_v38  ;;  %8901 = vmatpush.msk.msrb.mxu1 %vm12299_vm8, %v9273_v27  ;;  %v4641_v38 = vand.u32 4294901760, %v12577_v54  ;;  %v3131_v8 = vpop.f32.mrf.mxu2 }
 0x1ea   :  { %4535 = vmatpush.msrb.mxu2 %v4424_v60  ;;  %8905 = vmatpush.msk.msrb.mxu3 %vm12240_vm1, %v9273_v27  ;;  %vm533_vm1 = vcmp.eq.s32.totalorder %v9343_v16, %v12583_v15  ;;  %v4636_v60 = vsub.f32 %v12561_v40, %v4635_v51 }
 0x1eb   :  { %4336 = vmatpush.msra.mxu0 %v4231_v44  ;;  %8902 = vmatpush.msk.msrb.mxu1 %vm12333_vm5, %v9273_v27  ;;  %v4625_v44 = vand.u32 4294901760, %v4624_v33  ;;  %v3073_v4 = vpop.f32.mrf.mxu0 }
 0x1ec   :  { %4338 = vmatmul.f32.vlgmr.msra.gmra.mxu0 %v9666_v57  ;;  %4539 = vmatpush.msrb.mxu2 %v4430_v56  ;;  %v4647_v56 = vand.u32 4294901760, %v12602_v42  ;;  %v4637_v50 = vand.u32 4294901760, %v4636_v60  ;;  %v3182_v10 = vpop.f32.mrf.mxu3 }
 0x1ed   :  { %4463 = vmatpush.msrb.mxu0 %v12291_v48  ;;  %8906 = vmatpush.msk.msrb.mxu3 %vm12280_vm11, %v9273_v27  ;;  %vm12650_vm11 = vmor %vm285_vm10, %vm533_vm1  ;;  %v3074_v48 = vadd.f32 %v3073_v4, %v3035_v25  ;;  %vm183_vm10 = vcmp.eq.s32.totalorder %v9352_v19, %v12580_v32  ;;  %vm431_vm1 = vcmp.eq.s32.totalorder %v9352_v19, %v12583_v15 }
 0x1ee   :  { %8903 = vmatpush.msk.msrb.mxu1 %vm12347_vm13, %v9273_v27  ;;  %4543 = vmatpush.msrb.mxu2 %v4436_v43  ;;  %v4642_v43 = vsub.f32 %v12577_v54, %v4641_v38  ;;  %v4648_v6 = vsub.f32 %v12602_v42, %v4647_v56  ;;  %vm12726_vm15 = vmor %vm183_vm10, %vm431_vm1 }
 0x1ef   :  { %4466 = vmatpush.msrb.mxu0 %v12294_v30  ;;  %8907 = vmatpush.msk.msrb.mxu3 %vm12299_vm8, %v9273_v27  ;;  %v4653_v30 = vand.u32 4294901760, %v12618_v39  ;;  %vm217_vm8 = vcmp.eq.s32.totalorder %v9349_v18, %v12580_v32  ;;  %v3101_v55 = vadd.f32 %v3100_v1, %v3074_v48  ;;  %v8503_v53 = vsel %vm12726_vm15, 1.0, %v9272_v0 }
 0x1f0   :  { %4510 = vmatmul.f32.vlgmr.msrb.gmra.mxu1 %v9691_v5  ;;  %4547 = vmatpush.msrb.mxu2 %v4442_v41  ;;  %v8605_v41 = vsel %vm12650_vm11, 1.0, %v9272_v0  ;;  %v4643_v35 = vand.u32 4294901760, %v4642_v43  ;;  %v4649_v2 = vand.u32 4294901760, %v4648_v6 }
 0x1f1   :  { %4626 = vmatpush.msra.mxu1 %v4625_v44  ;;  %4469 = vmatpush.msrb.mxu0 %v12338_v36  ;;  %8386 = vst [vmem:[%s16362_s3 + $0x40] sm:$0xff] %v3101_v55  ;;  %v4654_v63 = vsub.f32 %v12618_v39, %v4653_v30  ;;  %v12718_v24 = vsub.f32 %v8605_v41, %v8605_v41  ;;  %v4840_v44 = vand.u32 4294901760, %v12721_v62  ;;  %v12813_v41 = vperm.slane %v12364_v13, 2 }
 0x1f2   :  { %8908 = vmatpush.msk.msrb.mxu3 %vm12333_vm5, %v9273_v27  ;;  %4549 = vmatmul.f32.vlgmr.msrb.gmra.mxu2 %v9666_v57  ;;  %vm12707_vm5 = vmor %vm217_vm8, %vm465_vm2  ;;  %vm115_vm8 = vcmp.eq.s32.totalorder %v9335_v12, %v12580_v32  ;;  %vm363_vm2 = vcmp.eq.s32.totalorder %v9335_v12, %v12583_v15  ;;  %v12786_v15 = vsub.f32 %v8503_v53, %v8503_v53 }
 0x1f3   :  { %4632 = vmatpush.msra.mxu1 %v4631_v28  ;;  %4674 = vmatpush.msra.mxu2 %v12514_v7  ;;  %v8537_v45 = vsel %vm12707_vm5, 1.0, %v9272_v0  ;;  %v4655_v33 = vand.u32 4294901760, %v4654_v63  ;;  %v4834_v11 = vand.u32 4294901760, %v12718_v24  ;;  %vm12774_vm1 = vmor %vm115_vm8, %vm363_vm2  ;;  %v4841_v1 = vsub.f32 %v12721_v62, %v4840_v44 }
 0x1f4   :  { %4472 = vmatpush.msrb.mxu0 %v12359_v49  ;;  %8909 = vmatpush.msk.msrb.mxu3 %vm12347_vm13, %v9273_v27  ;;  %vm149_vm13 = vcmp.eq.s32.totalorder %v9355_v21, %v12580_v32  ;;  %v12765_v25 = vsub.f32 %v8537_v45, %v8537_v45  ;;  %v8435_v28 = vsel %vm12774_vm1, 1.0, %v9272_v0  ;;  %v4852_v63 = vand.u32 4294901760, %v12786_v15 }
 0x1f5   :  { %4576 = vmatmul.f32.vlgmr.msrb.gmra.mxu3 %v9666_v57  ;;  %4638 = vmatpush.msra.mxu1 %v4637_v50  ;;  %vm12760_vm10 = vmor %vm149_vm13, %vm397_vm3  ;;  %v4835_v48 = vsub.f32 %v12718_v24, %v4834_v11  ;;  %v3245_v50 = vpop.f32.mrf.mxu1  ;;  %v4842_v3 = vand.u32 4294901760, %v4841_v1  ;;  %vm252_vm13 = vcmp.eq.s32.totalorder %v9346_v17, %v12813_v41  ;;  %vm500_vm3 = vcmp.eq.s32.totalorder %v9346_v17, %v12816_v22 }
 0x1f6   :  { %4677 = vmatpush.msra.mxu2 %v12527_v58  ;;  %8916 = vmatpush.msk.msra.mxu3 %vm12455_vm14, %v9273_v27  ;;  %v8469_v32 = vsel %vm12760_vm10, 1.0, %v9272_v0  ;;  %v4846_v55 = vand.u32 4294901760, %v12765_v25  ;;  %vm12888_vm8 = vmor %vm252_vm13, %vm500_vm3  ;;  %vm466_vm2 = vcmp.eq.s32.totalorder %v9349_v18, %v12816_v22  ;;  %vm150_vm13 = vcmp.eq.s32.totalorder %v9355_v21, %v12813_v41 }
 0x1f7   :  { %4475 = vmatpush.msrb.mxu0 %v12387_v31  ;;  %4644 = vmatpush.msra.mxu1 %v4643_v35  ;;  %v12810_v6 = vsub.f32 %v8469_v32, %v8469_v32  ;;  %v3284_v45 = vpop.f32.mrf.mxu2  ;;  %v4853_v32 = vsub.f32 %v12786_v15, %v4852_v63  ;;  %v8572_v52 = vsel %vm12888_vm8, 1.0, %v9272_v0  ;;  %vm398_vm3 = vcmp.eq.s32.totalorder %v9355_v21, %v12816_v22 }
 0x1f8   :  { %4680 = vmatpush.msra.mxu2 %v12561_v40  ;;  %8917 = vmatpush.msk.msra.mxu3 %vm12465_vm0, %v9273_v27  ;;  %v12950_v58 = vsub.f32 %v8572_v52, %v8572_v52 }
 0x1f9   :  { %4478 = vmatpush.msrb.mxu0 %v12402_v29  ;;  %4650 = vmatpush.msra.mxu1 %v4649_v2  ;;  %v3183_v29 = vadd.f32 %v3182_v10, %v3131_v8  ;;  %v3216_v4 = vpop.f32.mrf.mxu0  ;;  %v12825_v2 = vsub.f32 %v8435_v28, %v8435_v28  ;;  %v4836_v8 = vand.u32 4294901760, %v4835_v48  ;;  %v4858_v47 = vand.u32 4294901760, %v12810_v6 }
 0x1fa   :  { %4481 = vmatmul.f32.vlgmr.msrb.gmra.mxu0 %v9678_v61  ;;  %4683 = vmatpush.msra.mxu2 %v12577_v54  ;;  %v3311_v53 = vpop.f32.mrf.mxu3  ;;  %v13006_v54 = vperm.slane %v12366_v59, 3 }
 0x1fb   :  { %8910 = vmatpush.msk.msra.mxu0 %vm12455_vm14, %v9273_v27  ;;  %8918 = vmatpush.msk.msra.mxu3 %vm12498_vm9, %v9273_v27  ;;  %v3217_v43 = vadd.f32 %v3216_v4, %v3183_v29  ;;  %v4864_v4 = vand.u32 4294901760, %v12825_v2  ;;  %v4859_v28 = vsub.f32 %v12810_v6, %v4858_v47 }
 0x1fc   :  { %4656 = vmatpush.msra.mxu1 %v4655_v33  ;;  %4686 = vmatpush.msra.mxu2 %v12602_v42  ;;  %v4847_v33 = vsub.f32 %v12765_v25, %v4846_v55 }
 0x1fd   :  { %8911 = vmatpush.msk.msra.mxu0 %vm12465_vm0, %v9273_v27  ;;  %8919 = vmatpush.msk.msra.mxu3 %vm12519_vm6, %v9273_v27  ;;  %v3246_v35 = vadd.f32 %v3245_v50, %v3217_v43  ;;  %v4854_v43 = vand.u32 4294901760, %v4853_v32  ;;  %v4865_v1 = vsub.f32 %v12825_v2, %v4864_v4 }
 0x1fe   :  { %4658 = vmatmul.f32.vlgmr.msra.gmra.mxu1 %v9666_v57  ;;  %4689 = vmatpush.msra.mxu2 %v12618_v39  ;;  %v4848_v14 = vand.u32 4294901760, %v4847_v33 }
 0x1ff   :  { %8922 = vmatpush.msk.msrb.mxu1 %vm12455_vm14, %v9273_v27  ;;  %8912 = vmatpush.msk.msra.mxu0 %vm12498_vm9, %v9273_v27  ;;  %v3285_v10 = vadd.f32 %v3284_v45, %v3246_v35  ;;  %vm286_vm14 = vcmp.eq.s32.totalorder %v9343_v16, %v12813_v41  ;;  %v4860_v45 = vand.u32 4294901760, %v4859_v28  ;;  %v4866_v7 = vand.u32 4294901760, %v4865_v1 }
 0x200   :  { %8920 = vmatpush.msk.msra.mxu3 %vm12547_vm4, %v9273_v27  ;;  %4692 = vmatmul.f32.vlgmr.msra.gmra.mxu2 %v9678_v61 }
 0x201   :  { %8923 = vmatpush.msk.msrb.mxu1 %vm12465_vm0, %v9273_v27  ;;  %8928 = vmatpush.msk.msrb.mxu2 %vm12650_vm11, %v9273_v27  ;;  %vm534_vm0 = vcmp.eq.s32.totalorder %v9343_v16, %v12816_v22  ;;  %v3312_v29 = vadd.f32 %v3311_v53, %v3285_v10  ;;  %v3393_v10 = vpop.f32.mrf.mxu1  ;;  %v5051_v53 = vand.u32 4294901760, %v12950_v58 }
 0x202   :  { %8913 = vmatpush.msk.msra.mxu0 %vm12519_vm6, %v9273_v27  ;;  %8921 = vmatpush.msk.msra.mxu3 %vm12563_vm12, %v9273_v27 }
 0x203   :  { %4721 = vmatmul.f32.vlgmr.msra.gmra.mxu3 %v9691_v5  ;;  %8924 = vmatpush.msk.msrb.mxu1 %vm12498_vm9, %v9273_v27  ;;  %8387 = vst [vmem:[%s16362_s3 + $0x48] sm:$0xff] %v3312_v29  ;;  %vm12878_vm9 = vmor %vm286_vm14, %vm534_vm0  ;;  %vm184_vm14 = vcmp.eq.s32.totalorder %v9352_v19, %v12813_v41  ;;  %v5052_v42 = vsub.f32 %v12950_v58, %v5051_v53 }
 0x204   :  { %8929 = vmatpush.msk.msrb.mxu2 %vm12667_vm7, %v9273_v27  ;;  %4837 = vmatpush.msrb.mxu3 %v4836_v8  ;;  %v8606_v50 = vsel %vm12878_vm9, 1.0, %v9272_v0 }
 0x205   :  { %8914 = vmatpush.msk.msra.mxu0 %vm12547_vm4, %v9273_v27  ;;  %8925 = vmatpush.msk.msrb.mxu1 %vm12519_vm6, %v9273_v27  ;;  %vm218_vm6 = vcmp.eq.s32.totalorder %v9349_v18, %v12813_v41  ;;  %v3427_v32 = vpop.f32.mrf.mxu2  ;;  %v5053_v52 = vand.u32 4294901760, %v5052_v42 }
 0x206   :  { %8930 = vmatpush.msk.msrb.mxu2 %vm12707_vm5, %v9273_v27  ;;  %4843 = vmatpush.msrb.mxu3 %v4842_v3  ;;  %vm12921_vm0 = vmor %vm218_vm6, %vm466_vm2  ;;  %vm116_vm6 = vcmp.eq.s32.totalorder %v9335_v12, %v12813_v41  ;;  %vm364_vm2 = vcmp.eq.s32.totalorder %v9335_v12, %v12816_v22 }
 0x207   :  { %8915 = vmatpush.msk.msra.mxu0 %vm12563_vm12, %v9273_v27  ;;  %8926 = vmatpush.msk.msrb.mxu1 %vm12547_vm4, %v9273_v27  ;;  %vm432_vm4 = vcmp.eq.s32.totalorder %v9352_v19, %v12816_v22  ;;  %v3342_v8 = vpop.f32.mrf.mxu0 }
 0x208   :  { %4607 = vmatmul.f32.vlgmr.msra.gmra.mxu0 %v9731_v23  ;;  %8931 = vmatpush.msk.msrb.mxu2 %vm12726_vm15, %v9273_v27  ;;  %v3394_v40 = vadd.f32 %v3393_v10, %v3342_v8  ;;  %v3456_v46 = vpop.f32.mrf.mxu3 }
 0x209   :  { %4738 = vmatpush.msrb.mxu0 %v4623_v34  ;;  %4849 = vmatpush.msrb.mxu3 %v4848_v14  ;;  %v12937_v34 = vsub.f32 %v8606_v50, %v8606_v50  ;;  %v13003_v14 = vperm.slane %v12364_v13, 3 }
 0x20a   :  { %8927 = vmatpush.msk.msrb.mxu1 %vm12563_vm12, %v9273_v27  ;;  %8932 = vmatpush.msk.msrb.mxu2 %vm12760_vm10, %v9273_v27  ;;  %vm12942_vm12 = vmor %vm184_vm14, %vm432_vm4  ;;  %v3428_v28 = vadd.f32 %v3427_v32, %v3394_v40 }
 0x20b   :  { %4742 = vmatpush.msrb.mxu0 %v4629_v20  ;;  %4855 = vmatpush.msrb.mxu3 %v4854_v43  ;;  %v8538_v20 = vsel %vm12921_vm0, 1.0, %v9272_v0  ;;  %vm12970_vm14 = vmor %vm150_vm13, %vm398_vm3  ;;  %v8504_v33 = vsel %vm12942_vm12, 1.0, %v9272_v0  ;;  %vm253_vm13 = vcmp.eq.s32.totalorder %v9346_v17, %v13003_v14  ;;  %vm501_vm3 = vcmp.eq.s32.totalorder %v9346_v17, %v13006_v54 }
 0x20c   :  { %4787 = vmatmul.f32.vlgmr.msrb.gmra.mxu1 %v9666_v57  ;;  %8933 = vmatpush.msk.msrb.mxu2 %vm12774_vm1, %v9273_v27  ;;  %v12984_v41 = vsub.f32 %v8538_v20, %v8538_v20  ;;  %vm12986_vm4 = vmor %vm116_vm6, %vm364_vm2  ;;  %v8470_v29 = vsel %vm12970_vm14, 1.0, %v9272_v0  ;;  %v3457_v39 = vadd.f32 %v3456_v46, %v3428_v28  ;;  %vm467_vm2 = vcmp.eq.s32.totalorder %v9349_v18, %v13006_v54 }
 0x20d   :  { %8934 = vmatpush.msk.msra.mxu1 %vm12650_vm11, %v9273_v27  ;;  %4746 = vmatpush.msrb.mxu0 %v4635_v51  ;;  %v5045_v51 = vand.u32 4294901760, %v12937_v34  ;;  %v13025_v26 = vsub.f32 %v8470_v29, %v8470_v29  ;;  %vm13090_vm6 = vmor %vm253_vm13, %vm501_vm3  ;;  %vm399_vm3 = vcmp.eq.s32.totalorder %v9355_v21, %v13006_v54 }
 0x20e   :  { %4861 = vmatpush.msrb.mxu3 %v4860_v45  ;;  %4818 = vmatmul.f32.vlgmr.msrb.gmra.mxu2 %v9731_v23  ;;  %v5057_v43 = vand.u32 4294901760, %v12984_v41  ;;  %v3522_v45 = vpop.f32.mrf.mxu1  ;;  %v8573_v10 = vsel %vm13090_vm6, 1.0, %v9272_v0 }
 0x20f   :  { %8935 = vmatpush.msk.msra.mxu1 %vm12667_vm7, %v9273_v27  ;;  %4949 = vmatpush.msra.mxu2 %v4834_v11  ;;  %v13000_v11 = vsub.f32 %v8504_v33, %v8504_v33  ;;  %v13144_v32 = vsub.f32 %v8573_v10, %v8573_v10  ;;  %v13239_v10 = vperm.slane %v12366_v59, 4 }
 0x210   :  { %4750 = vmatpush.msrb.mxu0 %v4641_v38  ;;  %4867 = vmatpush.msrb.mxu3 %v4866_v7  ;;  %v8436_v38 = vsel %vm12986_vm4, 1.0, %v9272_v0 }
 0x211   :  { %4869 = vmatmul.f32.vlgmr.msrb.gmra.mxu3 %v9666_v57  ;;  %8936 = vmatpush.msk.msra.mxu1 %vm12707_vm5, %v9273_v27  ;;  %v13041_v1 = vsub.f32 %v8436_v38, %v8436_v38 }
 0x212   :  { %4953 = vmatpush.msra.mxu2 %v4840_v44  ;;  %8940 = vmatpush.msk.msra.mxu3 %vm12650_vm11, %v9273_v27  ;;  %v5046_v44 = vsub.f32 %v12937_v34, %v5045_v51  ;;  %vm287_vm11 = vcmp.eq.s32.totalorder %v9343_v16, %v13003_v14 }
 0x213   :  { %4754 = vmatpush.msrb.mxu0 %v4647_v56  ;;  %8937 = vmatpush.msk.msra.mxu1 %vm12726_vm15, %v9273_v27  ;;  %v5063_v56 = vand.u32 4294901760, %v13000_v11  ;;  %v3553_v38 = vpop.f32.mrf.mxu2 }
 0x214   :  { %4957 = vmatpush.msra.mxu2 %v4846_v55  ;;  %8941 = vmatpush.msk.msra.mxu3 %vm12667_vm7, %v9273_v27  ;;  %vm535_vm7 = vcmp.eq.s32.totalorder %v9343_v16, %v13006_v54  ;;  %v5058_v55 = vsub.f32 %v12984_v41, %v5057_v43 }
 0x215   :  { %4758 = vmatpush.msrb.mxu0 %v4653_v30  ;;  %8938 = vmatpush.msk.msra.mxu1 %vm12760_vm10, %v9273_v27  ;;  %v5047_v30 = vand.u32 4294901760, %v5046_v44  ;;  %v3495_v50 = vpop.f32.mrf.mxu0 }
 0x216   :  { %4760 = vmatmul.f32.vlgmr.msrb.gmra.mxu0 %v9666_v57  ;;  %4961 = vmatpush.msra.mxu2 %v4852_v63  ;;  %v5069_v63 = vand.u32 4294901760, %v13025_v26  ;;  %v5059_v8 = vand.u32 4294901760, %v5058_v55  ;;  %v3604_v28 = vpop.f32.mrf.mxu3 }
 0x217   :  { %4885 = vmatpush.msra.mxu0 %v12718_v24  ;;  %8942 = vmatpush.msk.msra.mxu3 %vm12707_vm5, %v9273_v27  ;;  %vm13073_vm5 = vmor %vm287_vm11, %vm535_vm7  ;;  %v3496_v24 = vadd.f32 %v3495_v50, %v3457_v39  ;;  %vm185_vm11 = vcmp.eq.s32.totalorder %v9352_v19, %v13003_v14  ;;  %vm433_vm7 = vcmp.eq.s32.totalorder %v9352_v19, %v13006_v54 }
 0x218   :  { %8939 = vmatpush.msk.msra.mxu1 %vm12774_vm1, %v9273_v27  ;;  %4965 = vmatpush.msra.mxu2 %v4858_v47  ;;  %v5064_v47 = vsub.f32 %v13000_v11, %v5063_v56  ;;  %v5070_v20 = vsub.f32 %v13025_v26, %v5069_v63  ;;  %vm13149_vm13 = vmor %vm185_vm11, %vm433_vm7 }
 0x219   :  { %4888 = vmatpush.msra.mxu0 %v12721_v62  ;;  %8943 = vmatpush.msk.msra.mxu3 %vm12726_vm15, %v9273_v27  ;;  %v5075_v62 = vand.u32 4294901760, %v13041_v1  ;;  %vm219_vm15 = vcmp.eq.s32.totalorder %v9349_v18, %v13003_v14  ;;  %v3523_v49 = vadd.f32 %v3522_v45, %v3496_v24  ;;  %v8505_v46 = vsel %vm13149_vm13, 1.0, %v9272_v0 }
 0x21a   :  { %4932 = vmatmul.f32.vlgmr.msra.gmra.mxu1 %v9691_v5  ;;  %4969 = vmatpush.msra.mxu2 %v4864_v4  ;;  %v8607_v4 = vsel %vm13073_vm5, 1.0, %v9272_v0  ;;  %v5065_v31 = vand.u32 4294901760, %v5064_v47  ;;  %v5071_v29 = vand.u32 4294901760, %v5070_v20 }
 0x21b   :  { %5048 = vmatpush.msrb.mxu1 %v5047_v30  ;;  %4891 = vmatpush.msra.mxu0 %v12765_v25  ;;  %8388 = vst [vmem:[%s16362_s3 + $0x50] sm:$0xff] %v3523_v49  ;;  %v5076_v33 = vsub.f32 %v13041_v1, %v5075_v62  ;;  %v13141_v40 = vsub.f32 %v8607_v4, %v8607_v4  ;;  %v5262_v30 = vand.u32 4294901760, %v13144_v32  ;;  %v13236_v4 = vperm.slane %v12364_v13, 4 }
 0x21c   :  { %8944 = vmatpush.msk.msra.mxu3 %vm12760_vm10, %v9273_v27  ;;  %4971 = vmatmul.f32.vlgmr.msra.gmra.mxu2 %v9666_v57  ;;  %vm13130_vm10 = vmor %vm219_vm15, %vm467_vm2  ;;  %vm117_vm15 = vcmp.eq.s32.totalorder %v9335_v12, %v13003_v14  ;;  %vm365_vm2 = vcmp.eq.s32.totalorder %v9335_v12, %v13006_v54  ;;  %v13209_v54 = vsub.f32 %v8505_v46, %v8505_v46 }
 0x21d   :  { %5054 = vmatpush.msrb.mxu1 %v5053_v52  ;;  %5096 = vmatpush.msrb.mxu2 %v12937_v34  ;;  %v8539_v60 = vsel %vm13130_vm10, 1.0, %v9272_v0  ;;  %v5077_v44 = vand.u32 4294901760, %v5076_v33  ;;  %v5256_v42 = vand.u32 4294901760, %v13141_v40  ;;  %vm13197_vm7 = vmor %vm117_vm15, %vm365_vm2  ;;  %v5263_v45 = vsub.f32 %v13144_v32, %v5262_v30 }
 0x21e   :  { %4894 = vmatpush.msra.mxu0 %v12786_v15  ;;  %8945 = vmatpush.msk.msra.mxu3 %vm12774_vm1, %v9273_v27  ;;  %vm151_vm1 = vcmp.eq.s32.totalorder %v9355_v21, %v13003_v14  ;;  %v13188_v39 = vsub.f32 %v8539_v60, %v8539_v60  ;;  %v8437_v52 = vsel %vm13197_vm7, 1.0, %v9272_v0  ;;  %v5274_v33 = vand.u32 4294901760, %v13209_v54 }
 0x21f   :  { %4998 = vmatmul.f32.vlgmr.msra.gmra.mxu3 %v9666_v57  ;;  %5060 = vmatpush.msrb.mxu1 %v5059_v8  ;;  %vm13183_vm11 = vmor %vm151_vm1, %vm399_vm3  ;;  %v5257_v24 = vsub.f32 %v13141_v40, %v5256_v42  ;;  %v3667_v8 = vpop.f32.mrf.mxu1  ;;  %v5264_v48 = vand.u32 4294901760, %v5263_v45  ;;  %vm254_vm1 = vcmp.eq.s32.totalorder %v9346_v17, %v13236_v4  ;;  %vm502_vm3 = vcmp.eq.s32.totalorder %v9346_v17, %v13239_v10 }
 0x220   :  { %5099 = vmatpush.msrb.mxu2 %v12950_v58  ;;  %8952 = vmatpush.msk.msrb.mxu3 %vm12878_vm9, %v9273_v27  ;;  %v8471_v14 = vsel %vm13183_vm11, 1.0, %v9272_v0  ;;  %v5268_v49 = vand.u32 4294901760, %v13188_v39  ;;  %v5275_v46 = vsub.f32 %v13209_v54, %v5274_v33  ;;  %vm13311_vm15 = vmor %vm254_vm1, %vm502_vm3  ;;  %vm468_vm2 = vcmp.eq.s32.totalorder %v9349_v18, %v13239_v10 }
 0x221   :  { %4897 = vmatpush.msra.mxu0 %v12810_v6  ;;  %5066 = vmatpush.msrb.mxu1 %v5065_v31  ;;  %v13233_v20 = vsub.f32 %v8471_v14, %v8471_v14  ;;  %v3706_v60 = vpop.f32.mrf.mxu2  ;;  %v5258_v13 = vand.u32 4294901760, %v5257_v24  ;;  %v8574_v3 = vsel %vm13311_vm15, 1.0, %v9272_v0  ;;  %vm152_vm1 = vcmp.eq.s32.totalorder %v9355_v21, %v13236_v4 }
 0x222   :  { %5102 = vmatpush.msrb.mxu2 %v12984_v41  ;;  %8953 = vmatpush.msk.msrb.mxu3 %vm12888_vm8, %v9273_v27  ;;  %v5276_v24 = vand.u32 4294901760, %v5275_v46  ;;  %vm400_vm3 = vcmp.eq.s32.totalorder %v9355_v21, %v13239_v10  ;;  %v13373_v58 = vsub.f32 %v8574_v3, %v8574_v3 }
 0x223   :  { %4900 = vmatpush.msra.mxu0 %v12825_v2  ;;  %5072 = vmatpush.msrb.mxu1 %v5071_v29  ;;  %v3605_v2 = vadd.f32 %v3604_v28, %v3553_v38  ;;  %v3638_v50 = vpop.f32.mrf.mxu0  ;;  %v13248_v29 = vsub.f32 %v8437_v52, %v8437_v52  ;;  %v5269_v38 = vsub.f32 %v13188_v39, %v5268_v49  ;;  %v5280_v37 = vand.u32 4294901760, %v13233_v20 }
 0x224   :  { %4903 = vmatmul.f32.vlgmr.msra.gmra.mxu0 %v9678_v61  ;;  %5105 = vmatpush.msrb.mxu2 %v13000_v11  ;;  %v3733_v28 = vpop.f32.mrf.mxu3 }
 0x225   :  { %8946 = vmatpush.msk.msrb.mxu0 %vm12878_vm9, %v9273_v27  ;;  %8954 = vmatpush.msk.msrb.mxu3 %vm12921_vm0, %v9273_v27  ;;  %v3639_v47 = vadd.f32 %v3638_v50, %v3605_v2  ;;  %v5286_v2 = vand.u32 4294901760, %v13248_v29  ;;  %v5270_v35 = vand.u32 4294901760, %v5269_v38  ;;  %v5281_v50 = vsub.f32 %v13233_v20, %v5280_v37 }
 0x226   :  { %5078 = vmatpush.msrb.mxu1 %v5077_v44  ;;  %5108 = vmatpush.msrb.mxu2 %v13025_v26 }
 0x227   :  { %8947 = vmatpush.msk.msrb.mxu0 %vm12888_vm8, %v9273_v27  ;;  %8955 = vmatpush.msk.msrb.mxu3 %vm12942_vm12, %v9273_v27  ;;  %v3668_v31 = vadd.f32 %v3667_v8, %v3639_v47  ;;  %v5287_v52 = vsub.f32 %v13248_v29, %v5286_v2  ;;  %v5282_v8 = vand.u32 4294901760, %v5281_v50 }
 0x228   :  { %5080 = vmatmul.f32.vlgmr.msrb.gmra.mxu1 %v9666_v57  ;;  %5111 = vmatpush.msrb.mxu2 %v13041_v1 }
 0x229   :  { %8958 = vmatpush.msk.msra.mxu1 %vm12878_vm9, %v9273_v27  ;;  %8948 = vmatpush.msk.msrb.mxu0 %vm12921_vm0, %v9273_v27  ;;  %v3707_v59 = vadd.f32 %v3706_v60, %v3668_v31  ;;  %vm288_vm9 = vcmp.eq.s32.totalorder %v9343_v16, %v13236_v4  ;;  %v5288_v34 = vand.u32 4294901760, %v5287_v52  ;;  %v3815_v60 = vpop.f32.mrf.mxu1 }
 0x22a   :  { %8956 = vmatpush.msk.msrb.mxu3 %vm12970_vm14, %v9273_v27  ;;  %5114 = vmatmul.f32.vlgmr.msrb.gmra.mxu2 %v9678_v61 }
 0x22b   :  { %8959 = vmatpush.msk.msra.mxu1 %vm12888_vm8, %v9273_v27  ;;  %8964 = vmatpush.msk.msra.mxu2 %vm13073_vm5, %v9273_v27  ;;  %vm536_vm8 = vcmp.eq.s32.totalorder %v9343_v16, %v13239_v10  ;;  %v3734_v44 = vadd.f32 %v3733_v28, %v3707_v59 }
 0x22c   :  { %8949 = vmatpush.msk.msrb.mxu0 %vm12942_vm12, %v9273_v27  ;;  %8957 = vmatpush.msk.msrb.mxu3 %vm12986_vm4, %v9273_v27 }
 0x22d   :  { %5143 = vmatmul.f32.vlgmr.msrb.gmra.mxu3 %v9691_v5  ;;  %8960 = vmatpush.msk.msra.mxu1 %vm12921_vm0, %v9273_v27  ;;  %8389 = vst [vmem:[%s16362_s3 + $0x58] sm:$0xff] %v3734_v44  ;;  %vm13301_vm0 = vmor %vm288_vm9, %vm536_vm8  ;;  %vm186_vm9 = vcmp.eq.s32.totalorder %v9352_v19, %v13236_v4  ;;  %v13425_v44 = vld [vmem:[#allocation3 + $0x20] ss:$2 sm:$0xff] }
 0x22e   :  { %8965 = vmatpush.msk.msra.mxu2 %vm13090_vm6, %v9273_v27  ;;  %5259 = vmatpush.msra.mxu3 %v5258_v13  ;;  %v8608_v47 = vsel %vm13301_vm0, 1.0, %v9272_v0  ;;  %v13428_v11 = vperm.slane %v13425_v44, 5 }
 0x22f   :  { %8950 = vmatpush.msk.msrb.mxu0 %vm12970_vm14, %v9273_v27  ;;  %8961 = vmatpush.msk.msra.mxu1 %vm12942_vm12, %v9273_v27  ;;  %vm220_vm12 = vcmp.eq.s32.totalorder %v9349_v18, %v13236_v4  ;;  %v3849_v28 = vpop.f32.mrf.mxu2 }
 0x230   :  { %8966 = vmatpush.msk.msra.mxu2 %vm13130_vm10, %v9273_v27  ;;  %5265 = vmatpush.msra.mxu3 %v5264_v48  ;;  %vm13344_vm8 = vmor %vm220_vm12, %vm468_vm2  ;;  %vm118_vm12 = vcmp.eq.s32.totalorder %v9335_v12, %v13236_v4  ;;  %vm366_vm2 = vcmp.eq.s32.totalorder %v9335_v12, %v13239_v10  ;;  %v5473_v48 = vand.u32 4294901760, %v13373_v58 }
 0x231   :  { %8951 = vmatpush.msk.msrb.mxu0 %vm12986_vm4, %v9273_v27  ;;  %8962 = vmatpush.msk.msra.mxu1 %vm12970_vm14, %v9273_v27  ;;  %vm434_vm14 = vcmp.eq.s32.totalorder %v9352_v19, %v13239_v10  ;;  %v3764_v31 = vpop.f32.mrf.mxu0 }
 0x232   :  { %5029 = vmatmul.f32.vlgmr.msrb.gmra.mxu0 %v9731_v23  ;;  %8967 = vmatpush.msk.msra.mxu2 %vm13149_vm13, %v9273_v27  ;;  %v3816_v41 = vadd.f32 %v3815_v60, %v3764_v31  ;;  %v5474_v26 = vsub.f32 %v13373_v58, %v5473_v48  ;;  %v3878_v7 = vpop.f32.mrf.mxu3 }
 0x233   :  { %5160 = vmatpush.msra.mxu0 %v5045_v51  ;;  %5271 = vmatpush.msra.mxu3 %v5270_v35  ;;  %v13360_v51 = vsub.f32 %v8608_v47, %v8608_v47 }
 0x234   :  { %8963 = vmatpush.msk.msra.mxu1 %vm12986_vm4, %v9273_v27  ;;  %8968 = vmatpush.msk.msra.mxu2 %vm13183_vm11, %v9273_v27  ;;  %vm13365_vm4 = vmor %vm186_vm9, %vm434_vm14  ;;  %v3850_v50 = vadd.f32 %v3849_v28, %v3816_v41  ;;  %v5475_v3 = vand.u32 4294901760, %v5474_v26 }
 0x235   :  { %5164 = vmatpush.msra.mxu0 %v5051_v53  ;;  %5277 = vmatpush.msra.mxu3 %v5276_v24  ;;  %v8540_v53 = vsel %vm13344_vm8, 1.0, %v9272_v0  ;;  %vm13393_vm9 = vmor %vm152_vm1, %vm400_vm3  ;;  %v8506_v59 = vsel %vm13365_vm4, 1.0, %v9272_v0  ;;  %vm255_vm1 = vcmp.eq.s32.totalorder %v9346_v17, %v13428_v11 }
 0x236   :  { %5209 = vmatmul.f32.vlgmr.msra.gmra.mxu1 %v9666_v57  ;;  %8969 = vmatpush.msk.msra.mxu2 %vm13197_vm7, %v9273_v27  ;;  %v13407_v4 = vsub.f32 %v8540_v53, %v8540_v53  ;;  %vm13409_vm14 = vmor %vm118_vm12, %vm366_vm2  ;;  %v8472_v38 = vsel %vm13393_vm9, 1.0, %v9272_v0  ;;  %v3879_v1 = vadd.f32 %v3878_v7, %v3850_v50 }
 0x237   :  { %8970 = vmatpush.msk.msrb.mxu1 %vm13073_vm5, %v9273_v27  ;;  %5168 = vmatpush.msra.mxu0 %v5057_v43  ;;  %v5467_v43 = vand.u32 4294901760, %v13360_v51  ;;  %v8438_v35 = vsel %vm13409_vm14, 1.0, %v9272_v0  ;;  %v13452_v36 = vsub.f32 %v8472_v38, %v8472_v38 }
 0x238   :  { %5283 = vmatpush.msra.mxu3 %v5282_v8  ;;  %5240 = vmatmul.f32.vlgmr.msra.gmra.mxu2 %v9731_v23  ;;  %v5479_v24 = vand.u32 4294901760, %v13407_v4  ;;  %v13468_v52 = vsub.f32 %v8438_v35, %v8438_v35  ;;  %v3944_v8 = vpop.f32.mrf.mxu1 }
 0x239   :  { %8971 = vmatpush.msk.msrb.mxu1 %vm13090_vm6, %v9273_v27  ;;  %5371 = vmatpush.msrb.mxu2 %v5256_v42  ;;  %v13423_v42 = vsub.f32 %v8506_v59, %v8506_v59 }
 0x23a   :  { %5172 = vmatpush.msra.mxu0 %v5063_v56  ;;  %5289 = vmatpush.msra.mxu3 %v5288_v34  ;;  %v13430_v56 = vld [vmem:[#allocation3 + $0x21] ss:$2 sm:$0xff] }
 0x23b   :  { %5291 = vmatmul.f32.vlgmr.msra.gmra.mxu3 %v9666_v57  ;;  %8972 = vmatpush.msk.msrb.mxu1 %vm13130_vm10, %v9273_v27  ;;  %v13433_v46 = vperm.slane %v13430_v56, 5 }
 0x23c   :  { %5375 = vmatpush.msrb.mxu2 %v5262_v30  ;;  %8976 = vmatpush.msk.msrb.mxu3 %vm13073_vm5, %v9273_v27  ;;  %v5468_v30 = vsub.f32 %v13360_v51, %v5467_v43  ;;  %vm289_vm5 = vcmp.eq.s32.totalorder %v9343_v16, %v13428_v11 }
 0x23d   :  { %5176 = vmatpush.msra.mxu0 %v5069_v63  ;;  %8973 = vmatpush.msk.msrb.mxu1 %vm13149_vm13, %v9273_v27  ;;  %v5485_v63 = vand.u32 4294901760, %v13423_v42  ;;  %vm503_vm3 = vcmp.eq.s32.totalorder %v9346_v17, %v13433_v46  ;;  %vm469_vm2 = vcmp.eq.s32.totalorder %v9349_v18, %v13433_v46  ;;  %v3975_v35 = vpop.f32.mrf.mxu2 }
 0x23e   :  { %5379 = vmatpush.msrb.mxu2 %v5268_v49  ;;  %8977 = vmatpush.msk.msrb.mxu3 %vm13090_vm6, %v9273_v27  ;;  %vm537_vm6 = vcmp.eq.s32.totalorder %v9343_v16, %v13433_v46  ;;  %v5480_v49 = vsub.f32 %v13407_v4, %v5479_v24  ;;  %vm13517_vm12 = vmor %vm255_vm1, %vm503_vm3  ;;  %vm401_vm3 = vcmp.eq.s32.totalorder %v9355_v21, %v13433_v46 }
 0x23f   :  { %5180 = vmatpush.msra.mxu0 %v5075_v62  ;;  %8974 = vmatpush.msk.msrb.mxu1 %vm13183_vm11, %v9273_v27  ;;  %v5469_v62 = vand.u32 4294901760, %v5468_v30  ;;  %v3917_v47 = vpop.f32.mrf.mxu0  ;;  %v8575_v60 = vsel %vm13517_vm12, 1.0, %v9272_v0 }
 0x240   :  { %5182 = vmatmul.f32.vlgmr.msra.gmra.mxu0 %v9666_v57  ;;  %5383 = vmatpush.msrb.mxu2 %v5274_v33  ;;  %v5491_v33 = vand.u32 4294901760, %v13452_v36  ;;  %v5481_v31 = vand.u32 4294901760, %v5480_v49  ;;  %v13571_v28 = vsub.f32 %v8575_v60, %v8575_v60  ;;  %v4026_v50 = vpop.f32.mrf.mxu3  ;;  %v13666_v60 = vperm.slane %v13430_v56, 6 }
 0x241   :  { %5307 = vmatpush.msrb.mxu0 %v13141_v40  ;;  %8978 = vmatpush.msk.msrb.mxu3 %vm13130_vm10, %v9273_v27  ;;  %vm13500_vm10 = vmor %vm289_vm5, %vm537_vm6  ;;  %v3918_v40 = vadd.f32 %v3917_v47, %v3879_v1  ;;  %vm187_vm5 = vcmp.eq.s32.totalorder %v9352_v19, %v13428_v11  ;;  %vm435_vm6 = vcmp.eq.s32.totalorder %v9352_v19, %v13433_v46 }
 0x242   :  { %8975 = vmatpush.msk.msrb.mxu1 %vm13197_vm7, %v9273_v27  ;;  %5387 = vmatpush.msrb.mxu2 %v5280_v37  ;;  %v5486_v37 = vsub.f32 %v13423_v42, %v5485_v63  ;;  %v5492_v53 = vsub.f32 %v13452_v36, %v5491_v33  ;;  %vm13576_vm1 = vmor %vm187_vm5, %vm435_vm6 }
 0x243   :  { %5310 = vmatpush.msrb.mxu0 %v13144_v32  ;;  %8979 = vmatpush.msk.msrb.mxu3 %vm13149_vm13, %v9273_v27  ;;  %v5497_v32 = vand.u32 4294901760, %v13468_v52  ;;  %vm221_vm13 = vcmp.eq.s32.totalorder %v9349_v18, %v13428_v11  ;;  %v3945_v15 = vadd.f32 %v3944_v8, %v3918_v40  ;;  %v8507_v7 = vsel %vm13576_vm1, 1.0, %v9272_v0 }
 0x244   :  { %5354 = vmatmul.f32.vlgmr.msrb.gmra.mxu1 %v9691_v5  ;;  %5391 = vmatpush.msrb.mxu2 %v5286_v2  ;;  %v8609_v2 = vsel %vm13500_vm10, 1.0, %v9272_v0  ;;  %v5487_v6 = vand.u32 4294901760, %v5486_v37  ;;  %v5493_v38 = vand.u32 4294901760, %v5492_v53 }
 0x245   :  { %5470 = vmatpush.msra.mxu1 %v5469_v62  ;;  %5313 = vmatpush.msrb.mxu0 %v13188_v39  ;;  %8390 = vst [vmem:[%s16362_s3 + $0x60] sm:$0xff] %v3945_v15  ;;  %v5498_v59 = vsub.f32 %v13468_v52, %v5497_v32  ;;  %v13568_v41 = vsub.f32 %v8609_v2, %v8609_v2  ;;  %v5684_v62 = vand.u32 4294901760, %v13571_v28  ;;  %v13663_v2 = vperm.slane %v13425_v44, 6 }
 0x246   :  { %8980 = vmatpush.msk.msrb.mxu3 %vm13183_vm11, %v9273_v27  ;;  %5393 = vmatmul.f32.vlgmr.msrb.gmra.mxu2 %v9666_v57  ;;  %vm13557_vm11 = vmor %vm221_vm13, %vm469_vm2  ;;  %vm119_vm13 = vcmp.eq.s32.totalorder %v9335_v12, %v13428_v11  ;;  %vm367_vm2 = vcmp.eq.s32.totalorder %v9335_v12, %v13433_v46  ;;  %v13636_v46 = vsub.f32 %v8507_v7, %v8507_v7 }
 0x247   :  { %5476 = vmatpush.msra.mxu1 %v5475_v3  ;;  %5518 = vmatpush.msra.mxu2 %v13360_v51  ;;  %v8541_v55 = vsel %vm13557_vm11, 1.0, %v9272_v0  ;;  %v5499_v30 = vand.u32 4294901760, %v5498_v59  ;;  %v5678_v26 = vand.u32 4294901760, %v13568_v41  ;;  %vm13624_vm6 = vmor %vm119_vm13, %vm367_vm2  ;;  %v5685_v8 = vsub.f32 %v13571_v28, %v5684_v62 }
 0x248   :  { %5316 = vmatpush.msrb.mxu0 %v13209_v54  ;;  %8981 = vmatpush.msk.msrb.mxu3 %vm13197_vm7, %v9273_v27  ;;  %vm153_vm7 = vcmp.eq.s32.totalorder %v9355_v21, %v13428_v11  ;;  %v13615_v1 = vsub.f32 %v8541_v55, %v8541_v55  ;;  %v8439_v3 = vsel %vm13624_vm6, 1.0, %v9272_v0  ;;  %v5696_v59 = vand.u32 4294901760, %v13636_v46 }
 0x249   :  { %5420 = vmatmul.f32.vlgmr.msrb.gmra.mxu3 %v9666_v57  ;;  %5482 = vmatpush.msra.mxu1 %v5481_v31  ;;  %vm13610_vm5 = vmor %vm153_vm7, %vm401_vm3  ;;  %v5679_v40 = vsub.f32 %v13568_v41, %v5678_v26  ;;  %v4089_v31 = vpop.f32.mrf.mxu1  ;;  %v5686_v14 = vand.u32 4294901760, %v5685_v8  ;;  %vm256_vm7 = vcmp.eq.s32.totalorder %v9346_v17, %v13663_v2  ;;  %vm504_vm3 = vcmp.eq.s32.totalorder %v9346_v17, %v13666_v60 }
 0x24a   :  { %5521 = vmatpush.msra.mxu2 %v13373_v58  ;;  %8988 = vmatpush.msk.msra.mxu3 %vm13301_vm0, %v9273_v27  ;;  %v8473_v11 = vsel %vm13610_vm5, 1.0, %v9272_v0  ;;  %v5690_v15 = vand.u32 4294901760, %v13615_v1  ;;  %vm13738_vm13 = vmor %vm256_vm7, %vm504_vm3  ;;  %vm470_vm2 = vcmp.eq.s32.totalorder %v9349_v18, %v13666_v60  ;;  %vm154_vm7 = vcmp.eq.s32.totalorder %v9355_v21, %v13663_v2 }
 0x24b   :  { %5319 = vmatpush.msrb.mxu0 %v13233_v20  ;;  %5488 = vmatpush.msra.mxu1 %v5487_v6  ;;  %v13660_v53 = vsub.f32 %v8473_v11, %v8473_v11  ;;  %v4128_v55 = vpop.f32.mrf.mxu2  ;;  %v5697_v11 = vsub.f32 %v13636_v46, %v5696_v59  ;;  %v8576_v13 = vsel %vm13738_vm13, 1.0, %v9272_v0  ;;  %vm402_vm3 = vcmp.eq.s32.totalorder %v9355_v21, %v13666_v60 }
 0x24c   :  { %5524 = vmatpush.msra.mxu2 %v13407_v4  ;;  %8989 = vmatpush.msk.msra.mxu3 %vm13311_vm15, %v9273_v27  ;;  %v13800_v58 = vsub.f32 %v8576_v13, %v8576_v13 }
 0x24d   :  { %5322 = vmatpush.msrb.mxu0 %v13248_v29  ;;  %5494 = vmatpush.msra.mxu1 %v5493_v38  ;;  %v4027_v29 = vadd.f32 %v4026_v50, %v3975_v35  ;;  %v4060_v47 = vpop.f32.mrf.mxu0  ;;  %v13675_v38 = vsub.f32 %v8439_v3, %v8439_v3  ;;  %v5680_v35 = vand.u32 4294901760, %v5679_v40  ;;  %v5702_v9 = vand.u32 4294901760, %v13660_v53 }
 0x24e   :  { %5325 = vmatmul.f32.vlgmr.msrb.gmra.mxu0 %v9678_v61  ;;  %5527 = vmatpush.msra.mxu2 %v13423_v42  ;;  %v4155_v7 = vpop.f32.mrf.mxu3  ;;  %v13856_v42 = vperm.slane %v13430_v56, 7 }
 0x24f   :  { %8982 = vmatpush.msk.msra.mxu0 %vm13301_vm0, %v9273_v27  ;;  %8990 = vmatpush.msk.msra.mxu3 %vm13344_vm8, %v9273_v27  ;;  %v4061_v37 = vadd.f32 %v4060_v47, %v4027_v29  ;;  %v5708_v47 = vand.u32 4294901760, %v13675_v38  ;;  %v5703_v3 = vsub.f32 %v13660_v53, %v5702_v9 }
 0x250   :  { %5500 = vmatpush.msra.mxu1 %v5499_v30  ;;  %5530 = vmatpush.msra.mxu2 %v13452_v36  ;;  %v5691_v30 = vsub.f32 %v13615_v1, %v5690_v15 }
 0x251   :  { %8983 = vmatpush.msk.msra.mxu0 %vm13311_vm15, %v9273_v27  ;;  %8991 = vmatpush.msk.msra.mxu3 %vm13365_vm4, %v9273_v27  ;;  %v4090_v6 = vadd.f32 %v4089_v31, %v4061_v37  ;;  %v5698_v37 = vand.u32 4294901760, %v5697_v11  ;;  %v5709_v8 = vsub.f32 %v13675_v38, %v5708_v47 }
 0x252   :  { %5502 = vmatmul.f32.vlgmr.msra.gmra.mxu1 %v9666_v57  ;;  %5533 = vmatpush.msra.mxu2 %v13468_v52  ;;  %v5692_v45 = vand.u32 4294901760, %v5691_v30 }
 0x253   :  { %8994 = vmatpush.msk.msrb.mxu1 %vm13301_vm0, %v9273_v27  ;;  %8984 = vmatpush.msk.msra.mxu0 %vm13344_vm8, %v9273_v27  ;;  %v4129_v50 = vadd.f32 %v4128_v55, %v4090_v6  ;;  %vm290_vm0 = vcmp.eq.s32.totalorder %v9343_v16, %v13663_v2  ;;  %v5704_v55 = vand.u32 4294901760, %v5703_v3  ;;  %v5710_v51 = vand.u32 4294901760, %v5709_v8 }
 0x254   :  { %8992 = vmatpush.msk.msra.mxu3 %vm13393_vm9, %v9273_v27  ;;  %5536 = vmatmul.f32.vlgmr.msra.gmra.mxu2 %v9678_v61 }
 0x255   :  { %8995 = vmatpush.msk.msrb.mxu1 %vm13311_vm15, %v9273_v27  ;;  %9000 = vmatpush.msk.msrb.mxu2 %vm13500_vm10, %v9273_v27  ;;  %vm538_vm15 = vcmp.eq.s32.totalorder %v9343_v16, %v13666_v60  ;;  %v4156_v29 = vadd.f32 %v4155_v7, %v4129_v50  ;;  %v4237_v50 = vpop.f32.mrf.mxu1  ;;  %v5895_v7 = vand.u32 4294901760, %v13800_v58 }
 0x256   :  { %8985 = vmatpush.msk.msra.mxu0 %vm13365_vm4, %v9273_v27  ;;  %8993 = vmatpush.msk.msra.mxu3 %vm13409_vm14, %v9273_v27 }
 0x257   :  { %5565 = vmatmul.f32.vlgmr.msra.gmra.mxu3 %v9691_v5  ;;  %8996 = vmatpush.msk.msrb.mxu1 %vm13344_vm8, %v9273_v27  ;;  %8391 = vst [vmem:[%s16362_s3 + $0x68] sm:$0xff] %v4156_v29  ;;  %vm13728_vm8 = vmor %vm290_vm0, %vm538_vm15  ;;  %vm188_vm0 = vcmp.eq.s32.totalorder %v9352_v19, %v13663_v2  ;;  %v5896_v36 = vsub.f32 %v13800_v58, %v5895_v7 }
 0x258   :  { %9001 = vmatpush.msk.msrb.mxu2 %vm13517_vm12, %v9273_v27  ;;  %5681 = vmatpush.msrb.mxu3 %v5680_v35  ;;  %v8610_v31 = vsel %vm13728_vm8, 1.0, %v9272_v0 }
 0x259   :  { %8986 = vmatpush.msk.msra.mxu0 %vm13393_vm9, %v9273_v27  ;;  %8997 = vmatpush.msk.msrb.mxu1 %vm13365_vm4, %v9273_v27  ;;  %vm222_vm4 = vcmp.eq.s32.totalorder %v9349_v18, %v13663_v2  ;;  %v4271_v11 = vpop.f32.mrf.mxu2  ;;  %v5897_v8 = vand.u32 4294901760, %v5896_v36 }
 0x25a   :  { %9002 = vmatpush.msk.msrb.mxu2 %vm13557_vm11, %v9273_v27  ;;  %5687 = vmatpush.msrb.mxu3 %v5686_v14  ;;  %vm13771_vm15 = vmor %vm222_vm4, %vm470_vm2  ;;  %vm120_vm4 = vcmp.eq.s32.totalorder %v9335_v12, %v13663_v2  ;;  %vm368_vm2 = vcmp.eq.s32.totalorder %v9335_v12, %v13666_v60 }
 0x25b   :  { %8987 = vmatpush.msk.msra.mxu0 %vm13409_vm14, %v9273_v27  ;;  %8998 = vmatpush.msk.msrb.mxu1 %vm13393_vm9, %v9273_v27  ;;  %vm436_vm9 = vcmp.eq.s32.totalorder %v9352_v19, %v13666_v60  ;;  %v4186_v35 = vpop.f32.mrf.mxu0 }
 0x25c   :  { %5451 = vmatmul.f32.vlgmr.msra.gmra.mxu0 %v9731_v23  ;;  %9003 = vmatpush.msk.msrb.mxu2 %vm13576_vm1, %v9273_v27  ;;  %v4238_v4 = vadd.f32 %v4237_v50, %v4186_v35  ;;  %v4300_v34 = vpop.f32.mrf.mxu3 }
 0x25d   :  { %5582 = vmatpush.msrb.mxu0 %v5467_v43  ;;  %5693 = vmatpush.msrb.mxu3 %v5692_v45  ;;  %v13787_v43 = vsub.f32 %v8610_v31, %v8610_v31  ;;  %v13853_v45 = vperm.slane %v13425_v44, 7 }
 0x25e   :  { %8999 = vmatpush.msk.msrb.mxu1 %vm13409_vm14, %v9273_v27  ;;  %9004 = vmatpush.msk.msrb.mxu2 %vm13610_vm5, %v9273_v27  ;;  %vm13792_vm14 = vmor %vm188_vm0, %vm436_vm9  ;;  %v4272_v3 = vadd.f32 %v4271_v11, %v4238_v4 }
 0x25f   :  { %5586 = vmatpush.msrb.mxu0 %v5473_v48  ;;  %5699 = vmatpush.msrb.mxu3 %v5698_v37  ;;  %v8542_v48 = vsel %vm13771_vm15, 1.0, %v9272_v0  ;;  %vm13820_vm0 = vmor %vm154_vm7, %vm402_vm3  ;;  %v8508_v30 = vsel %vm13792_vm14, 1.0, %v9272_v0  ;;  %vm257_vm7 = vcmp.eq.s32.totalorder %v9346_v17, %v13853_v45  ;;  %vm505_vm3 = vcmp.eq.s32.totalorder %v9346_v17, %v13856_v42  ;;  %v4366_v31 = vpop.f32.mrf.mxu1 }
 0x260   :  { %5631 = vmatmul.f32.vlgmr.msrb.gmra.mxu1 %v9666_v57  ;;  %9005 = vmatpush.msk.msrb.mxu2 %vm13624_vm6, %v9273_v27  ;;  %v13834_v2 = vsub.f32 %v8542_v48, %v8542_v48  ;;  %vm13836_vm9 = vmor %vm120_vm4, %vm368_vm2  ;;  %v8474_v29 = vsel %vm13820_vm0, 1.0, %v9272_v0  ;;  %v4301_v52 = vadd.f32 %v4300_v34, %v4272_v3  ;;  %vm471_vm2 = vcmp.eq.s32.totalorder %v9349_v18, %v13856_v42 }
 0x261   :  { %9006 = vmatpush.msk.msra.mxu1 %vm13500_vm10, %v9273_v27  ;;  %5590 = vmatpush.msrb.mxu0 %v5479_v24  ;;  %v5889_v24 = vand.u32 4294901760, %v13787_v43  ;;  %v13875_v25 = vsub.f32 %v8474_v29, %v8474_v29  ;;  %vm13940_vm4 = vmor %vm257_vm7, %vm505_vm3  ;;  %vm403_vm3 = vcmp.eq.s32.totalorder %v9355_v21, %v13856_v42 }
 0x262   :  { %5705 = vmatpush.msrb.mxu3 %v5704_v55  ;;  %5662 = vmatmul.f32.vlgmr.msrb.gmra.mxu2 %v9731_v23  ;;  %v5901_v56 = vand.u32 4294901760, %v13834_v2  ;;  %v8577_v35 = vsel %vm13940_vm4, 1.0, %v9272_v0 }
 0x263   :  { %9007 = vmatpush.msk.msra.mxu1 %vm13517_vm12, %v9273_v27  ;;  %5793 = vmatpush.msra.mxu2 %v5678_v26  ;;  %v13850_v26 = vsub.f32 %v8508_v30, %v8508_v30  ;;  %v5890_v44 = vsub.f32 %v13787_v43, %v5889_v24  ;;  %v13994_v4 = vsub.f32 %v8577_v35, %v8577_v35 }
 0x264   :  { %5594 = vmatpush.msrb.mxu0 %v5485_v63  ;;  %5711 = vmatpush.msrb.mxu3 %v5710_v51  ;;  %v8440_v63 = vsel %vm13836_vm9, 1.0, %v9272_v0 }
 0x265   :  { %5713 = vmatmul.f32.vlgmr.msrb.gmra.mxu3 %v9666_v57  ;;  %9008 = vmatpush.msk.msra.mxu1 %vm13557_vm11, %v9273_v27  ;;  %v6106_v34 = vand.u32 4294901760, %v13994_v4 }
 0x266   :  { %5797 = vmatpush.msra.mxu2 %v5684_v62  ;;  %9012 = vmatpush.msk.msra.mxu3 %vm13500_vm10, %v9273_v27  ;;  %v13891_v62 = vsub.f32 %v8440_v63, %v8440_v63  ;;  %vm291_vm10 = vcmp.eq.s32.totalorder %v9343_v16, %v13853_v45 }
 0x267   :  { %5598 = vmatpush.msrb.mxu0 %v5491_v33  ;;  %9009 = vmatpush.msk.msra.mxu1 %vm13576_vm1, %v9273_v27  ;;  %v5907_v33 = vand.u32 4294901760, %v13850_v26  ;;  %v4397_v29 = vpop.f32.mrf.mxu2 }
 0x268   :  { %5801 = vmatpush.msra.mxu2 %v5690_v15  ;;  %9013 = vmatpush.msk.msra.mxu3 %vm13517_vm12, %v9273_v27  ;;  %vm539_vm12 = vcmp.eq.s32.totalorder %v9343_v16, %v13856_v42  ;;  %v5902_v15 = vsub.f32 %v13834_v2, %v5901_v56 }
 0x269   :  { %5602 = vmatpush.msrb.mxu0 %v5497_v32  ;;  %9010 = vmatpush.msk.msra.mxu1 %vm13610_vm5, %v9273_v27  ;;  %v5891_v32 = vand.u32 4294901760, %v5890_v44  ;;  %v4339_v37 = vpop.f32.mrf.mxu0 }
 0x26a   :  { %5604 = vmatmul.f32.vlgmr.msrb.gmra.mxu0 %v9666_v57  ;;  %5805 = vmatpush.msra.mxu2 %v5696_v59  ;;  %v5913_v59 = vand.u32 4294901760, %v13875_v25  ;;  %v5903_v55 = vand.u32 4294901760, %v5902_v15  ;;  %v4448_v11 = vpop.f32.mrf.mxu3  ;;  %v14066_v15 = vld [vmem:[#allocation3 + $0x31] ss:$2 sm:$0xff] }
 0x26b   :  { %5729 = vmatpush.msra.mxu0 %v13568_v41  ;;  %9014 = vmatpush.msk.msra.mxu3 %vm13557_vm11, %v9273_v27  ;;  %vm13923_vm11 = vmor %vm291_vm10, %vm539_vm12  ;;  %v4340_v41 = vadd.f32 %v4339_v37, %v4301_v52  ;;  %vm189_vm10 = vcmp.eq.s32.totalorder %v9352_v19, %v13853_v45  ;;  %vm437_vm12 = vcmp.eq.s32.totalorder %v9352_v19, %v13856_v42  ;;  %v14093_v35 = vperm.slane %v14066_v15, 0 }
 0x26c   :  { %9011 = vmatpush.msk.msra.mxu1 %vm13624_vm6, %v9273_v27  ;;  %5809 = vmatpush.msra.mxu2 %v5702_v9  ;;  %v5908_v9 = vsub.f32 %v13850_v26, %v5907_v33  ;;  %v5914_v51 = vsub.f32 %v13875_v25, %v5913_v59  ;;  %vm13999_vm7 = vmor %vm189_vm10, %vm437_vm12 }
 0x26d   :  { %5732 = vmatpush.msra.mxu0 %v13571_v28  ;;  %9015 = vmatpush.msk.msra.mxu3 %vm13576_vm1, %v9273_v27  ;;  %v5919_v28 = vand.u32 4294901760, %v13891_v62  ;;  %vm223_vm1 = vcmp.eq.s32.totalorder %v9349_v18, %v13853_v45  ;;  %v4367_v54 = vadd.f32 %v4366_v31, %v4340_v41  ;;  %v8509_v44 = vsel %vm13999_vm7, 1.0, %v9272_v0 }
 0x26e   :  { %5776 = vmatmul.f32.vlgmr.msra.gmra.mxu1 %v9691_v5  ;;  %5813 = vmatpush.msra.mxu2 %v5708_v47  ;;  %v8611_v47 = vsel %vm13923_vm11, 1.0, %v9272_v0  ;;  %v5909_v20 = vand.u32 4294901760, %v5908_v9  ;;  %v5915_v30 = vand.u32 4294901760, %v5914_v51  ;;  %v6107_v31 = vsub.f32 %v13994_v4, %v6106_v34 }
 0x26f   :  { %5892 = vmatpush.msrb.mxu1 %v5891_v32  ;;  %5735 = vmatpush.msra.mxu0 %v13615_v1  ;;  %8392 = vst [vmem:[%s16362_s3 + $0x70] sm:$0xff] %v4367_v54  ;;  %v5920_v48 = vsub.f32 %v13891_v62, %v5919_v28  ;;  %v13991_v50 = vsub.f32 %v8611_v47, %v8611_v47  ;;  %v14064_v32 = vld [vmem:[#allocation3 + $0x30] ss:$2 sm:$0xff] }
 0x270   :  { %9016 = vmatpush.msk.msra.mxu3 %vm13610_vm5, %v9273_v27  ;;  %5815 = vmatmul.f32.vlgmr.msra.gmra.mxu2 %v9666_v57  ;;  %vm13980_vm5 = vmor %vm223_vm1, %vm471_vm2  ;;  %vm121_vm1 = vcmp.eq.s32.totalorder %v9335_v12, %v13853_v45  ;;  %vm369_vm2 = vcmp.eq.s32.totalorder %v9335_v12, %v13856_v42  ;;  %v14059_v42 = vsub.f32 %v8509_v44, %v8509_v44  ;;  %v14090_v47 = vperm.slane %v14064_v32, 0 }
 0x271   :  { %5898 = vmatpush.msrb.mxu1 %v5897_v8  ;;  %5940 = vmatpush.msrb.mxu2 %v13787_v43  ;;  %v8543_v49 = vsel %vm13980_vm5, 1.0, %v9272_v0  ;;  %v5921_v63 = vand.u32 4294901760, %v5920_v48  ;;  %v6100_v3 = vand.u32 4294901760, %v13991_v50  ;;  %vm14047_vm12 = vmor %vm121_vm1, %vm369_vm2  ;;  %v6108_v40 = vand.u32 4294901760, %v6107_v31 }
 0x272   :  { %5738 = vmatpush.msra.mxu0 %v13636_v46  ;;  %9017 = vmatpush.msk.msra.mxu3 %vm13624_vm6, %v9273_v27  ;;  %vm155_vm6 = vcmp.eq.s32.totalorder %v9355_v21, %v13853_v45  ;;  %v14038_v36 = vsub.f32 %v8543_v49, %v8543_v49  ;;  %v8441_v8 = vsel %vm14047_vm12, 1.0, %v9272_v0  ;;  %v6118_v48 = vand.u32 4294901760, %v14059_v42 }
 0x273   :  { %5842 = vmatmul.f32.vlgmr.msra.gmra.mxu3 %v9666_v57  ;;  %5904 = vmatpush.msrb.mxu1 %v5903_v55  ;;  %vm14033_vm10 = vmor %vm155_vm6, %vm403_vm3  ;;  %v6101_v41 = vsub.f32 %v13991_v50, %v6100_v3  ;;  %v4511_v55 = vpop.f32.mrf.mxu1  ;;  %vm258_vm6 = vcmp.eq.s32.totalorder %v9346_v17, %v14090_v47  ;;  %vm506_vm3 = vcmp.eq.s32.totalorder %v9346_v17, %v14093_v35 }
 0x274   :  { %5943 = vmatpush.msrb.mxu2 %v13800_v58  ;;  %9024 = vmatpush.msk.msrb.mxu3 %vm13728_vm8, %v9273_v27  ;;  %v8475_v45 = vsel %vm14033_vm10, 1.0, %v9272_v0  ;;  %v6112_v54 = vand.u32 4294901760, %v14038_v36  ;;  %vm14165_vm1 = vmor %vm258_vm6, %vm506_vm3  ;;  %vm472_vm2 = vcmp.eq.s32.totalorder %v9349_v18, %v14093_v35  ;;  %vm156_vm6 = vcmp.eq.s32.totalorder %v9355_v21, %v14090_v47 }
 0x275   :  { %5741 = vmatpush.msra.mxu0 %v13660_v53  ;;  %5910 = vmatpush.msrb.mxu1 %v5909_v20  ;;  %v14087_v51 = vsub.f32 %v8475_v45, %v8475_v45  ;;  %v4550_v49 = vpop.f32.mrf.mxu2  ;;  %v6119_v45 = vsub.f32 %v14059_v42, %v6118_v48  ;;  %v8578_v14 = vsel %vm14165_vm1, 1.0, %v9272_v0  ;;  %vm404_vm3 = vcmp.eq.s32.totalorder %v9355_v21, %v14093_v35 }
 0x276   :  { %5946 = vmatpush.msrb.mxu2 %v13834_v2  ;;  %9025 = vmatpush.msk.msrb.mxu3 %vm13738_vm13, %v9273_v27  ;;  %v14227_v58 = vsub.f32 %v8578_v14, %v8578_v14 }
 0x277   :  { %5744 = vmatpush.msra.mxu0 %v13675_v38  ;;  %5916 = vmatpush.msrb.mxu1 %v5915_v30  ;;  %v4449_v38 = vadd.f32 %v4448_v11, %v4397_v29  ;;  %v4482_v37 = vpop.f32.mrf.mxu0  ;;  %v14102_v30 = vsub.f32 %v8441_v8, %v8441_v8  ;;  %v6102_v29 = vand.u32 4294901760, %v6101_v41  ;;  %v6124_v22 = vand.u32 4294901760, %v14087_v51 }
 0x278   :  { %5747 = vmatmul.f32.vlgmr.msra.gmra.mxu0 %v9678_v61  ;;  %5949 = vmatpush.msrb.mxu2 %v13850_v26  ;;  %v4577_v44 = vpop.f32.mrf.mxu3  ;;  %v14283_v26 = vperm.slane %v14066_v15, 1 }
 0x279   :  { %9018 = vmatpush.msk.msrb.mxu0 %vm13728_vm8, %v9273_v27  ;;  %9026 = vmatpush.msk.msrb.mxu3 %vm13771_vm15, %v9273_v27  ;;  %v4483_v9 = vadd.f32 %v4482_v37, %v4449_v38  ;;  %v6130_v37 = vand.u32 4294901760, %v14102_v30  ;;  %v6125_v8 = vsub.f32 %v14087_v51, %v6124_v22 }
 0x27a   :  { %5922 = vmatpush.msrb.mxu1 %v5921_v63  ;;  %5952 = vmatpush.msrb.mxu2 %v13875_v25  ;;  %v6113_v63 = vsub.f32 %v14038_v36, %v6112_v54 }
 0x27b   :  { %9019 = vmatpush.msk.msrb.mxu0 %vm13738_vm13, %v9273_v27  ;;  %9027 = vmatpush.msk.msrb.mxu3 %vm13792_vm14, %v9273_v27  ;;  %v4512_v20 = vadd.f32 %v4511_v55, %v4483_v9  ;;  %v6120_v9 = vand.u32 4294901760, %v6119_v45  ;;  %v6131_v31 = vsub.f32 %v14102_v30, %v6130_v37 }
 0x27c   :  { %5924 = vmatmul.f32.vlgmr.msrb.gmra.mxu1 %v9666_v57  ;;  %5955 = vmatpush.msrb.mxu2 %v13891_v62  ;;  %v6114_v6 = vand.u32 4294901760, %v6113_v63 }
 0x27d   :  { %9030 = vmatpush.msk.msra.mxu1 %vm13728_vm8, %v9273_v27  ;;  %9020 = vmatpush.msk.msrb.mxu0 %vm13771_vm15, %v9273_v27  ;;  %v4551_v11 = vadd.f32 %v4550_v49, %v4512_v20  ;;  %vm292_vm8 = vcmp.eq.s32.totalorder %v9343_v16, %v14090_v47  ;;  %v6126_v49 = vand.u32 4294901760, %v6125_v8  ;;  %v6132_v43 = vand.u32 4294901760, %v6131_v31 }
 0x27e   :  { %9028 = vmatpush.msk.msrb.mxu3 %vm13820_vm0, %v9273_v27  ;;  %5958 = vmatmul.f32.vlgmr.msrb.gmra.mxu2 %v9678_v61 }
 0x27f   :  { %9031 = vmatpush.msk.msra.mxu1 %vm13738_vm13, %v9273_v27  ;;  %9036 = vmatpush.msk.msra.mxu2 %vm13923_vm11, %v9273_v27  ;;  %vm540_vm13 = vcmp.eq.s32.totalorder %v9343_v16, %v14093_v35  ;;  %v4578_v38 = vadd.f32 %v4577_v44, %v4551_v11  ;;  %v4659_v11 = vpop.f32.mrf.mxu1  ;;  %v6317_v44 = vand.u32 4294901760, %v14227_v58 }
 0x280   :  { %9021 = vmatpush.msk.msrb.mxu0 %vm13792_vm14, %v9273_v27  ;;  %9029 = vmatpush.msk.msrb.mxu3 %vm13836_vm9, %v9273_v27 }
 0x281   :  { %5987 = vmatmul.f32.vlgmr.msrb.gmra.mxu3 %v9691_v5  ;;  %9032 = vmatpush.msk.msra.mxu1 %vm13771_vm15, %v9273_v27  ;;  %8393 = vst [vmem:[%s16362_s3 + $0x78] sm:$0xff] %v4578_v38  ;;  %vm14155_vm15 = vmor %vm292_vm8, %vm540_vm13  ;;  %vm190_vm8 = vcmp.eq.s32.totalorder %v9352_v19, %v14090_v47  ;;  %v6318_v25 = vsub.f32 %v14227_v58, %v6317_v44 }
 0x282   :  { %9037 = vmatpush.msk.msra.mxu2 %vm13940_vm4, %v9273_v27  ;;  %6103 = vmatpush.msra.mxu3 %v6102_v29  ;;  %v8612_v55 = vsel %vm14155_vm15, 1.0, %v9272_v0 }
 0x283   :  { %9022 = vmatpush.msk.msrb.mxu0 %vm13820_vm0, %v9273_v27  ;;  %9033 = vmatpush.msk.msra.mxu1 %vm13792_vm14, %v9273_v27  ;;  %vm224_vm14 = vcmp.eq.s32.totalorder %v9349_v18, %v14090_v47  ;;  %v4693_v45 = vpop.f32.mrf.mxu2  ;;  %v6319_v14 = vand.u32 4294901760, %v6318_v25 }
 0x284   :  { %9038 = vmatpush.msk.msra.mxu2 %vm13980_vm5, %v9273_v27  ;;  %6109 = vmatpush.msra.mxu3 %v6108_v40  ;;  %vm14198_vm13 = vmor %vm224_vm14, %vm472_vm2  ;;  %vm122_vm14 = vcmp.eq.s32.totalorder %v9335_v12, %v14090_v47  ;;  %vm370_vm2 = vcmp.eq.s32.totalorder %v9335_v12, %v14093_v35 }
 0x285   :  { %9023 = vmatpush.msk.msrb.mxu0 %vm13836_vm9, %v9273_v27  ;;  %9034 = vmatpush.msk.msra.mxu1 %vm13820_vm0, %v9273_v27  ;;  %vm438_vm0 = vcmp.eq.s32.totalorder %v9352_v19, %v14093_v35  ;;  %v4608_v29 = vpop.f32.mrf.mxu0 }
 0x286   :  { %5873 = vmatmul.f32.vlgmr.msrb.gmra.mxu0 %v9731_v23  ;;  %9039 = vmatpush.msk.msra.mxu2 %vm13999_vm7, %v9273_v27  ;;  %v4660_v2 = vadd.f32 %v4659_v11, %v4608_v29  ;;  %v4722_v13 = vpop.f32.mrf.mxu3 }
 0x287   :  { %6004 = vmatpush.msra.mxu0 %v5889_v24  ;;  %6115 = vmatpush.msra.mxu3 %v6114_v6  ;;  %v14214_v24 = vsub.f32 %v8612_v55, %v8612_v55  ;;  %v14280_v6 = vperm.slane %v14064_v32, 1 }
 0x288   :  { %9035 = vmatpush.msk.msra.mxu1 %vm13836_vm9, %v9273_v27  ;;  %9040 = vmatpush.msk.msra.mxu2 %vm14033_vm10, %v9273_v27  ;;  %vm14219_vm9 = vmor %vm190_vm8, %vm438_vm0  ;;  %v4694_v8 = vadd.f32 %v4693_v45, %v4660_v2 }
 0x289   :  { %6008 = vmatpush.msra.mxu0 %v5895_v7  ;;  %6121 = vmatpush.msra.mxu3 %v6120_v9  ;;  %v8544_v7 = vsel %vm14198_vm13, 1.0, %v9272_v0  ;;  %vm14247_vm8 = vmor %vm156_vm6, %vm404_vm3  ;;  %v8510_v63 = vsel %vm14219_vm9, 1.0, %v9272_v0  ;;  %vm259_vm6 = vcmp.eq.s32.totalorder %v9346_v17, %v14280_v6  ;;  %vm507_vm3 = vcmp.eq.s32.totalorder %v9346_v17, %v14283_v26 }
 0x28a   :  { %6053 = vmatmul.f32.vlgmr.msra.gmra.mxu1 %v9666_v57  ;;  %9041 = vmatpush.msk.msra.mxu2 %vm14047_vm12, %v9273_v27  ;;  %v14261_v47 = vsub.f32 %v8544_v7, %v8544_v7  ;;  %vm14263_vm0 = vmor %vm122_vm14, %vm370_vm2  ;;  %v8476_v38 = vsel %vm14247_vm8, 1.0, %v9272_v0  ;;  %v4723_v62 = vadd.f32 %v4722_v13, %v4694_v8  ;;  %vm473_vm2 = vcmp.eq.s32.totalorder %v9349_v18, %v14283_v26 }
 0x28b   :  { %9042 = vmatpush.msk.msrb.mxu1 %vm13923_vm11, %v9273_v27  ;;  %6012 = vmatpush.msra.mxu0 %v5901_v56  ;;  %v6311_v56 = vand.u32 4294901760, %v14214_v24  ;;  %v14302_v39 = vsub.f32 %v8476_v38, %v8476_v38  ;;  %vm14367_vm14 = vmor %vm259_vm6, %vm507_vm3  ;;  %vm405_vm3 = vcmp.eq.s32.totalorder %v9355_v21, %v14283_v26 }
 0x28c   :  { %6127 = vmatpush.msra.mxu3 %v6126_v49  ;;  %6084 = vmatmul.f32.vlgmr.msra.gmra.mxu2 %v9731_v23  ;;  %v6323_v9 = vand.u32 4294901760, %v14261_v47  ;;  %v4788_v49 = vpop.f32.mrf.mxu1  ;;  %v8579_v11 = vsel %vm14367_vm14, 1.0, %v9272_v0 }
 0x28d   :  { %9043 = vmatpush.msk.msrb.mxu1 %vm13940_vm4, %v9273_v27  ;;  %6215 = vmatpush.msrb.mxu2 %v6100_v3  ;;  %v14277_v3 = vsub.f32 %v8510_v63, %v8510_v63  ;;  %v14421_v45 = vsub.f32 %v8579_v11, %v8579_v11  ;;  %v14516_v11 = vperm.slane %v14066_v15, 2 }
 0x28e   :  { %6016 = vmatpush.msra.mxu0 %v5907_v33  ;;  %6133 = vmatpush.msra.mxu3 %v6132_v43  ;;  %v8442_v33 = vsel %vm14263_vm0, 1.0, %v9272_v0 }
 0x28f   :  { %6135 = vmatmul.f32.vlgmr.msra.gmra.mxu3 %v9666_v57  ;;  %9044 = vmatpush.msk.msrb.mxu1 %vm13980_vm5, %v9273_v27  ;;  %v14318_v31 = vsub.f32 %v8442_v33, %v8442_v33 }
 0x290   :  { %6219 = vmatpush.msrb.mxu2 %v6106_v34  ;;  %9048 = vmatpush.msk.msrb.mxu3 %vm13923_vm11, %v9273_v27  ;;  %v6312_v34 = vsub.f32 %v14214_v24, %v6311_v56  ;;  %vm293_vm11 = vcmp.eq.s32.totalorder %v9343_v16, %v14280_v6 }
 0x291   :  { %6020 = vmatpush.msra.mxu0 %v5913_v59  ;;  %9045 = vmatpush.msk.msrb.mxu1 %vm13999_vm7, %v9273_v27  ;;  %v6329_v59 = vand.u32 4294901760, %v14277_v3  ;;  %v4819_v33 = vpop.f32.mrf.mxu2 }
 0x292   :  { %6223 = vmatpush.msrb.mxu2 %v6112_v54  ;;  %9049 = vmatpush.msk.msrb.mxu3 %vm13940_vm4, %v9273_v27  ;;  %vm541_vm4 = vcmp.eq.s32.totalorder %v9343_v16, %v14283_v26  ;;  %v6324_v54 = vsub.f32 %v14261_v47, %v6323_v9 }
 0x293   :  { %6024 = vmatpush.msra.mxu0 %v5919_v28  ;;  %9046 = vmatpush.msk.msrb.mxu1 %vm14033_vm10, %v9273_v27  ;;  %v6313_v28 = vand.u32 4294901760, %v6312_v34  ;;  %v4761_v55 = vpop.f32.mrf.mxu0 }
 0x294   :  { %6026 = vmatmul.f32.vlgmr.msra.gmra.mxu0 %v9666_v57  ;;  %6227 = vmatpush.msrb.mxu2 %v6118_v48  ;;  %v6335_v48 = vand.u32 4294901760, %v14302_v39  ;;  %v6325_v29 = vand.u32 4294901760, %v6324_v54  ;;  %v4870_v8 = vpop.f32.mrf.mxu3 }
 0x295   :  { %6151 = vmatpush.msrb.mxu0 %v13991_v50  ;;  %9050 = vmatpush.msk.msrb.mxu3 %vm13980_vm5, %v9273_v27  ;;  %vm14350_vm5 = vmor %vm293_vm11, %vm541_vm4  ;;  %v4762_v50 = vadd.f32 %v4761_v55, %v4723_v62  ;;  %vm191_vm11 = vcmp.eq.s32.totalorder %v9352_v19, %v14280_v6  ;;  %vm439_vm4 = vcmp.eq.s32.totalorder %v9352_v19, %v14283_v26 }
 0x296   :  { %9047 = vmatpush.msk.msrb.mxu1 %vm14047_vm12, %v9273_v27  ;;  %6231 = vmatpush.msrb.mxu2 %v6124_v22  ;;  %v6330_v22 = vsub.f32 %v14277_v3, %v6329_v59  ;;  %v6336_v7 = vsub.f32 %v14302_v39, %v6335_v48  ;;  %vm14426_vm6 = vmor %vm191_vm11, %vm439_vm4 }
 0x297   :  { %6154 = vmatpush.msrb.mxu0 %v13994_v4  ;;  %9051 = vmatpush.msk.msrb.mxu3 %vm13999_vm7, %v9273_v27  ;;  %v6341_v4 = vand.u32 4294901760, %v14318_v31  ;;  %vm225_vm7 = vcmp.eq.s32.totalorder %v9349_v18, %v14280_v6  ;;  %v4789_v46 = vadd.f32 %v4788_v49, %v4762_v50  ;;  %v8511_v13 = vsel %vm14426_vm6, 1.0, %v9272_v0 }
 0x298   :  { %6198 = vmatmul.f32.vlgmr.msrb.gmra.mxu1 %v9691_v5  ;;  %6235 = vmatpush.msrb.mxu2 %v6130_v37  ;;  %v8613_v37 = vsel %vm14350_vm5, 1.0, %v9272_v0  ;;  %v6331_v53 = vand.u32 4294901760, %v6330_v22  ;;  %v6337_v38 = vand.u32 4294901760, %v6336_v7 }
 0x299   :  { %6314 = vmatpush.msra.mxu1 %v6313_v28  ;;  %6157 = vmatpush.msrb.mxu0 %v14038_v36  ;;  %8394 = vst [vmem:[%s16362_s3 + $0x80] sm:$0xff] %v4789_v46  ;;  %v6342_v63 = vsub.f32 %v14318_v31, %v6341_v4  ;;  %v14418_v2 = vsub.f32 %v8613_v37, %v8613_v37  ;;  %v6528_v28 = vand.u32 4294901760, %v14421_v45  ;;  %v14513_v37 = vperm.slane %v14064_v32, 2 }
 0x29a   :  { %9052 = vmatpush.msk.msrb.mxu3 %vm14033_vm10, %v9273_v27  ;;  %6237 = vmatmul.f32.vlgmr.msrb.gmra.mxu2 %v9666_v57  ;;  %vm14407_vm10 = vmor %vm225_vm7, %vm473_vm2  ;;  %vm123_vm7 = vcmp.eq.s32.totalorder %v9335_v12, %v14280_v6  ;;  %vm371_vm2 = vcmp.eq.s32.totalorder %v9335_v12, %v14283_v26  ;;  %v14486_v26 = vsub.f32 %v8511_v13, %v8511_v13 }
 0x29b   :  { %6320 = vmatpush.msra.mxu1 %v6319_v14  ;;  %6362 = vmatpush.msra.mxu2 %v14214_v24  ;;  %v8545_v52 = vsel %vm14407_vm10, 1.0, %v9272_v0  ;;  %v6343_v34 = vand.u32 4294901760, %v6342_v63  ;;  %v6522_v25 = vand.u32 4294901760, %v14418_v2  ;;  %vm14474_vm4 = vmor %vm123_vm7, %vm371_vm2  ;;  %v6529_v49 = vsub.f32 %v14421_v45, %v6528_v28 }
 0x29c   :  { %6160 = vmatpush.msrb.mxu0 %v14059_v42  ;;  %9053 = vmatpush.msk.msrb.mxu3 %vm14047_vm12, %v9273_v27  ;;  %vm157_vm12 = vcmp.eq.s32.totalorder %v9355_v21, %v14280_v6  ;;  %v14465_v62 = vsub.f32 %v8545_v52, %v8545_v52  ;;  %v8443_v14 = vsel %vm14474_vm4, 1.0, %v9272_v0  ;;  %v6540_v63 = vand.u32 4294901760, %v14486_v26 }
 0x29d   :  { %6264 = vmatmul.f32.vlgmr.msrb.gmra.mxu3 %v9666_v57  ;;  %6326 = vmatpush.msra.mxu1 %v6325_v29  ;;  %vm14460_vm11 = vmor %vm157_vm12, %vm405_vm3  ;;  %v6523_v50 = vsub.f32 %v14418_v2, %v6522_v25  ;;  %v4933_v29 = vpop.f32.mrf.mxu1  ;;  %v6530_v41 = vand.u32 4294901760, %v6529_v49  ;;  %vm260_vm12 = vcmp.eq.s32.totalorder %v9346_v17, %v14513_v37  ;;  %vm508_vm3 = vcmp.eq.s32.totalorder %v9346_v17, %v14516_v11 }
 0x29e   :  { %6365 = vmatpush.msra.mxu2 %v14227_v58  ;;  %9060 = vmatpush.msk.msra.mxu3 %vm14155_vm15, %v9273_v27  ;;  %v8477_v6 = vsel %vm14460_vm11, 1.0, %v9272_v0  ;;  %v6534_v46 = vand.u32 4294901760, %v14465_v62  ;;  %vm14588_vm7 = vmor %vm260_vm12, %vm508_vm3  ;;  %vm474_vm2 = vcmp.eq.s32.totalorder %v9349_v18, %v14516_v11  ;;  %vm158_vm12 = vcmp.eq.s32.totalorder %v9355_v21, %v14513_v37 }
 0x29f   :  { %6163 = vmatpush.msrb.mxu0 %v14087_v51  ;;  %6332 = vmatpush.msra.mxu1 %v6331_v53  ;;  %v14510_v7 = vsub.f32 %v8477_v6, %v8477_v6  ;;  %v4972_v52 = vpop.f32.mrf.mxu2  ;;  %v6541_v6 = vsub.f32 %v14486_v26, %v6540_v63  ;;  %v8580_v40 = vsel %vm14588_vm7, 1.0, %v9272_v0  ;;  %vm406_vm3 = vcmp.eq.s32.totalorder %v9355_v21, %v14516_v11 }
 0x2a0   :  { %6368 = vmatpush.msra.mxu2 %v14261_v47  ;;  %9061 = vmatpush.msk.msra.mxu3 %vm14165_vm1, %v9273_v27  ;;  %v14650_v58 = vsub.f32 %v8580_v40, %v8580_v40 }
 0x2a1   :  { %6166 = vmatpush.msrb.mxu0 %v14102_v30  ;;  %6338 = vmatpush.msra.mxu1 %v6337_v38  ;;  %v4871_v30 = vadd.f32 %v4870_v8, %v4819_v33  ;;  %v4904_v55 = vpop.f32.mrf.mxu0  ;;  %v14525_v38 = vsub.f32 %v8443_v14, %v8443_v14  ;;  %v6524_v33 = vand.u32 4294901760, %v6523_v50  ;;  %v6546_v10 = vand.u32 4294901760, %v14510_v7 }
 0x2a2   :  { %6169 = vmatmul.f32.vlgmr.msrb.gmra.mxu0 %v9678_v61  ;;  %6371 = vmatpush.msra.mxu2 %v14277_v3  ;;  %v4999_v13 = vpop.f32.mrf.mxu3  ;;  %v14706_v3 = vperm.slane %v14066_v15, 3 }
 0x2a3   :  { %9054 = vmatpush.msk.msra.mxu0 %vm14155_vm15, %v9273_v27  ;;  %9062 = vmatpush.msk.msra.mxu3 %vm14198_vm13, %v9273_v27  ;;  %v4905_v22 = vadd.f32 %v4904_v55, %v4871_v30  ;;  %v6552_v55 = vand.u32 4294901760, %v14525_v38  ;;  %v6547_v14 = vsub.f32 %v14510_v7, %v6546_v10 }
 0x2a4   :  { %6344 = vmatpush.msra.mxu1 %v6343_v34  ;;  %6374 = vmatpush.msra.mxu2 %v14302_v39  ;;  %v6535_v34 = vsub.f32 %v14465_v62, %v6534_v46 }
 0x2a5   :  { %9055 = vmatpush.msk.msra.mxu0 %vm14165_vm1, %v9273_v27  ;;  %9063 = vmatpush.msk.msra.mxu3 %vm14219_vm9, %v9273_v27  ;;  %v4934_v53 = vadd.f32 %v4933_v29, %v4905_v22  ;;  %v6542_v22 = vand.u32 4294901760, %v6541_v6  ;;  %v6553_v49 = vsub.f32 %v14525_v38, %v6552_v55 }
 0x2a6   :  { %6346 = vmatmul.f32.vlgmr.msra.gmra.mxu1 %v9666_v57  ;;  %6377 = vmatpush.msra.mxu2 %v14318_v31  ;;  %v6536_v20 = vand.u32 4294901760, %v6535_v34 }
 0x2a7   :  { %9066 = vmatpush.msk.msrb.mxu1 %vm14155_vm15, %v9273_v27  ;;  %9056 = vmatpush.msk.msra.mxu0 %vm14198_vm13, %v9273_v27  ;;  %v4973_v8 = vadd.f32 %v4972_v52, %v4934_v53  ;;  %vm294_vm15 = vcmp.eq.s32.totalorder %v9343_v16, %v14513_v37  ;;  %v6548_v52 = vand.u32 4294901760, %v6547_v14  ;;  %v6554_v24 = vand.u32 4294901760, %v6553_v49 }
 0x2a8   :  { %9064 = vmatpush.msk.msra.mxu3 %vm14247_vm8, %v9273_v27  ;;  %6380 = vmatmul.f32.vlgmr.msra.gmra.mxu2 %v9678_v61 }
 0x2a9   :  { %9067 = vmatpush.msk.msrb.mxu1 %vm14165_vm1, %v9273_v27  ;;  %9072 = vmatpush.msk.msrb.mxu2 %vm14350_vm5, %v9273_v27  ;;  %vm542_vm1 = vcmp.eq.s32.totalorder %v9343_v16, %v14516_v11  ;;  %v5000_v30 = vadd.f32 %v4999_v13, %v4973_v8  ;;  %v5081_v8 = vpop.f32.mrf.mxu1  ;;  %v6739_v13 = vand.u32 4294901760, %v14650_v58 }
 0x2aa   :  { %9057 = vmatpush.msk.msra.mxu0 %vm14219_vm9, %v9273_v27  ;;  %9065 = vmatpush.msk.msra.mxu3 %vm14263_vm0, %v9273_v27 }
 0x2ab   :  { %6409 = vmatmul.f32.vlgmr.msra.gmra.mxu3 %v9691_v5  ;;  %9068 = vmatpush.msk.msrb.mxu1 %vm14198_vm13, %v9273_v27  ;;  %8395 = vst [vmem:[%s16362_s3 + $0x88] sm:$0xff] %v5000_v30  ;;  %vm14578_vm13 = vmor %vm294_vm15, %vm542_vm1  ;;  %vm192_vm15 = vcmp.eq.s32.totalorder %v9352_v19, %v14513_v37  ;;  %v6740_v39 = vsub.f32 %v14650_v58, %v6739_v13 }
 0x2ac   :  { %9073 = vmatpush.msk.msrb.mxu2 %vm14367_vm14, %v9273_v27  ;;  %6525 = vmatpush.msrb.mxu3 %v6524_v33  ;;  %v8614_v29 = vsel %vm14578_vm13, 1.0, %v9272_v0 }
 0x2ad   :  { %9058 = vmatpush.msk.msra.mxu0 %vm14247_vm8, %v9273_v27  ;;  %9069 = vmatpush.msk.msrb.mxu1 %vm14219_vm9, %v9273_v27  ;;  %vm226_vm9 = vcmp.eq.s32.totalorder %v9349_v18, %v14513_v37  ;;  %v5115_v6 = vpop.f32.mrf.mxu2  ;;  %v6741_v40 = vand.u32 4294901760, %v6740_v39 }
 0x2ae   :  { %9074 = vmatpush.msk.msrb.mxu2 %vm14407_vm10, %v9273_v27  ;;  %6531 = vmatpush.msrb.mxu3 %v6530_v41  ;;  %vm14621_vm1 = vmor %vm226_vm9, %vm474_vm2  ;;  %vm124_vm9 = vcmp.eq.s32.totalorder %v9335_v12, %v14513_v37  ;;  %vm372_vm2 = vcmp.eq.s32.totalorder %v9335_v12, %v14516_v11 }
 0x2af   :  { %9059 = vmatpush.msk.msra.mxu0 %vm14263_vm0, %v9273_v27  ;;  %9070 = vmatpush.msk.msrb.mxu1 %vm14247_vm8, %v9273_v27  ;;  %vm440_vm8 = vcmp.eq.s32.totalorder %v9352_v19, %v14516_v11  ;;  %v5030_v33 = vpop.f32.mrf.mxu0 }
 0x2b0   :  { %6295 = vmatmul.f32.vlgmr.msra.gmra.mxu0 %v9731_v23  ;;  %9075 = vmatpush.msk.msrb.mxu2 %vm14426_vm6, %v9273_v27  ;;  %v5082_v47 = vadd.f32 %v5081_v8, %v5030_v33  ;;  %v5144_v43 = vpop.f32.mrf.mxu3 }
 0x2b1   :  { %6426 = vmatpush.msrb.mxu0 %v6311_v56  ;;  %6537 = vmatpush.msrb.mxu3 %v6536_v20  ;;  %v14637_v56 = vsub.f32 %v8614_v29, %v8614_v29  ;;  %v14703_v20 = vperm.slane %v14064_v32, 3 }
 0x2b2   :  { %9071 = vmatpush.msk.msrb.mxu1 %vm14263_vm0, %v9273_v27  ;;  %9076 = vmatpush.msk.msrb.mxu2 %vm14460_vm11, %v9273_v27  ;;  %vm14642_vm0 = vmor %vm192_vm15, %vm440_vm8  ;;  %v5116_v14 = vadd.f32 %v5115_v6, %v5082_v47 }
 0x2b3   :  { %6430 = vmatpush.msrb.mxu0 %v6317_v44  ;;  %6543 = vmatpush.msrb.mxu3 %v6542_v22  ;;  %v8546_v44 = vsel %vm14621_vm1, 1.0, %v9272_v0  ;;  %vm14670_vm15 = vmor %vm158_vm12, %vm406_vm3  ;;  %v8512_v34 = vsel %vm14642_vm0, 1.0, %v9272_v0  ;;  %vm261_vm12 = vcmp.eq.s32.totalorder %v9346_v17, %v14703_v20  ;;  %vm509_vm3 = vcmp.eq.s32.totalorder %v9346_v17, %v14706_v3 }
 0x2b4   :  { %6475 = vmatmul.f32.vlgmr.msrb.gmra.mxu1 %v9666_v57  ;;  %9077 = vmatpush.msk.msrb.mxu2 %vm14474_vm4, %v9273_v27  ;;  %v14684_v37 = vsub.f32 %v8546_v44, %v8546_v44  ;;  %vm14686_vm8 = vmor %vm124_vm9, %vm372_vm2  ;;  %v8478_v30 = vsel %vm14670_vm15, 1.0, %v9272_v0  ;;  %v5145_v31 = vadd.f32 %v5144_v43, %v5116_v14  ;;  %vm475_vm2 = vcmp.eq.s32.totalorder %v9349_v18, %v14706_v3 }
 0x2b5   :  { %9078 = vmatpush.msk.msra.mxu1 %vm14350_vm5, %v9273_v27  ;;  %6434 = vmatpush.msrb.mxu0 %v6323_v9  ;;  %v6733_v9 = vand.u32 4294901760, %v14637_v56  ;;  %v14725_v1 = vsub.f32 %v8478_v30, %v8478_v30  ;;  %vm14790_vm9 = vmor %vm261_vm12, %vm509_vm3  ;;  %vm407_vm3 = vcmp.eq.s32.totalorder %v9355_v21, %v14706_v3 }
 0x2b6   :  { %6549 = vmatpush.msrb.mxu3 %v6548_v52  ;;  %6506 = vmatmul.f32.vlgmr.msrb.gmra.mxu2 %v9731_v23  ;;  %v6745_v22 = vand.u32 4294901760, %v14684_v37  ;;  %v5210_v52 = vpop.f32.mrf.mxu1  ;;  %v8581_v8 = vsel %vm14790_vm9, 1.0, %v9272_v0 }
 0x2b7   :  { %9079 = vmatpush.msk.msra.mxu1 %vm14367_vm14, %v9273_v27  ;;  %6637 = vmatpush.msra.mxu2 %v6522_v25  ;;  %v14700_v25 = vsub.f32 %v8512_v34, %v8512_v34  ;;  %v14844_v6 = vsub.f32 %v8581_v8, %v8581_v8  ;;  %v14939_v8 = vperm.slane %v14066_v15, 4 }
 0x2b8   :  { %6438 = vmatpush.msrb.mxu0 %v6329_v59  ;;  %6555 = vmatpush.msrb.mxu3 %v6554_v24  ;;  %v8444_v59 = vsel %vm14686_vm8, 1.0, %v9272_v0 }
 0x2b9   :  { %6557 = vmatmul.f32.vlgmr.msrb.gmra.mxu3 %v9666_v57  ;;  %9080 = vmatpush.msk.msra.mxu1 %vm14407_vm10, %v9273_v27  ;;  %v14741_v49 = vsub.f32 %v8444_v59, %v8444_v59 }
 0x2ba   :  { %6641 = vmatpush.msra.mxu2 %v6528_v28  ;;  %9084 = vmatpush.msk.msra.mxu3 %vm14350_vm5, %v9273_v27  ;;  %v6734_v28 = vsub.f32 %v14637_v56, %v6733_v9  ;;  %vm295_vm5 = vcmp.eq.s32.totalorder %v9343_v16, %v14703_v20 }
 0x2bb   :  { %6442 = vmatpush.msrb.mxu0 %v6335_v48  ;;  %9081 = vmatpush.msk.msra.mxu1 %vm14426_vm6, %v9273_v27  ;;  %v6751_v48 = vand.u32 4294901760, %v14700_v25  ;;  %v5241_v59 = vpop.f32.mrf.mxu2 }
 0x2bc   :  { %6645 = vmatpush.msra.mxu2 %v6534_v46  ;;  %9085 = vmatpush.msk.msra.mxu3 %vm14367_vm14, %v9273_v27  ;;  %vm543_vm14 = vcmp.eq.s32.totalorder %v9343_v16, %v14706_v3  ;;  %v6746_v46 = vsub.f32 %v14684_v37, %v6745_v22 }
 0x2bd   :  { %6446 = vmatpush.msrb.mxu0 %v6341_v4  ;;  %9082 = vmatpush.msk.msra.mxu1 %vm14460_vm11, %v9273_v27  ;;  %v6735_v4 = vand.u32 4294901760, %v6734_v28  ;;  %v5183_v29 = vpop.f32.mrf.mxu0 }
 0x2be   :  { %6448 = vmatmul.f32.vlgmr.msrb.gmra.mxu0 %v9666_v57  ;;  %6649 = vmatpush.msra.mxu2 %v6540_v63  ;;  %v6757_v63 = vand.u32 4294901760, %v14725_v1  ;;  %v6747_v33 = vand.u32 4294901760, %v6746_v46  ;;  %v5292_v14 = vpop.f32.mrf.mxu3 }
 0x2bf   :  { %6573 = vmatpush.msra.mxu0 %v14418_v2  ;;  %9086 = vmatpush.msk.msra.mxu3 %vm14407_vm10, %v9273_v27  ;;  %vm14773_vm10 = vmor %vm295_vm5, %vm543_vm14  ;;  %v5184_v2 = vadd.f32 %v5183_v29, %v5145_v31  ;;  %vm193_vm5 = vcmp.eq.s32.totalorder %v9352_v19, %v14703_v20  ;;  %vm441_vm14 = vcmp.eq.s32.totalorder %v9352_v19, %v14706_v3 }
 0x2c0   :  { %9083 = vmatpush.msk.msra.mxu1 %vm14474_vm4, %v9273_v27  ;;  %6653 = vmatpush.msra.mxu2 %v6546_v10  ;;  %v6752_v10 = vsub.f32 %v14700_v25, %v6751_v48  ;;  %v6758_v44 = vsub.f32 %v14725_v1, %v6757_v63  ;;  %vm14849_vm12 = vmor %vm193_vm5, %vm441_vm14 }
 0x2c1   :  { %6576 = vmatpush.msra.mxu0 %v14421_v45  ;;  %9087 = vmatpush.msk.msra.mxu3 %vm14426_vm6, %v9273_v27  ;;  %v6763_v45 = vand.u32 4294901760, %v14741_v49  ;;  %vm227_vm6 = vcmp.eq.s32.totalorder %v9349_v18, %v14703_v20  ;;  %v5211_v42 = vadd.f32 %v5210_v52, %v5184_v2  ;;  %v8513_v43 = vsel %vm14849_vm12, 1.0, %v9272_v0 }
 0x2c2   :  { %6620 = vmatmul.f32.vlgmr.msra.gmra.mxu1 %v9691_v5  ;;  %6657 = vmatpush.msra.mxu2 %v6552_v55  ;;  %v8615_v55 = vsel %vm14773_vm10, 1.0, %v9272_v0  ;;  %v6753_v51 = vand.u32 4294901760, %v6752_v10  ;;  %v6759_v30 = vand.u32 4294901760, %v6758_v44 }
 0x2c3   :  { %6736 = vmatpush.msrb.mxu1 %v6735_v4  ;;  %6579 = vmatpush.msra.mxu0 %v14465_v62  ;;  %8396 = vst [vmem:[%s16362_s3 + $0x90] sm:$0xff] %v5211_v42  ;;  %v6764_v34 = vsub.f32 %v14741_v49, %v6763_v45  ;;  %v14841_v47 = vsub.f32 %v8615_v55, %v8615_v55  ;;  %v6950_v4 = vand.u32 4294901760, %v14844_v6  ;;  %v14936_v55 = vperm.slane %v14064_v32, 4 }
 0x2c4   :  { %9088 = vmatpush.msk.msra.mxu3 %vm14460_vm11, %v9273_v27  ;;  %6659 = vmatmul.f32.vlgmr.msra.gmra.mxu2 %v9666_v57  ;;  %vm14830_vm11 = vmor %vm227_vm6, %vm475_vm2  ;;  %vm125_vm6 = vcmp.eq.s32.totalorder %v9335_v12, %v14703_v20  ;;  %vm373_vm2 = vcmp.eq.s32.totalorder %v9335_v12, %v14706_v3  ;;  %v14909_v3 = vsub.f32 %v8513_v43, %v8513_v43 }
 0x2c5   :  { %6742 = vmatpush.msrb.mxu1 %v6741_v40  ;;  %6784 = vmatpush.msrb.mxu2 %v14637_v56  ;;  %v8547_v54 = vsel %vm14830_vm11, 1.0, %v9272_v0  ;;  %v6765_v28 = vand.u32 4294901760, %v6764_v34  ;;  %v6944_v39 = vand.u32 4294901760, %v14841_v47  ;;  %vm14897_vm14 = vmor %vm125_vm6, %vm373_vm2  ;;  %v6951_v52 = vsub.f32 %v14844_v6, %v6950_v4 }
 0x2c6   :  { %6582 = vmatpush.msra.mxu0 %v14486_v26  ;;  %9089 = vmatpush.msk.msra.mxu3 %vm14474_vm4, %v9273_v27  ;;  %vm159_vm4 = vcmp.eq.s32.totalorder %v9355_v21, %v14703_v20  ;;  %v14888_v31 = vsub.f32 %v8547_v54, %v8547_v54  ;;  %v8445_v40 = vsel %vm14897_vm14, 1.0, %v9272_v0  ;;  %v6962_v34 = vand.u32 4294901760, %v14909_v3 }
 0x2c7   :  { %6686 = vmatmul.f32.vlgmr.msra.gmra.mxu3 %v9666_v57  ;;  %6748 = vmatpush.msrb.mxu1 %v6747_v33  ;;  %vm14883_vm5 = vmor %vm159_vm4, %vm407_vm3  ;;  %v6945_v2 = vsub.f32 %v14841_v47, %v6944_v39  ;;  %v5355_v33 = vpop.f32.mrf.mxu1  ;;  %v6952_v50 = vand.u32 4294901760, %v6951_v52  ;;  %vm262_vm4 = vcmp.eq.s32.totalorder %v9346_v17, %v14936_v55  ;;  %vm510_vm3 = vcmp.eq.s32.totalorder %v9346_v17, %v14939_v8 }
 0x2c8   :  { %6787 = vmatpush.msrb.mxu2 %v14650_v58  ;;  %9096 = vmatpush.msk.msrb.mxu3 %vm14578_vm13, %v9273_v27  ;;  %v8479_v20 = vsel %vm14883_vm5, 1.0, %v9272_v0  ;;  %v6956_v42 = vand.u32 4294901760, %v14888_v31  ;;  %v6963_v43 = vsub.f32 %v14909_v3, %v6962_v34  ;;  %vm15011_vm6 = vmor %vm262_vm4, %vm510_vm3  ;;  %vm476_vm2 = vcmp.eq.s32.totalorder %v9349_v18, %v14939_v8 }
 0x2c9   :  { %6585 = vmatpush.msra.mxu0 %v14510_v7  ;;  %6754 = vmatpush.msrb.mxu1 %v6753_v51  ;;  %v14933_v44 = vsub.f32 %v8479_v20, %v8479_v20  ;;  %v5394_v54 = vpop.f32.mrf.mxu2  ;;  %v6946_v32 = vand.u32 4294901760, %v6945_v2  ;;  %v8582_v41 = vsel %vm15011_vm6, 1.0, %v9272_v0  ;;  %vm160_vm4 = vcmp.eq.s32.totalorder %v9355_v21, %v14936_v55 }
 0x2ca   :  { %6790 = vmatpush.msrb.mxu2 %v14684_v37  ;;  %9097 = vmatpush.msk.msrb.mxu3 %vm14588_vm7, %v9273_v27  ;;  %v6964_v2 = vand.u32 4294901760, %v6963_v43  ;;  %vm408_vm3 = vcmp.eq.s32.totalorder %v9355_v21, %v14939_v8  ;;  %v15073_v58 = vsub.f32 %v8582_v41, %v8582_v41 }
 0x2cb   :  { %6588 = vmatpush.msra.mxu0 %v14525_v38  ;;  %6760 = vmatpush.msrb.mxu1 %v6759_v30  ;;  %v5293_v38 = vadd.f32 %v5292_v14, %v5241_v59  ;;  %v5326_v29 = vpop.f32.mrf.mxu0  ;;  %v14948_v30 = vsub.f32 %v8445_v40, %v8445_v40  ;;  %v6957_v59 = vsub.f32 %v14888_v31, %v6956_v42  ;;  %v6968_v60 = vand.u32 4294901760, %v14933_v44 }
 0x2cc   :  { %6591 = vmatmul.f32.vlgmr.msra.gmra.mxu0 %v9678_v61  ;;  %6793 = vmatpush.msrb.mxu2 %v14700_v25  ;;  %v5421_v14 = vpop.f32.mrf.mxu3 }
 0x2cd   :  { %9090 = vmatpush.msk.msrb.mxu0 %vm14578_vm13, %v9273_v27  ;;  %9098 = vmatpush.msk.msrb.mxu3 %vm14621_vm1, %v9273_v27  ;;  %v5327_v10 = vadd.f32 %v5326_v29, %v5293_v38  ;;  %v6974_v38 = vand.u32 4294901760, %v14948_v30  ;;  %v6958_v53 = vand.u32 4294901760, %v6957_v59  ;;  %v6969_v29 = vsub.f32 %v14933_v44, %v6968_v60 }
 0x2ce   :  { %6766 = vmatpush.msrb.mxu1 %v6765_v28  ;;  %6796 = vmatpush.msrb.mxu2 %v14725_v1 }
 0x2cf   :  { %9091 = vmatpush.msk.msrb.mxu0 %vm14588_vm7, %v9273_v27  ;;  %9099 = vmatpush.msk.msrb.mxu3 %vm14642_vm0, %v9273_v27  ;;  %v5356_v51 = vadd.f32 %v5355_v33, %v5327_v10  ;;  %v6975_v40 = vsub.f32 %v14948_v30, %v6974_v38  ;;  %v6970_v33 = vand.u32 4294901760, %v6969_v29 }
 0x2d0   :  { %6768 = vmatmul.f32.vlgmr.msrb.gmra.mxu1 %v9666_v57  ;;  %6799 = vmatpush.msrb.mxu2 %v14741_v49 }
 0x2d1   :  { %9102 = vmatpush.msk.msra.mxu1 %vm14578_vm13, %v9273_v27  ;;  %9092 = vmatpush.msk.msrb.mxu0 %vm14621_vm1, %v9273_v27  ;;  %v5395_v15 = vadd.f32 %v5394_v54, %v5356_v51  ;;  %vm296_vm13 = vcmp.eq.s32.totalorder %v9343_v16, %v14936_v55  ;;  %v6976_v56 = vand.u32 4294901760, %v6975_v40  ;;  %v5503_v54 = vpop.f32.mrf.mxu1 }
 0x2d2   :  { %9100 = vmatpush.msk.msrb.mxu3 %vm14670_vm15, %v9273_v27  ;;  %6802 = vmatmul.f32.vlgmr.msrb.gmra.mxu2 %v9678_v61 }
 0x2d3   :  { %9103 = vmatpush.msk.msra.mxu1 %vm14588_vm7, %v9273_v27  ;;  %9108 = vmatpush.msk.msra.mxu2 %vm14773_vm10, %v9273_v27  ;;  %vm544_vm7 = vcmp.eq.s32.totalorder %v9343_v16, %v14939_v8  ;;  %v5422_v28 = vadd.f32 %v5421_v14, %v5395_v15 }
 0x2d4   :  { %9093 = vmatpush.msk.msrb.mxu0 %vm14642_vm0, %v9273_v27  ;;  %9101 = vmatpush.msk.msrb.mxu3 %vm14686_vm8, %v9273_v27 }
 0x2d5   :  { %6831 = vmatmul.f32.vlgmr.msrb.gmra.mxu3 %v9691_v5  ;;  %9104 = vmatpush.msk.msra.mxu1 %vm14621_vm1, %v9273_v27  ;;  %8397 = vst [vmem:[%s16362_s3 + $0x98] sm:$0xff] %v5422_v28  ;;  %vm15001_vm1 = vmor %vm296_vm13, %vm544_vm7  ;;  %vm194_vm13 = vcmp.eq.s32.totalorder %v9352_v19, %v14936_v55  ;;  %v15125_v28 = vld [vmem:[#allocation3 + $0x30] ss:$2 sm:$0xff] }
 0x2d6   :  { %9109 = vmatpush.msk.msra.mxu2 %vm14790_vm9, %v9273_v27  ;;  %6947 = vmatpush.msra.mxu3 %v6946_v32  ;;  %v8616_v10 = vsel %vm15001_vm1, 1.0, %v9272_v0  ;;  %v15128_v25 = vperm.slane %v15125_v28, 5 }
 0x2d7   :  { %9094 = vmatpush.msk.msrb.mxu0 %vm14670_vm15, %v9273_v27  ;;  %9105 = vmatpush.msk.msra.mxu1 %vm14642_vm0, %v9273_v27  ;;  %vm228_vm0 = vcmp.eq.s32.totalorder %v9349_v18, %v14936_v55  ;;  %v5537_v14 = vpop.f32.mrf.mxu2 }
 0x2d8   :  { %9110 = vmatpush.msk.msra.mxu2 %vm14830_vm11, %v9273_v27  ;;  %6953 = vmatpush.msra.mxu3 %v6952_v50  ;;  %vm15044_vm7 = vmor %vm228_vm0, %vm476_vm2  ;;  %vm126_vm0 = vcmp.eq.s32.totalorder %v9335_v12, %v14936_v55  ;;  %vm374_vm2 = vcmp.eq.s32.totalorder %v9335_v12, %v14939_v8  ;;  %v7161_v50 = vand.u32 4294901760, %v15073_v58 }
 0x2d9   :  { %9095 = vmatpush.msk.msrb.mxu0 %vm14686_vm8, %v9273_v27  ;;  %9106 = vmatpush.msk.msra.mxu1 %vm14670_vm15, %v9273_v27  ;;  %vm442_vm15 = vcmp.eq.s32.totalorder %v9352_v19, %v14939_v8  ;;  %v5452_v51 = vpop.f32.mrf.mxu0 }
 0x2da   :  { %6717 = vmatmul.f32.vlgmr.msrb.gmra.mxu0 %v9731_v23  ;;  %9111 = vmatpush.msk.msra.mxu2 %vm14849_vm12, %v9273_v27  ;;  %v5504_v37 = vadd.f32 %v5503_v54, %v5452_v51  ;;  %v7162_v1 = vsub.f32 %v15073_v58, %v7161_v50  ;;  %v5566_v24 = vpop.f32.mrf.mxu3 }
 0x2db   :  { %6848 = vmatpush.msra.mxu0 %v6733_v9  ;;  %6959 = vmatpush.msra.mxu3 %v6958_v53  ;;  %v15060_v9 = vsub.f32 %v8616_v10, %v8616_v10 }
 0x2dc   :  { %9107 = vmatpush.msk.msra.mxu1 %vm14686_vm8, %v9273_v27  ;;  %9112 = vmatpush.msk.msra.mxu2 %vm14883_vm5, %v9273_v27  ;;  %vm15065_vm8 = vmor %vm194_vm13, %vm442_vm15  ;;  %v5538_v29 = vadd.f32 %v5537_v14, %v5504_v37  ;;  %v7163_v41 = vand.u32 4294901760, %v7162_v1 }
 0x2dd   :  { %6852 = vmatpush.msra.mxu0 %v6739_v13  ;;  %6965 = vmatpush.msra.mxu3 %v6964_v2  ;;  %v8548_v13 = vsel %vm15044_vm7, 1.0, %v9272_v0  ;;  %vm15093_vm13 = vmor %vm160_vm4, %vm408_vm3  ;;  %v8514_v15 = vsel %vm15065_vm8, 1.0, %v9272_v0  ;;  %vm263_vm4 = vcmp.eq.s32.totalorder %v9346_v17, %v15128_v25 }
 0x2de   :  { %6897 = vmatmul.f32.vlgmr.msra.gmra.mxu1 %v9666_v57  ;;  %9113 = vmatpush.msk.msra.mxu2 %vm14897_vm14, %v9273_v27  ;;  %v15107_v55 = vsub.f32 %v8548_v13, %v8548_v13  ;;  %vm15109_vm15 = vmor %vm126_vm0, %vm374_vm2  ;;  %v8480_v59 = vsel %vm15093_vm13, 1.0, %v9272_v0  ;;  %v5567_v49 = vadd.f32 %v5566_v24, %v5538_v29 }
 0x2df   :  { %9114 = vmatpush.msk.msrb.mxu1 %vm14773_vm10, %v9273_v27  ;;  %6856 = vmatpush.msra.mxu0 %v6745_v22  ;;  %v7155_v22 = vand.u32 4294901760, %v15060_v9  ;;  %v8446_v53 = vsel %vm15109_vm15, 1.0, %v9272_v0  ;;  %v15152_v36 = vsub.f32 %v8480_v59, %v8480_v59 }
 0x2e0   :  { %6971 = vmatpush.msra.mxu3 %v6970_v33  ;;  %6928 = vmatmul.f32.vlgmr.msra.gmra.mxu2 %v9731_v23  ;;  %v7167_v2 = vand.u32 4294901760, %v15107_v55  ;;  %v15168_v40 = vsub.f32 %v8446_v53, %v8446_v53  ;;  %v5632_v33 = vpop.f32.mrf.mxu1 }
 0x2e1   :  { %9115 = vmatpush.msk.msrb.mxu1 %vm14790_vm9, %v9273_v27  ;;  %7059 = vmatpush.msrb.mxu2 %v6944_v39  ;;  %v15123_v39 = vsub.f32 %v8514_v15, %v8514_v15 }
 0x2e2   :  { %6860 = vmatpush.msra.mxu0 %v6751_v48  ;;  %6977 = vmatpush.msra.mxu3 %v6976_v56  ;;  %v15130_v48 = vld [vmem:[#allocation3 + $0x31] ss:$2 sm:$0xff] }
 0x2e3   :  { %6979 = vmatmul.f32.vlgmr.msra.gmra.mxu3 %v9666_v57  ;;  %9116 = vmatpush.msk.msrb.mxu1 %vm14830_vm11, %v9273_v27  ;;  %v15133_v43 = vperm.slane %v15130_v48, 5 }
 0x2e4   :  { %7063 = vmatpush.msrb.mxu2 %v6950_v4  ;;  %9120 = vmatpush.msk.msrb.mxu3 %vm14773_vm10, %v9273_v27  ;;  %v7156_v4 = vsub.f32 %v15060_v9, %v7155_v22  ;;  %vm297_vm10 = vcmp.eq.s32.totalorder %v9343_v16, %v15128_v25 }
 0x2e5   :  { %6864 = vmatpush.msra.mxu0 %v6757_v63  ;;  %9117 = vmatpush.msk.msrb.mxu1 %vm14849_vm12, %v9273_v27  ;;  %v7173_v63 = vand.u32 4294901760, %v15123_v39  ;;  %vm511_vm3 = vcmp.eq.s32.totalorder %v9346_v17, %v15133_v43  ;;  %vm477_vm2 = vcmp.eq.s32.totalorder %v9349_v18, %v15133_v43  ;;  %v5663_v53 = vpop.f32.mrf.mxu2 }
 0x2e6   :  { %7067 = vmatpush.msrb.mxu2 %v6956_v42  ;;  %9121 = vmatpush.msk.msrb.mxu3 %vm14790_vm9, %v9273_v27  ;;  %vm545_vm9 = vcmp.eq.s32.totalorder %v9343_v16, %v15133_v43  ;;  %v7168_v42 = vsub.f32 %v15107_v55, %v7167_v2  ;;  %vm15217_vm0 = vmor %vm263_vm4, %vm511_vm3  ;;  %vm409_vm3 = vcmp.eq.s32.totalorder %v9355_v21, %v15133_v43 }
 0x2e7   :  { %6868 = vmatpush.msra.mxu0 %v6763_v45  ;;  %9118 = vmatpush.msk.msrb.mxu1 %vm14883_vm5, %v9273_v27  ;;  %v7157_v45 = vand.u32 4294901760, %v7156_v4  ;;  %v5605_v10 = vpop.f32.mrf.mxu0  ;;  %v8583_v54 = vsel %vm15217_vm0, 1.0, %v9272_v0 }
 0x2e8   :  { %6870 = vmatmul.f32.vlgmr.msra.gmra.mxu0 %v9666_v57  ;;  %7071 = vmatpush.msrb.mxu2 %v6962_v34  ;;  %v7179_v34 = vand.u32 4294901760, %v15152_v36  ;;  %v7169_v51 = vand.u32 4294901760, %v7168_v42  ;;  %v15271_v14 = vsub.f32 %v8583_v54, %v8583_v54  ;;  %v5714_v29 = vpop.f32.mrf.mxu3  ;;  %v15366_v54 = vperm.slane %v15130_v48, 6 }
 0x2e9   :  { %6995 = vmatpush.msrb.mxu0 %v14841_v47  ;;  %9122 = vmatpush.msk.msrb.mxu3 %vm14830_vm11, %v9273_v27  ;;  %vm15200_vm11 = vmor %vm297_vm10, %vm545_vm9  ;;  %v5606_v47 = vadd.f32 %v5605_v10, %v5567_v49  ;;  %vm195_vm10 = vcmp.eq.s32.totalorder %v9352_v19, %v15128_v25  ;;  %vm443_vm9 = vcmp.eq.s32.totalorder %v9352_v19, %v15133_v43 }
 0x2ea   :  { %9119 = vmatpush.msk.msrb.mxu1 %vm14897_vm14, %v9273_v27  ;;  %7075 = vmatpush.msrb.mxu2 %v6968_v60  ;;  %v7174_v60 = vsub.f32 %v15123_v39, %v7173_v63  ;;  %v7180_v13 = vsub.f32 %v15152_v36, %v7179_v34  ;;  %vm15276_vm4 = vmor %vm195_vm10, %vm443_vm9 }
 0x2eb   :  { %6998 = vmatpush.msrb.mxu0 %v14844_v6  ;;  %9123 = vmatpush.msk.msrb.mxu3 %vm14849_vm12, %v9273_v27  ;;  %v7185_v6 = vand.u32 4294901760, %v15168_v40  ;;  %vm229_vm12 = vcmp.eq.s32.totalorder %v9349_v18, %v15128_v25  ;;  %v5633_v26 = vadd.f32 %v5632_v33, %v5606_v47  ;;  %v8515_v24 = vsel %vm15276_vm4, 1.0, %v9272_v0 }
 0x2ec   :  { %7042 = vmatmul.f32.vlgmr.msrb.gmra.mxu1 %v9691_v5  ;;  %7079 = vmatpush.msrb.mxu2 %v6974_v38  ;;  %v8617_v38 = vsel %vm15200_vm11, 1.0, %v9272_v0  ;;  %v7175_v7 = vand.u32 4294901760, %v7174_v60  ;;  %v7181_v59 = vand.u32 4294901760, %v7180_v13 }
 0x2ed   :  { %7158 = vmatpush.msra.mxu1 %v7157_v45  ;;  %7001 = vmatpush.msrb.mxu0 %v14888_v31  ;;  %8398 = vst [vmem:[%s16362_s3 + $0xa0] sm:$0xff] %v5633_v26  ;;  %v7186_v15 = vsub.f32 %v15168_v40, %v7185_v6  ;;  %v15268_v37 = vsub.f32 %v8617_v38, %v8617_v38  ;;  %v7372_v45 = vand.u32 4294901760, %v15271_v14  ;;  %v15363_v38 = vperm.slane %v15125_v28, 6 }
 0x2ee   :  { %9124 = vmatpush.msk.msrb.mxu3 %vm14883_vm5, %v9273_v27  ;;  %7081 = vmatmul.f32.vlgmr.msrb.gmra.mxu2 %v9666_v57  ;;  %vm15257_vm5 = vmor %vm229_vm12, %vm477_vm2  ;;  %vm127_vm12 = vcmp.eq.s32.totalorder %v9335_v12, %v15128_v25  ;;  %vm375_vm2 = vcmp.eq.s32.totalorder %v9335_v12, %v15133_v43  ;;  %v15336_v43 = vsub.f32 %v8515_v24, %v8515_v24 }
 0x2ef   :  { %7164 = vmatpush.msra.mxu1 %v7163_v41  ;;  %7206 = vmatpush.msra.mxu2 %v15060_v9  ;;  %v8549_v46 = vsel %vm15257_vm5, 1.0, %v9272_v0  ;;  %v7187_v4 = vand.u32 4294901760, %v7186_v15  ;;  %v7366_v1 = vand.u32 4294901760, %v15268_v37  ;;  %vm15324_vm9 = vmor %vm127_vm12, %vm375_vm2  ;;  %v7373_v33 = vsub.f32 %v15271_v14, %v7372_v45 }
 0x2f0   :  { %7004 = vmatpush.msrb.mxu0 %v14909_v3  ;;  %9125 = vmatpush.msk.msrb.mxu3 %vm14897_vm14, %v9273_v27  ;;  %vm161_vm14 = vcmp.eq.s32.totalorder %v9355_v21, %v15128_v25  ;;  %v15315_v49 = vsub.f32 %v8549_v46, %v8549_v46  ;;  %v8447_v41 = vsel %vm15324_vm9, 1.0, %v9272_v0  ;;  %v7384_v15 = vand.u32 4294901760, %v15336_v43 }
 0x2f1   :  { %7108 = vmatmul.f32.vlgmr.msrb.gmra.mxu3 %v9666_v57  ;;  %7170 = vmatpush.msra.mxu1 %v7169_v51  ;;  %vm15310_vm10 = vmor %vm161_vm14, %vm409_vm3  ;;  %v7367_v47 = vsub.f32 %v15268_v37, %v7366_v1  ;;  %v5777_v51 = vpop.f32.mrf.mxu1  ;;  %v7374_v20 = vand.u32 4294901760, %v7373_v33  ;;  %vm264_vm14 = vcmp.eq.s32.totalorder %v9346_v17, %v15363_v38  ;;  %vm512_vm3 = vcmp.eq.s32.totalorder %v9346_v17, %v15366_v54 }
 0x2f2   :  { %7209 = vmatpush.msra.mxu2 %v15073_v58  ;;  %9132 = vmatpush.msk.msra.mxu3 %vm15001_vm1, %v9273_v27  ;;  %v8481_v25 = vsel %vm15310_vm10, 1.0, %v9272_v0  ;;  %v7378_v26 = vand.u32 4294901760, %v15315_v49  ;;  %vm15438_vm12 = vmor %vm264_vm14, %vm512_vm3  ;;  %vm478_vm2 = vcmp.eq.s32.totalorder %v9349_v18, %v15366_v54  ;;  %vm162_vm14 = vcmp.eq.s32.totalorder %v9355_v21, %v15363_v38 }
 0x2f3   :  { %7007 = vmatpush.msrb.mxu0 %v14933_v44  ;;  %7176 = vmatpush.msra.mxu1 %v7175_v7  ;;  %v15360_v13 = vsub.f32 %v8481_v25, %v8481_v25  ;;  %v5816_v46 = vpop.f32.mrf.mxu2  ;;  %v7385_v25 = vsub.f32 %v15336_v43, %v7384_v15  ;;  %v8584_v32 = vsel %vm15438_vm12, 1.0, %v9272_v0  ;;  %vm410_vm3 = vcmp.eq.s32.totalorder %v9355_v21, %v15366_v54 }
 0x2f4   :  { %7212 = vmatpush.msra.mxu2 %v15107_v55  ;;  %9133 = vmatpush.msk.msra.mxu3 %vm15011_vm6, %v9273_v27  ;;  %v15500_v58 = vsub.f32 %v8584_v32, %v8584_v32 }
 0x2f5   :  { %7010 = vmatpush.msrb.mxu0 %v14948_v30  ;;  %7182 = vmatpush.msra.mxu1 %v7181_v59  ;;  %v5715_v30 = vadd.f32 %v5714_v29, %v5663_v53  ;;  %v5748_v10 = vpop.f32.mrf.mxu0  ;;  %v15375_v59 = vsub.f32 %v8447_v41, %v8447_v41  ;;  %v7368_v53 = vand.u32 4294901760, %v7367_v47  ;;  %v7390_v35 = vand.u32 4294901760, %v15360_v13 }
 0x2f6   :  { %7013 = vmatmul.f32.vlgmr.msrb.gmra.mxu0 %v9678_v61  ;;  %7215 = vmatpush.msra.mxu2 %v15123_v39  ;;  %v5843_v24 = vpop.f32.mrf.mxu3  ;;  %v15556_v39 = vperm.slane %v15130_v48, 7 }
 0x2f7   :  { %9126 = vmatpush.msk.msra.mxu0 %vm15001_vm1, %v9273_v27  ;;  %9134 = vmatpush.msk.msra.mxu3 %vm15044_vm7, %v9273_v27  ;;  %v5749_v60 = vadd.f32 %v5748_v10, %v5715_v30  ;;  %v7396_v10 = vand.u32 4294901760, %v15375_v59  ;;  %v7391_v41 = vsub.f32 %v15360_v13, %v7390_v35 }
 0x2f8   :  { %7188 = vmatpush.msra.mxu1 %v7187_v4  ;;  %7218 = vmatpush.msra.mxu2 %v15152_v36  ;;  %v7379_v4 = vsub.f32 %v15315_v49, %v7378_v26 }
 0x2f9   :  { %9127 = vmatpush.msk.msra.mxu0 %vm15011_vm6, %v9273_v27  ;;  %9135 = vmatpush.msk.msra.mxu3 %vm15065_vm8, %v9273_v27  ;;  %v5778_v7 = vadd.f32 %v5777_v51, %v5749_v60  ;;  %v7386_v60 = vand.u32 4294901760, %v7385_v25  ;;  %v7397_v33 = vsub.f32 %v15375_v59, %v7396_v10 }
 0x2fa   :  { %7190 = vmatmul.f32.vlgmr.msra.gmra.mxu1 %v9666_v57  ;;  %7221 = vmatpush.msra.mxu2 %v15168_v40  ;;  %v7380_v52 = vand.u32 4294901760, %v7379_v4 }
 0x2fb   :  { %9138 = vmatpush.msk.msrb.mxu1 %vm15001_vm1, %v9273_v27  ;;  %9128 = vmatpush.msk.msra.mxu0 %vm15044_vm7, %v9273_v27  ;;  %v5817_v29 = vadd.f32 %v5816_v46, %v5778_v7  ;;  %vm298_vm1 = vcmp.eq.s32.totalorder %v9343_v16, %v15363_v38  ;;  %v7392_v46 = vand.u32 4294901760, %v7391_v41  ;;  %v7398_v9 = vand.u32 4294901760, %v7397_v33 }
 0x2fc   :  { %9136 = vmatpush.msk.msra.mxu3 %vm15093_vm13, %v9273_v27  ;;  %7224 = vmatmul.f32.vlgmr.msra.gmra.mxu2 %v9678_v61 }
 0x2fd   :  { %9139 = vmatpush.msk.msrb.mxu1 %vm15011_vm6, %v9273_v27  ;;  %9144 = vmatpush.msk.msrb.mxu2 %vm15200_vm11, %v9273_v27  ;;  %vm546_vm6 = vcmp.eq.s32.totalorder %v9343_v16, %v15366_v54  ;;  %v5844_v30 = vadd.f32 %v5843_v24, %v5817_v29  ;;  %v5925_v29 = vpop.f32.mrf.mxu1  ;;  %v7583_v24 = vand.u32 4294901760, %v15500_v58 }
 0x2fe   :  { %9129 = vmatpush.msk.msra.mxu0 %vm15065_vm8, %v9273_v27  ;;  %9137 = vmatpush.msk.msra.mxu3 %vm15109_vm15, %v9273_v27 }
 0x2ff   :  { %7253 = vmatmul.f32.vlgmr.msra.gmra.mxu3 %v9691_v5  ;;  %9140 = vmatpush.msk.msrb.mxu1 %vm15044_vm7, %v9273_v27  ;;  %8399 = vst [vmem:[%s16362_s3 + $0xa8] sm:$0xff] %v5844_v30  ;;  %vm15428_vm7 = vmor %vm298_vm1, %vm546_vm6  ;;  %vm196_vm1 = vcmp.eq.s32.totalorder %v9352_v19, %v15363_v38  ;;  %v7584_v36 = vsub.f32 %v15500_v58, %v7583_v24 }
 0x300   :  { %9145 = vmatpush.msk.msrb.mxu2 %vm15217_vm0, %v9273_v27  ;;  %7369 = vmatpush.msrb.mxu3 %v7368_v53  ;;  %v8618_v51 = vsel %vm15428_vm7, 1.0, %v9272_v0 }
 0x301   :  { %9130 = vmatpush.msk.msra.mxu0 %vm15093_vm13, %v9273_v27  ;;  %9141 = vmatpush.msk.msrb.mxu1 %vm15065_vm8, %v9273_v27  ;;  %vm230_vm8 = vcmp.eq.s32.totalorder %v9349_v18, %v15363_v38  ;;  %v5959_v25 = vpop.f32.mrf.mxu2  ;;  %v7585_v33 = vand.u32 4294901760, %v7584_v36 }
 0x302   :  { %9146 = vmatpush.msk.msrb.mxu2 %vm15257_vm5, %v9273_v27  ;;  %7375 = vmatpush.msrb.mxu3 %v7374_v20  ;;  %vm15471_vm6 = vmor %vm230_vm8, %vm478_vm2  ;;  %vm128_vm8 = vcmp.eq.s32.totalorder %v9335_v12, %v15363_v38  ;;  %vm376_vm2 = vcmp.eq.s32.totalorder %v9335_v12, %v15366_v54 }
 0x303   :  { %9131 = vmatpush.msk.msra.mxu0 %vm15109_vm15, %v9273_v27  ;;  %9142 = vmatpush.msk.msrb.mxu1 %vm15093_vm13, %v9273_v27  ;;  %vm444_vm13 = vcmp.eq.s32.totalorder %v9352_v19, %v15366_v54  ;;  %v5874_v53 = vpop.f32.mrf.mxu0 }
 0x304   :  { %7139 = vmatmul.f32.vlgmr.msra.gmra.mxu0 %v9731_v23  ;;  %9147 = vmatpush.msk.msrb.mxu2 %vm15276_vm4, %v9273_v27  ;;  %v5926_v55 = vadd.f32 %v5925_v29, %v5874_v53  ;;  %v5988_v56 = vpop.f32.mrf.mxu3 }
 0x305   :  { %7270 = vmatpush.msrb.mxu0 %v7155_v22  ;;  %7381 = vmatpush.msrb.mxu3 %v7380_v52  ;;  %v15487_v22 = vsub.f32 %v8618_v51, %v8618_v51  ;;  %v15553_v52 = vperm.slane %v15125_v28, 7 }
 0x306   :  { %9143 = vmatpush.msk.msrb.mxu1 %vm15109_vm15, %v9273_v27  ;;  %9148 = vmatpush.msk.msrb.mxu2 %vm15310_vm10, %v9273_v27  ;;  %vm15492_vm15 = vmor %vm196_vm1, %vm444_vm13  ;;  %v5960_v41 = vadd.f32 %v5959_v25, %v5926_v55 }
 0x307   :  { %7274 = vmatpush.msrb.mxu0 %v7161_v50  ;;  %7387 = vmatpush.msrb.mxu3 %v7386_v60  ;;  %v8550_v50 = vsel %vm15471_vm6, 1.0, %v9272_v0  ;;  %vm15520_vm1 = vmor %vm162_vm14, %vm410_vm3  ;;  %v8516_v4 = vsel %vm15492_vm15, 1.0, %v9272_v0  ;;  %vm265_vm14 = vcmp.eq.s32.totalorder %v9346_v17, %v15553_v52  ;;  %vm513_vm3 = vcmp.eq.s32.totalorder %v9346_v17, %v15556_v39  ;;  %v6054_v51 = vpop.f32.mrf.mxu1 }
 0x308   :  { %7319 = vmatmul.f32.vlgmr.msrb.gmra.mxu1 %v9666_v57  ;;  %9149 = vmatpush.msk.msrb.mxu2 %vm15324_vm9, %v9273_v27  ;;  %v15534_v38 = vsub.f32 %v8550_v50, %v8550_v50  ;;  %vm15536_vm13 = vmor %vm128_vm8, %vm376_vm2  ;;  %v8482_v30 = vsel %vm15520_vm1, 1.0, %v9272_v0  ;;  %v5989_v40 = vadd.f32 %v5988_v56, %v5960_v41  ;;  %vm231_vm2 = vcmp.eq.s32.totalorder %v9349_v18, %v15553_v52 }
 0x309   :  { %9150 = vmatpush.msk.msra.mxu1 %vm15200_vm11, %v9273_v27  ;;  %7278 = vmatpush.msrb.mxu0 %v7167_v2  ;;  %v7577_v2 = vand.u32 4294901760, %v15487_v22  ;;  %v15575_v62 = vsub.f32 %v8482_v30, %v8482_v30  ;;  %vm15640_vm8 = vmor %vm265_vm14, %vm513_vm3  ;;  %vm445_vm14 = vcmp.eq.s32.totalorder %v9352_v19, %v15556_v39  ;;  %vm411_vm3 = vcmp.eq.s32.totalorder %v9355_v21, %v15556_v39 }
 0x30a   :  { %7393 = vmatpush.msrb.mxu3 %v7392_v46  ;;  %7350 = vmatmul.f32.vlgmr.msrb.gmra.mxu2 %v9731_v23  ;;  %v7589_v48 = vand.u32 4294901760, %v15534_v38 }
 0x30b   :  { %9151 = vmatpush.msk.msra.mxu1 %vm15217_vm0, %v9273_v27  ;;  %7481 = vmatpush.msra.mxu2 %v7366_v1  ;;  %v15550_v1 = vsub.f32 %v8516_v4, %v8516_v4  ;;  %v7578_v28 = vsub.f32 %v15487_v22, %v7577_v2 }
 0x30c   :  { %7282 = vmatpush.msrb.mxu0 %v7173_v63  ;;  %7399 = vmatpush.msrb.mxu3 %v7398_v9  ;;  %v8448_v63 = vsel %vm15536_vm13, 1.0, %v9272_v0 }
 0x30d   :  { %7401 = vmatmul.f32.vlgmr.msrb.gmra.mxu3 %v9666_v57  ;;  %9152 = vmatpush.msk.msra.mxu1 %vm15257_vm5, %v9273_v27 }
 0x30e   :  { %7485 = vmatpush.msra.mxu2 %v7372_v45  ;;  %9156 = vmatpush.msk.msra.mxu3 %vm15200_vm11, %v9273_v27  ;;  %v15591_v45 = vsub.f32 %v8448_v63, %v8448_v63  ;;  %vm299_vm11 = vcmp.eq.s32.totalorder %v9343_v16, %v15553_v52 }
 0x30f   :  { %7286 = vmatpush.msrb.mxu0 %v7179_v34  ;;  %9153 = vmatpush.msk.msra.mxu1 %vm15276_vm4, %v9273_v27  ;;  %v7595_v34 = vand.u32 4294901760, %v15550_v1  ;;  %v6085_v25 = vpop.f32.mrf.mxu2 }
 0x310   :  { %7489 = vmatpush.msra.mxu2 %v7378_v26  ;;  %9157 = vmatpush.msk.msra.mxu3 %vm15217_vm0, %v9273_v27  ;;  %vm547_vm0 = vcmp.eq.s32.totalorder %v9343_v16, %v15556_v39  ;;  %v7590_v26 = vsub.f32 %v15534_v38, %v7589_v48 }
 0x311   :  { %7290 = vmatpush.msrb.mxu0 %v7185_v6  ;;  %9154 = vmatpush.msk.msra.mxu1 %vm15310_vm10, %v9273_v27  ;;  %v7579_v6 = vand.u32 4294901760, %v7578_v28  ;;  %v6027_v60 = vpop.f32.mrf.mxu0 }
 0x312   :  { %7292 = vmatmul.f32.vlgmr.msrb.gmra.mxu0 %v9666_v57  ;;  %7493 = vmatpush.msra.mxu2 %v7384_v15  ;;  %v7601_v15 = vand.u32 4294901760, %v15575_v62  ;;  %v7591_v46 = vand.u32 4294901760, %v7590_v26  ;;  %v6136_v63 = vpop.f32.mrf.mxu3  ;;  %v15746_v26 = vld [vmem:[#allocation3 + $0x41] ss:$2 sm:$0x3] }
 0x313   :  { %7417 = vmatpush.msra.mxu0 %v15268_v37  ;;  %9158 = vmatpush.msk.msra.mxu3 %vm15257_vm5, %v9273_v27  ;;  %vm15623_vm5 = vmor %vm299_vm11, %vm547_vm0  ;;  %v6028_v37 = vadd.f32 %v6027_v60, %v5989_v40  ;;  %vm197_vm0 = vcmp.eq.s32.totalorder %v9352_v19, %v15553_v52 }
 0x314   :  { %9155 = vmatpush.msk.msra.mxu1 %vm15324_vm9, %v9273_v27  ;;  %7497 = vmatpush.msra.mxu2 %v7390_v35  ;;  %v7596_v35 = vsub.f32 %v15550_v1, %v7595_v34  ;;  %v7602_v9 = vsub.f32 %v15575_v62, %v7601_v15  ;;  %v8619_v53 = vsel %vm15623_vm5, 1.0, %v9272_v0 }
 0x315   :  { %7420 = vmatpush.msra.mxu0 %v15271_v14  ;;  %9159 = vmatpush.msk.msra.mxu3 %vm15276_vm4, %v9273_v27  ;;  %vm479_vm4 = vcmp.eq.s32.totalorder %v9349_v18, %v15556_v39  ;;  %v7607_v14 = vand.u32 4294901760, %v15591_v45  ;;  %v6055_v3 = vadd.f32 %v6054_v51, %v6028_v37  ;;  %v15689_v29 = vsub.f32 %v8619_v53, %v8619_v53 }
 0x316   :  { %7464 = vmatmul.f32.vlgmr.msra.gmra.mxu1 %v9691_v5  ;;  %7501 = vmatpush.msra.mxu2 %v7396_v10  ;;  %v8585_v10 = vsel %vm15640_vm8, 1.0, %v9272_v0  ;;  %vm15666_vm11 = vmor %vm231_vm2, %vm479_vm4  ;;  %v7597_v44 = vand.u32 4294901760, %v7596_v35  ;;  %v7603_v4 = vand.u32 4294901760, %v7602_v9  ;;  %vm129_vm4 = vcmp.eq.s32.totalorder %v9335_v12, %v15553_v52 }
 0x317   :  { %7580 = vmatpush.msrb.mxu1 %v7579_v6  ;;  %7423 = vmatpush.msra.mxu0 %v15315_v49  ;;  %8400 = vst [vmem:[%s16362_s3 + $0xb0] sm:$0xff] %v6055_v3  ;;  %v7608_v50 = vsub.f32 %v15591_v45, %v7607_v14  ;;  %v15692_v55 = vsub.f32 %v8585_v10, %v8585_v10  ;;  %v7788_v28 = vand.u32 4294901760, %v15689_v29  ;;  %v15776_v53 = vperm.slane %v15746_v26, 0 }
 0x318   :  { %9160 = vmatpush.msk.msra.mxu3 %vm15310_vm10, %v9273_v27  ;;  %7503 = vmatmul.f32.vlgmr.msra.gmra.mxu2 %v9666_v57  ;;  %vm163_vm10 = vcmp.eq.s32.totalorder %v9355_v21, %v15553_v52  ;;  %v6137_v6 = vadd.f32 %v6136_v63, %v6085_v25 }
 0x319   :  { %7586 = vmatpush.msrb.mxu1 %v7585_v33  ;;  %7628 = vmatpush.msrb.mxu2 %v15487_v22  ;;  %vm15711_vm2 = vmor %vm163_vm10, %vm411_vm3  ;;  %v7609_v41 = vand.u32 4294901760, %v7608_v50  ;;  %v7789_v37 = vsub.f32 %v15689_v29, %v7788_v28  ;;  %vm548_vm10 = vcmp.eq.s32.totalorder %v9343_v16, %v15776_v53 }
 0x31a   :  { %7426 = vmatpush.msra.mxu0 %v15336_v43  ;;  %9161 = vmatpush.msk.msra.mxu3 %vm15324_vm9, %v9273_v27  ;;  %v8551_v43 = vsel %vm15666_vm11, 1.0, %v9272_v0  ;;  %vm15703_vm9 = vmor %vm197_vm0, %vm445_vm14  ;;  %vm377_vm0 = vcmp.eq.s32.totalorder %v9335_v12, %v15556_v39  ;;  %v7794_v39 = vand.u32 4294901760, %v15692_v55  ;;  %v8483_v56 = vsel %vm15711_vm2, 1.0, %v9272_v0 }
 0x31b   :  { %7530 = vmatmul.f32.vlgmr.msra.gmra.mxu3 %v9666_v57  ;;  %7592 = vmatpush.msrb.mxu1 %v7591_v46  ;;  %v15725_v36 = vsub.f32 %v8551_v43, %v8551_v43  ;;  %vm15740_vm14 = vmor %vm129_vm4, %vm377_vm0  ;;  %v15767_v51 = vsub.f32 %v8483_v56, %v8483_v56  ;;  %v6199_v46 = vpop.f32.mrf.mxu1  ;;  %v7790_v43 = vand.u32 4294901760, %v7789_v37  ;;  %vm480_vm0 = vcmp.eq.s32.totalorder %v9349_v18, %v15776_v53 }
 0x31c   :  { %7631 = vmatpush.msrb.mxu2 %v15500_v58  ;;  %9168 = vmatpush.msk.msrb.mxu3 %vm15428_vm7, %v9273_v27  ;;  %v8449_v3 = vsel %vm15740_vm14, 1.0, %v9272_v0  ;;  %v7795_v10 = vsub.f32 %v15692_v55, %v7794_v39 }
 0x31d   :  { %7429 = vmatpush.msra.mxu0 %v15360_v13  ;;  %7598 = vmatpush.msrb.mxu1 %v7597_v44  ;;  %v8517_v13 = vsel %vm15703_vm9, 1.0, %v9272_v0  ;;  %v7800_v33 = vand.u32 4294901760, %v15725_v36  ;;  %v15794_v25 = vsub.f32 %v8449_v3, %v8449_v3 }
 0x31e   :  { %7634 = vmatpush.msrb.mxu2 %v15534_v38  ;;  %9169 = vmatpush.msk.msrb.mxu3 %vm15438_vm12, %v9273_v27  ;;  %v15754_v60 = vsub.f32 %v8517_v13, %v8517_v13  ;;  %v7796_v11 = vand.u32 4294901760, %v7795_v10 }
 0x31f   :  { %7432 = vmatpush.msra.mxu0 %v15375_v59  ;;  %7604 = vmatpush.msrb.mxu1 %v7603_v4  ;;  %v15744_v59 = vld [vmem:[#allocation3 + $0x40] ss:$2 sm:$0x3]  ;;  %v6170_v52 = vpop.f32.mrf.mxu0  ;;  %v6238_v4 = vpop.f32.mrf.mxu2  ;;  %v7801_v47 = vsub.f32 %v15725_v36, %v7800_v33 }
 0x320   :  { %7435 = vmatmul.f32.vlgmr.msra.gmra.mxu0 %v9678_v61  ;;  %7637 = vmatpush.msrb.mxu2 %v15550_v1  ;;  %v6171_v35 = vadd.f32 %v6170_v52, %v6137_v6  ;;  %v15773_v9 = vperm.slane %v15744_v59, 0  ;;  %v7806_v50 = vand.u32 4294901760, %v15754_v60  ;;  %v6265_v13 = vpop.f32.mrf.mxu3  ;;  %v7818_v52 = vand.u32 4294901760, %v15794_v25 }
 0x321   :  { %9162 = vmatpush.msk.msrb.mxu0 %vm15428_vm7, %v9273_v27  ;;  %9170 = vmatpush.msk.msrb.mxu3 %vm15471_vm6, %v9273_v27  ;;  %v7802_v7 = vand.u32 4294901760, %v7801_v47 }
 0x322   :  { %7610 = vmatpush.msrb.mxu1 %v7609_v41  ;;  %7640 = vmatpush.msrb.mxu2 %v15575_v62  ;;  %v6200_v44 = vadd.f32 %v6199_v46, %v6171_v35  ;;  %v7812_v41 = vand.u32 4294901760, %v15767_v51  ;;  %v7807_v6 = vsub.f32 %v15754_v60, %v7806_v50  ;;  %vm266_vm3 = vcmp.eq.s32.totalorder %v9346_v17, %v15773_v9 }
 0x323   :  { %9163 = vmatpush.msk.msrb.mxu0 %vm15438_vm12, %v9273_v27  ;;  %9171 = vmatpush.msk.msrb.mxu3 %vm15492_vm15, %v9273_v27  ;;  %vm232_vm4 = vcmp.eq.s32.totalorder %v9349_v18, %v15773_v9  ;;  %v7819_v20 = vsub.f32 %v15794_v25, %v7818_v52 }
 0x324   :  { %7612 = vmatmul.f32.vlgmr.msrb.gmra.mxu1 %v9666_v57  ;;  %7643 = vmatpush.msrb.mxu2 %v15591_v45  ;;  %v6239_v63 = vadd.f32 %v6238_v4, %v6200_v44  ;;  %v7813_v35 = vsub.f32 %v15767_v51, %v7812_v41  ;;  %v7808_v8 = vand.u32 4294901760, %v7807_v6  ;;  %v15965_v6 = vperm.slane %v15746_v26, 1 }
 0x325   :  { %9174 = vmatpush.msk.msra.mxu1 %vm15428_vm7, %v9273_v27  ;;  %9164 = vmatpush.msk.msrb.mxu0 %vm15471_vm6, %v9273_v27  ;;  %vm300_vm7 = vcmp.eq.s32.totalorder %v9343_v16, %v15773_v9 }
 0x326   :  { %9172 = vmatpush.msk.msrb.mxu3 %vm15520_vm1, %v9273_v27  ;;  %7646 = vmatmul.f32.vlgmr.msrb.gmra.mxu2 %v9678_v61  ;;  %v6266_v56 = vadd.f32 %v6265_v13, %v6239_v63  ;;  %v7814_v10 = vand.u32 4294901760, %v7813_v35 }
 0x327   :  { %9175 = vmatpush.msk.msra.mxu1 %vm15438_vm12, %v9273_v27  ;;  %9180 = vmatpush.msk.msra.mxu2 %vm15623_vm5, %v9273_v27  ;;  %vm15827_vm12 = vmor %vm300_vm7, %vm548_vm10  ;;  %vm446_vm7 = vcmp.eq.s32.totalorder %v9352_v19, %v15776_v53 }
 0x328   :  { %9165 = vmatpush.msk.msrb.mxu0 %vm15492_vm15, %v9273_v27  ;;  %9173 = vmatpush.msk.msrb.mxu3 %vm15536_vm13, %v9273_v27  ;;  %8401 = vst [vmem:[%s16362_s3 + $0xb8] sm:$0xff] %v6266_v56  ;;  %v8620_v3 = vsel %vm15827_vm12, 1.0, %v9272_v0  ;;  %vm15886_vm10 = vmor %vm232_vm4, %vm480_vm0  ;;  %vm130_vm0 = vcmp.eq.s32.totalorder %v9335_v12, %v15773_v9 }
 0x329   :  { %7675 = vmatmul.f32.vlgmr.msrb.gmra.mxu3 %v9691_v5  ;;  %9176 = vmatpush.msk.msra.mxu1 %vm15471_vm6, %v9273_v27  ;;  %vm514_vm6 = vcmp.eq.s32.totalorder %v9346_v17, %v15776_v53  ;;  %v15896_v4 = vsub.f32 %v8620_v3, %v8620_v3  ;;  %v8552_v63 = vsel %vm15886_vm10, 1.0, %v9272_v0 }
 0x32a   :  { %9181 = vmatpush.msk.msra.mxu2 %vm15640_vm8, %v9273_v27  ;;  %7791 = vmatpush.msra.mxu3 %v7790_v43  ;;  %v7820_v43 = vand.u32 4294901760, %v7819_v20 }
 0x32b   :  { %9166 = vmatpush.msk.msrb.mxu0 %vm15520_vm1, %v9273_v27  ;;  %9177 = vmatpush.msk.msra.mxu1 %vm15492_vm15, %v9273_v27  ;;  %vm15866_vm15 = vmor %vm266_vm3, %vm514_vm6  ;;  %vm164_vm3 = vcmp.eq.s32.totalorder %v9355_v21, %v15773_v9  ;;  %vm412_vm6 = vcmp.eq.s32.totalorder %v9355_v21, %v15776_v53  ;;  %v7999_v13 = vand.u32 4294901760, %v15896_v4  ;;  %v6381_v1 = vpop.f32.mrf.mxu2 }
 0x32c   :  { %9182 = vmatpush.msk.msra.mxu2 %vm15666_vm11, %v9273_v27  ;;  %7797 = vmatpush.msra.mxu3 %v7796_v11  ;;  %v8586_v22 = vsel %vm15866_vm15, 1.0, %v9272_v0  ;;  %vm15925_vm4 = vmor %vm164_vm3, %vm412_vm6  ;;  %vm549_vm3 = vcmp.eq.s32.totalorder %v9343_v16, %v15965_v6  ;;  %vm515_vm6 = vcmp.eq.s32.totalorder %v9346_v17, %v15965_v6 }
 0x32d   :  { %9167 = vmatpush.msk.msrb.mxu0 %vm15536_vm13, %v9273_v27  ;;  %9178 = vmatpush.msk.msra.mxu1 %vm15520_vm1, %v9273_v27  ;;  %vm198_vm1 = vcmp.eq.s32.totalorder %v9352_v19, %v15773_v9  ;;  %v6296_v54 = vpop.f32.mrf.mxu0  ;;  %v15923_v58 = vsub.f32 %v8586_v22, %v8586_v22  ;;  %v15943_v9 = vsub.f32 %v8552_v63, %v8552_v63 }
 0x32e   :  { %7561 = vmatmul.f32.vlgmr.msrb.gmra.mxu0 %v9731_v23  ;;  %9183 = vmatpush.msk.msra.mxu2 %vm15703_vm9, %v9273_v27  ;;  %v6410_v32 = vpop.f32.mrf.mxu3 }
 0x32f   :  { %7692 = vmatpush.msra.mxu0 %v7577_v2  ;;  %7803 = vmatpush.msra.mxu3 %v7802_v7  ;;  %v8000_v7 = vsub.f32 %v15896_v4, %v7999_v13 }
 0x330   :  { %9179 = vmatpush.msk.msra.mxu1 %vm15536_vm13, %v9273_v27  ;;  %9184 = vmatpush.msk.msra.mxu2 %vm15711_vm2, %v9273_v27  ;;  %vm15907_vm13 = vmor %vm198_vm1, %vm446_vm7  ;;  %vm378_vm1 = vcmp.eq.s32.totalorder %v9335_v12, %v15776_v53  ;;  %v8484_v53 = vsel %vm15925_vm4, 1.0, %v9272_v0 }
 0x331   :  { %7696 = vmatpush.msra.mxu0 %v7583_v24  ;;  %7809 = vmatpush.msra.mxu3 %v7808_v8  ;;  %v6347_v24 = vpop.f32.mrf.mxu1  ;;  %v8518_v38 = vsel %vm15907_vm13, 1.0, %v9272_v0  ;;  %vm15950_vm7 = vmor %vm130_vm0, %vm378_vm1  ;;  %v15981_v26 = vsub.f32 %v8484_v53, %v8484_v53  ;;  %v8001_v45 = vand.u32 4294901760, %v8000_v7  ;;  %vm481_vm1 = vcmp.eq.s32.totalorder %v9349_v18, %v15965_v6 }
 0x332   :  { %7741 = vmatmul.f32.vlgmr.msra.gmra.mxu1 %v9666_v57  ;;  %9185 = vmatpush.msk.msra.mxu2 %vm15740_vm14, %v9273_v27  ;;  %v15959_v56 = vsub.f32 %v8518_v38, %v8518_v38  ;;  %v8450_v31 = vsel %vm15950_vm7, 1.0, %v9272_v0 }
 0x333   :  { %9186 = vmatpush.msk.msrb.mxu1 %vm15623_vm5, %v9273_v27  ;;  %7700 = vmatpush.msra.mxu0 %v7589_v48  ;;  %v6348_v48 = vadd.f32 %v6347_v24, %v6296_v54  ;;  %v8023_v8 = vand.u32 4294901760, %v15981_v26 }
 0x334   :  { %7815 = vmatpush.msra.mxu3 %v7814_v10  ;;  %7772 = vmatmul.f32.vlgmr.msra.gmra.mxu2 %v9731_v23 }
 0x335   :  { %9187 = vmatpush.msk.msrb.mxu1 %vm15640_vm8, %v9273_v27  ;;  %7903 = vmatpush.msrb.mxu2 %v7788_v28  ;;  %v8005_v28 = vand.u32 4294901760, %v15923_v58  ;;  %v6382_v35 = vadd.f32 %v6381_v1, %v6348_v48  ;;  %v8024_v10 = vsub.f32 %v15981_v26, %v8023_v8 }
 0x336   :  { %7704 = vmatpush.msra.mxu0 %v7595_v34  ;;  %7821 = vmatpush.msra.mxu3 %v7820_v43  ;;  %v15962_v34 = vperm.slane %v15744_v59, 1  ;;  %v8011_v59 = vand.u32 4294901760, %v15943_v9 }
 0x337   :  { %7823 = vmatmul.f32.vlgmr.msra.gmra.mxu3 %v9666_v57  ;;  %9188 = vmatpush.msk.msrb.mxu1 %vm15666_vm11, %v9273_v27  ;;  %v8006_v62 = vsub.f32 %v15923_v58, %v8005_v28 }
 0x338   :  { %7907 = vmatpush.msrb.mxu2 %v7794_v39  ;;  %9192 = vmatpush.msk.msrb.mxu3 %vm15623_vm5, %v9273_v27  ;;  %vm301_vm5 = vcmp.eq.s32.totalorder %v9343_v16, %v15962_v34  ;;  %v6411_v39 = vadd.f32 %v6410_v32, %v6382_v35 }
 0x339   :  { %7708 = vmatpush.msra.mxu0 %v7601_v15  ;;  %9189 = vmatpush.msk.msrb.mxu1 %vm15703_vm9, %v9273_v27  ;;  %v8017_v15 = vand.u32 4294901760, %v15959_v56  ;;  %v8007_v3 = vand.u32 4294901760, %v8006_v62  ;;  %v6476_v20 = vpop.f32.mrf.mxu1 }
 0x33a   :  { %7911 = vmatpush.msrb.mxu2 %v7800_v33  ;;  %9193 = vmatpush.msk.msrb.mxu3 %vm15640_vm8, %v9273_v27  ;;  %v8012_v33 = vsub.f32 %v15943_v9, %v8011_v59  ;;  %vm267_vm8 = vcmp.eq.s32.totalorder %v9346_v17, %v15962_v34 }
 0x33b   :  { %7712 = vmatpush.msra.mxu0 %v7607_v14  ;;  %9190 = vmatpush.msk.msrb.mxu1 %vm15711_vm2, %v9273_v27  ;;  %v16007_v14 = vsub.f32 %v8450_v31, %v8450_v31  ;;  %vm16050_vm0 = vmor %vm267_vm8, %vm515_vm6  ;;  %vm413_vm6 = vcmp.eq.s32.totalorder %v9355_v21, %v15965_v6 }
 0x33c   :  { %7714 = vmatmul.f32.vlgmr.msra.gmra.mxu0 %v9666_v57  ;;  %7915 = vmatpush.msrb.mxu2 %v7806_v50  ;;  %v6449_v50 = vpop.f32.mrf.mxu0  ;;  %v8587_v30 = vsel %vm16050_vm0, 1.0, %v9272_v0  ;;  %v6558_v24 = vpop.f32.mrf.mxu3 }
 0x33d   :  { %7839 = vmatpush.msrb.mxu0 %v15689_v29  ;;  %9194 = vmatpush.msk.msrb.mxu3 %vm15666_vm11, %v9273_v27  ;;  %vm16032_vm11 = vmor %vm301_vm5, %vm549_vm3  ;;  %v6450_v29 = vadd.f32 %v6449_v50, %v6411_v39  ;;  %v8029_v16 = vand.u32 4294901760, %v16007_v14  ;;  %vm199_vm5 = vcmp.eq.s32.totalorder %v9352_v19, %v15962_v34  ;;  %vm447_vm3 = vcmp.eq.s32.totalorder %v9352_v19, %v15965_v6 }
 0x33e   :  { %9191 = vmatpush.msk.msrb.mxu1 %vm15740_vm14, %v9273_v27  ;;  %7919 = vmatpush.msrb.mxu2 %v7812_v41  ;;  %v8018_v41 = vsub.f32 %v15959_v56, %v8017_v15  ;;  %v8621_v17 = vsel %vm16032_vm11, 1.0, %v9272_v0  ;;  %vm16103_vm8 = vmor %vm199_vm5, %vm447_vm3  ;;  %v16115_v40 = vsub.f32 %v8587_v30, %v8587_v30 }
 0x33f   :  { %7842 = vmatpush.msrb.mxu0 %v15692_v55  ;;  %9195 = vmatpush.msk.msrb.mxu3 %vm15703_vm9, %v9273_v27  ;;  %vm233_vm9 = vcmp.eq.s32.totalorder %v9349_v18, %v15962_v34  ;;  %v6477_v42 = vadd.f32 %v6476_v20, %v6450_v29  ;;  %v8030_v54 = vsub.f32 %v16007_v14, %v8029_v16  ;;  %v8025_v18 = vand.u32 4294901760, %v8024_v10 }
 0x340   :  { %7886 = vmatmul.f32.vlgmr.msrb.gmra.mxu1 %v9691_v5  ;;  %7923 = vmatpush.msrb.mxu2 %v7818_v52  ;;  %v8013_v52 = vand.u32 4294901760, %v8012_v33  ;;  %v16097_v43 = vsub.f32 %v8621_v17, %v8621_v17  ;;  %v8216_v35 = vand.u32 4294901760, %v16115_v40 }
 0x341   :  { %8002 = vmatpush.msra.mxu1 %v8001_v45  ;;  %7845 = vmatpush.msrb.mxu0 %v15725_v36  ;;  %8402 = vst [vmem:[%s16362_s3 + $0xc0] sm:$0xff] %v6477_v42  ;;  %v8019_v36 = vand.u32 4294901760, %v8018_v41  ;;  %v8031_v38 = vand.u32 4294901760, %v8030_v54  ;;  %v6621_v62 = vpop.f32.mrf.mxu1 }
 0x342   :  { %9196 = vmatpush.msk.msrb.mxu3 %vm15711_vm2, %v9273_v27  ;;  %7925 = vmatmul.f32.vlgmr.msrb.gmra.mxu2 %v9666_v57  ;;  %vm16086_vm2 = vmor %vm233_vm9, %vm481_vm1  ;;  %vm131_vm9 = vcmp.eq.s32.totalorder %v9335_v12, %v15962_v34  ;;  %vm379_vm1 = vcmp.eq.s32.totalorder %v9335_v12, %v15965_v6  ;;  %v8210_v48 = vand.u32 4294901760, %v16097_v43  ;;  %v8217_v33 = vsub.f32 %v16115_v40, %v8216_v35 }
 0x343   :  { %8008 = vmatpush.msra.mxu1 %v8007_v3  ;;  %8050 = vmatpush.msra.mxu2 %v15896_v4  ;;  %v8553_v19 = vsel %vm16086_vm2, 1.0, %v9272_v0  ;;  %vm16152_vm3 = vmor %vm131_vm9, %vm379_vm1 }
 0x344   :  { %7848 = vmatpush.msrb.mxu0 %v15754_v60  ;;  %9197 = vmatpush.msk.msrb.mxu3 %vm15740_vm14, %v9273_v27  ;;  %vm165_vm14 = vcmp.eq.s32.totalorder %v9355_v21, %v15962_v34  ;;  %v6507_v60 = vpop.f32.mrf.mxu2  ;;  %v16144_v1 = vsub.f32 %v8553_v19, %v8553_v19  ;;  %v8211_v34 = vsub.f32 %v16097_v43, %v8210_v48  ;;  %v8451_v45 = vsel %vm16152_vm3, 1.0, %v9272_v0 }
 0x345   :  { %7952 = vmatmul.f32.vlgmr.msrb.gmra.mxu3 %v9666_v57  ;;  %8014 = vmatpush.msra.mxu1 %v8013_v52  ;;  %vm16139_vm5 = vmor %vm165_vm14, %vm413_vm6  ;;  %v6559_v7 = vadd.f32 %v6558_v24, %v6507_v60  ;;  %v16199_v20 = vsub.f32 %v8451_v45, %v8451_v45  ;;  %v8218_v10 = vand.u32 4294901760, %v8217_v33 }
 0x346   :  { %8053 = vmatpush.msra.mxu2 %v15923_v58  ;;  %9204 = vmatpush.msk.msra.mxu3 %vm15827_vm12, %v9273_v27  ;;  %v8485_v31 = vsel %vm16139_vm5, 1.0, %v9272_v0  ;;  %v8222_v32 = vand.u32 4294901760, %v16144_v1  ;;  %v8212_v41 = vand.u32 4294901760, %v8211_v34 }
 0x347   :  { %7851 = vmatpush.msrb.mxu0 %v15767_v51  ;;  %8020 = vmatpush.msra.mxu1 %v8019_v36  ;;  %v8519_v51 = vsel %vm16103_vm8, 1.0, %v9272_v0  ;;  %v16186_v50 = vsub.f32 %v8485_v31, %v8485_v31  ;;  %v8240_v36 = vand.u32 4294901760, %v16199_v20 }
 0x348   :  { %8056 = vmatpush.msra.mxu2 %v15943_v9  ;;  %9205 = vmatpush.msk.msra.mxu3 %vm15866_vm15, %v9273_v27  ;;  %v8223_v37 = vsub.f32 %v16144_v1, %v8222_v32 }
 0x349   :  { %7854 = vmatpush.msrb.mxu0 %v15794_v25  ;;  %8026 = vmatpush.msra.mxu1 %v8025_v18  ;;  %v6592_v6 = vpop.f32.mrf.mxu0  ;;  %v16162_v25 = vsub.f32 %v8519_v51, %v8519_v51  ;;  %v8234_v46 = vand.u32 4294901760, %v16186_v50  ;;  %v8241_v54 = vsub.f32 %v16199_v20, %v8240_v36 }
 0x34a   :  { %7857 = vmatmul.f32.vlgmr.msrb.gmra.mxu0 %v9678_v61  ;;  %8059 = vmatpush.msra.mxu2 %v15959_v56  ;;  %v6593_v12 = vadd.f32 %v6592_v6, %v6559_v7  ;;  %v6687_v42 = vpop.f32.mrf.mxu3  ;;  %v8224_v44 = vand.u32 4294901760, %v8223_v37 }
 0x34b   :  { %9198 = vmatpush.msk.msra.mxu0 %vm15827_vm12, %v9273_v27  ;;  %9206 = vmatpush.msk.msra.mxu3 %vm15886_vm10, %v9273_v27  ;;  %v8228_v0 = vand.u32 4294901760, %v16162_v25  ;;  %v8235_v30 = vsub.f32 %v16186_v50, %v8234_v46  ;;  %v8242_v4 = vand.u32 4294901760, %v8241_v54 }
 0x34c   :  { %8032 = vmatpush.msra.mxu1 %v8031_v38  ;;  %8062 = vmatpush.msra.mxu2 %v15981_v26  ;;  %v6622_v39 = vadd.f32 %v6621_v62, %v6593_v12  ;;  %v6660_v29 = vpop.f32.mrf.mxu2 }
 0x34d   :  { %9199 = vmatpush.msk.msra.mxu0 %vm15866_vm15, %v9273_v27  ;;  %9207 = vmatpush.msk.msra.mxu3 %vm15907_vm13, %v9273_v27  ;;  %v8229_v17 = vsub.f32 %v16162_v25, %v8228_v0  ;;  %v8236_v47 = vand.u32 4294901760, %v8235_v30  ;;  %v6769_v19 = vpop.f32.mrf.mxu1 }
 0x34e   :  { %8034 = vmatmul.f32.vlgmr.msra.gmra.mxu1 %v9666_v57  ;;  %8065 = vmatpush.msra.mxu2 %v16007_v14  ;;  %v6661_v3 = vadd.f32 %v6660_v29, %v6622_v39 }
 0x34f   :  { %9210 = vmatpush.msk.msrb.mxu1 %vm15827_vm12, %v9273_v27  ;;  %9200 = vmatpush.msk.msra.mxu0 %vm15886_vm10, %v9273_v27  ;;  %v8230_v2 = vand.u32 4294901760, %v8229_v17  ;;  %vm8411_vm12 = vcmask 7168  }
 0x350   :  { %9208 = vmatpush.msk.msra.mxu3 %vm15925_vm4, %v9273_v27  ;;  %8068 = vmatmul.f32.vlgmr.msra.gmra.mxu2 %v9678_v61  ;;  %v6688_v52 = vadd.f32 %v6687_v42, %v6661_v3 }
 0x351   :  { %9211 = vmatpush.msk.msrb.mxu1 %vm15866_vm15, %v9273_v27  ;;  %9216 = vmatpush.msk.msrb.mxu2 %vm16032_vm11, %v9273_v27 }
 0x352   :  { %9201 = vmatpush.msk.msra.mxu0 %vm15907_vm13, %v9273_v27  ;;  %9209 = vmatpush.msk.msra.mxu3 %vm15950_vm7, %v9273_v27  ;;  %8403 = vst [vmem:[%s16362_s3 + $0xc8] sm:$0xff] %v6688_v52 }
 0x353   :  { %8097 = vmatmul.f32.vlgmr.msra.gmra.mxu3 %v9691_v5  ;;  %9212 = vmatpush.msk.msrb.mxu1 %vm15886_vm10, %v9273_v27 }
 0x354   :  { %9217 = vmatpush.msk.msrb.mxu2 %vm16050_vm0, %v9273_v27  ;;  %8213 = vmatpush.msrb.mxu3 %v8212_v41 }
 0x355   :  { %9202 = vmatpush.msk.msra.mxu0 %vm15925_vm4, %v9273_v27  ;;  %9213 = vmatpush.msk.msrb.mxu1 %vm15907_vm13, %v9273_v27  ;;  %v6803_v58 = vpop.f32.mrf.mxu2 }
 0x356   :  { %9218 = vmatpush.msk.msrb.mxu2 %vm16086_vm2, %v9273_v27  ;;  %8219 = vmatpush.msrb.mxu3 %v8218_v10 }
 0x357   :  { %9203 = vmatpush.msk.msra.mxu0 %vm15950_vm7, %v9273_v27  ;;  %9214 = vmatpush.msk.msrb.mxu1 %vm15925_vm4, %v9273_v27  ;;  %v6718_v18 = vpop.f32.mrf.mxu0 }
 0x358   :  { %7983 = vmatmul.f32.vlgmr.msra.gmra.mxu0 %v9731_v23  ;;  %9219 = vmatpush.msk.msrb.mxu2 %vm16103_vm8, %v9273_v27 }
 0x359   :  { %8114 = vmatpush.msrb.mxu0 %v7999_v13  ;;  %8225 = vmatpush.msrb.mxu3 %v8224_v44  ;;  %v6770_v13 = vadd.f32 %v6769_v19, %v6718_v18 }
 0x35a   :  { %9215 = vmatpush.msk.msrb.mxu1 %vm15950_vm7, %v9273_v27  ;;  %9220 = vmatpush.msk.msrb.mxu2 %vm16139_vm5, %v9273_v27 }
 0x35b   :  { %8118 = vmatpush.msrb.mxu0 %v8005_v28  ;;  %8231 = vmatpush.msrb.mxu3 %v8230_v2  ;;  %v6804_v11 = vadd.f32 %v6803_v58, %v6770_v13 }
 0x35c   :  { %8163 = vmatmul.f32.vlgmr.msrb.gmra.mxu1 %v9666_v57  ;;  %9221 = vmatpush.msk.msrb.mxu2 %vm16152_vm3, %v9273_v27 }
 0x35d   :  { %9222 = vmatpush.msk.msra.mxu1 %vm16032_vm11, %v9273_v27  ;;  %8122 = vmatpush.msrb.mxu0 %v8011_v59  ;;  %v6898_v59 = vpop.f32.mrf.mxu1 }
 0x35e   :  { %8237 = vmatpush.msrb.mxu3 %v8236_v47  ;;  %8194 = vmatmul.f32.vlgmr.msrb.gmra.mxu2 %v9731_v23  ;;  %v6832_v23 = vpop.f32.mrf.mxu3 }
 0x35f   :  { %9223 = vmatpush.msk.msra.mxu1 %vm16050_vm0, %v9273_v27  ;;  %8325 = vmatpush.msra.mxu2 %v8210_v48  ;;  %v6833_v9 = vadd.f32 %v6832_v23, %v6804_v11 }
 0x360   :  { %8126 = vmatpush.msrb.mxu0 %v8017_v15  ;;  %8243 = vmatpush.msrb.mxu3 %v8242_v4 }
 0x361   :  { %8245 = vmatmul.f32.vlgmr.msrb.gmra.mxu3 %v9666_v57  ;;  %9224 = vmatpush.msk.msra.mxu1 %vm16086_vm2, %v9273_v27 }
 0x362   :  { %8329 = vmatpush.msra.mxu2 %v8216_v35  ;;  %9228 = vmatpush.msk.msra.mxu3 %vm16032_vm11, %v9273_v27 }
 0x363   :  { %8130 = vmatpush.msrb.mxu0 %v8023_v8  ;;  %9225 = vmatpush.msk.msra.mxu1 %vm16103_vm8, %v9273_v27 }
 0x364   :  { %8333 = vmatpush.msra.mxu2 %v8222_v32  ;;  %9229 = vmatpush.msk.msra.mxu3 %vm16050_vm0, %v9273_v27 }
 0x365   :  { %8134 = vmatpush.msrb.mxu0 %v8029_v16  ;;  %9226 = vmatpush.msk.msra.mxu1 %vm16139_vm5, %v9273_v27  ;;  %v6871_v28 = vpop.f32.mrf.mxu0 }
 0x366   :  { %8136 = vmatmul.f32.vlgmr.msrb.gmra.mxu0 %v9666_v57  ;;  %8337 = vmatpush.msra.mxu2 %v8228_v0  ;;  %v6872_v56 = vadd.f32 %v6871_v28, %v6833_v9  ;;  %v6980_v15 = vpop.f32.mrf.mxu3 }
 0x367   :  { %8261 = vmatpush.msra.mxu0 %v16097_v43  ;;  %9230 = vmatpush.msk.msra.mxu3 %vm16086_vm2, %v9273_v27 }
 0x368   :  { %9227 = vmatpush.msk.msra.mxu1 %vm16152_vm3, %v9273_v27  ;;  %8341 = vmatpush.msra.mxu2 %v8234_v46  ;;  %v6899_v26 = vadd.f32 %v6898_v59, %v6872_v56 }
 0x369   :  { %8264 = vmatpush.msra.mxu0 %v16115_v40  ;;  %9231 = vmatpush.msk.msra.mxu3 %vm16103_vm8, %v9273_v27  ;;  %v7043_v16 = vpop.f32.mrf.mxu1 }
 0x36a   :  { %8308 = vmatmul.f32.vlgmr.msra.gmra.mxu1 %v9691_v5  ;;  %8345 = vmatpush.msra.mxu2 %v8240_v36  ;;  %8404 = vst [vmem:[%s16362_s3 + $0xd0] sm:$0xff] %v6899_v26  ;;  %v6929_v5 = vpop.f32.mrf.mxu2 }
 0x36b   :  { %8267 = vmatpush.msra.mxu0 %v16144_v1  ;;  %9232 = vmatpush.msk.msra.mxu3 %vm16139_vm5, %v9273_v27  ;;  %v6981_v14 = vadd.f32 %v6980_v15, %v6929_v5 }
 0x36c   :  { %8347 = vmatmul.f32.vlgmr.msra.gmra.mxu2 %v9666_v57 }
 0x36d   :  { %8270 = vmatpush.msra.mxu0 %v16162_v25  ;;  %9233 = vmatpush.msk.msra.mxu3 %vm16152_vm3, %v9273_v27 }
 0x36e   :  { %8374 = vmatmul.f32.vlgmr.msra.gmra.mxu3 %v9666_v57 }
 0x36f   :  { %8273 = vmatpush.msra.mxu0 %v16186_v50 }
 0x371   :  { %8276 = vmatpush.msra.mxu0 %v16199_v20 }
 0x372   :  { %8279 = vmatmul.f32.vlgmr.msra.gmra.mxu0 %v9678_v61  ;;  %v7082_v22 = vpop.f32.mrf.mxu2 }
 0x373   :  { %v7014_v8 = vpop.f32.mrf.mxu0 }
 0x374   :  { %v7015_v49 = vadd.f32 %v7014_v8, %v6981_v14  ;;  %v7109_v63 = vpop.f32.mrf.mxu3 }
 0x376   :  { %v7044_v55 = vadd.f32 %v7043_v16, %v7015_v49 }
 0x377   :  { %v7191_v57 = vpop.f32.mrf.mxu1 }
 0x378   :  { %v7083_v43 = vadd.f32 %v7082_v22, %v7044_v55 }
 0x37a   :  { %v7110_v40 = vadd.f32 %v7109_v63, %v7083_v43 }
 0x37c   :  { %8405 = vst [vmem:[%s16362_s3 + $0xd8] sm:$0xff] %v7110_v40 }
 0x37f   :  { %v7225_v24 = vpop.f32.mrf.mxu2 }
 0x381   :  { %v7140_v27 = vpop.f32.mrf.mxu0 }
 0x382   :  { %v7192_v60 = vadd.f32 %v7191_v57, %v7140_v27  ;;  %v7254_v48 = vpop.f32.mrf.mxu3 }
 0x384   :  { %v7226_v38 = vadd.f32 %v7225_v24, %v7192_v60 }
 0x385   :  { %v7320_v1 = vpop.f32.mrf.mxu1 }
 0x386   :  { %v7255_v61 = vadd.f32 %v7254_v48, %v7226_v38 }
 0x38d   :  { %v7351_v35 = vpop.f32.mrf.mxu2 }
 0x38f   :  { %v7293_v51 = vpop.f32.mrf.mxu0 }
 0x390   :  { %v7294_v53 = vadd.f32 %v7293_v51, %v7255_v61  ;;  %v7402_v21 = vpop.f32.mrf.mxu3 }
 0x391   :  { %v7403_v6 = vadd.f32 %v7402_v21, %v7351_v35 }
 0x392   :  { %v7321_v7 = vadd.f32 %v7320_v1, %v7294_v53 }
 0x393   :  { %v7465_v12 = vpop.f32.mrf.mxu1 }
 0x394   :  { %8406 = vst [vmem:[%s16362_s3 + $0xe0] sm:$0xff] %v7321_v7 }
 0x39b   :  { %v7504_v62 = vpop.f32.mrf.mxu2 }
 0x39d   :  { %v7436_v25 = vpop.f32.mrf.mxu0 }
 0x39e   :  { %v7437_v31 = vadd.f32 %v7436_v25, %v7403_v6  ;;  %v7531_v45 = vpop.f32.mrf.mxu3 }
 0x3a0   :  { %v7466_v34 = vadd.f32 %v7465_v12, %v7437_v31 }
 0x3a1   :  { %v7613_v50 = vpop.f32.mrf.mxu1 }
 0x3a2   :  { %v7505_v32 = vadd.f32 %v7504_v62, %v7466_v34 }
 0x3a4   :  { %v7532_v39 = vadd.f32 %v7531_v45, %v7505_v32 }
 0x3a6   :  { %8407 = vst [vmem:[%s16362_s3 + $0xe8] sm:$0xff] %v7532_v39 }
 0x3a9   :  { %v7647_v0 = vpop.f32.mrf.mxu2 }
 0x3ab   :  { %v7562_v33 = vpop.f32.mrf.mxu0 }
 0x3ac   :  { %v7614_v29 = vadd.f32 %v7613_v50, %v7562_v33  ;;  %v7676_v41 = vpop.f32.mrf.mxu3 }
 0x3ae   :  { %v7648_v3 = vadd.f32 %v7647_v0, %v7614_v29 }
 0x3af   :  { %v7742_v52 = vpop.f32.mrf.mxu1 }
 0x3b0   :  { %v7677_v20 = vadd.f32 %v7676_v41, %v7648_v3 }
 0x3b7   :  { %v7773_v46 = vpop.f32.mrf.mxu2 }
 0x3b9   :  { %v7715_v42 = vpop.f32.mrf.mxu0 }
 0x3ba   :  { %v7716_v37 = vadd.f32 %v7715_v42, %v7677_v20  ;;  %v7824_v17 = vpop.f32.mrf.mxu3 }
 0x3bb   :  { %v7825_v36 = vadd.f32 %v7824_v17, %v7773_v46 }
 0x3bc   :  { %v7743_v10 = vadd.f32 %v7742_v52, %v7716_v37 }
 0x3bd   :  { %v7887_v2 = vpop.f32.mrf.mxu1 }
 0x3be   :  { %8408 = vst [vmem:[%s16362_s3 + $0xf0] sm:$0xff] %v7743_v10 }
 0x3c5   :  { %v7926_v18 = vpop.f32.mrf.mxu2 }
 0x3c7   :  { %v7858_v44 = vpop.f32.mrf.mxu0 }
 0x3c8   :  { %v7859_v30 = vadd.f32 %v7858_v44, %v7825_v36  ;;  %v7953_v19 = vpop.f32.mrf.mxu3 }
 0x3ca   :  { %v7888_v54 = vadd.f32 %v7887_v2, %v7859_v30 }
 0x3cb   :  { %v8035_v58 = vpop.f32.mrf.mxu1 }
 0x3cc   :  { %v7927_v47 = vadd.f32 %v7926_v18, %v7888_v54 }
 0x3ce   :  { %v7954_v4 = vadd.f32 %v7953_v19, %v7927_v47 }
 0x3d0   :  { %8409 = vst [vmem:[%s16362_s3 + $0xf8] sm:$0xff] %v7954_v4 }
 0x3d3   :  { %v8069_v23 = vpop.f32.mrf.mxu2 }
 0x3d5   :  { %v7984_v13 = vpop.f32.mrf.mxu0 }
 0x3d6   :  { %v8036_v11 = vadd.f32 %v8035_v58, %v7984_v13  ;;  %v8098_v28 = vpop.f32.mrf.mxu3 }
 0x3d8   :  { %v8070_v9 = vadd.f32 %v8069_v23, %v8036_v11 }
 0x3d9   :  { %v8164_v5 = vpop.f32.mrf.mxu1 }
 0x3da   :  { %v8099_v56 = vadd.f32 %v8098_v28, %v8070_v9 }
 0x3e1   :  { %v8195_v14 = vpop.f32.mrf.mxu2 }
 0x3e3   :  { %v8137_v59 = vpop.f32.mrf.mxu0 }
 0x3e4   :  { %v8138_v26 = vadd.f32 %v8137_v59, %v8099_v56  ;;  %v8246_v8 = vpop.f32.mrf.mxu3 }
 0x3e5   :  { %v8247_v49 = vadd.f32 %v8246_v8, %v8195_v14 }
 0x3e6   :  { %v8165_v15 = vadd.f32 %v8164_v5, %v8138_v26 }
 0x3e7   :  { %v8309_v22 = vpop.f32.mrf.mxu1 }
 0x3e8   :  { %8410 = vst [vmem:[%s16362_s3 + $0x100] sm:$0xff] %v8165_v15 }
 0x3ef   :  { %v8280_v16 = vpop.f32.mrf.mxu0  ;;  %v8348_v63 = vpop.f32.mrf.mxu2 }
 0x3f0   :  { %v8281_v55 = vadd.f32 %v8280_v16, %v8247_v49 }
 0x3f1   :  { %v8375_v27 = vpop.f32.mrf.mxu3 }
 0x3f2   :  { %v8310_v43 = vadd.f32 %v8309_v22, %v8281_v55 }
 0x3f4   :  { %v8349_v40 = vadd.f32 %v8348_v63, %v8310_v43 }
 0x3f6   :  { %v8376_v57 = vadd.f32 %v8375_v27, %v8349_v40 }
 0x3f8   :  { %8412 = vst.msk [vmem:[%s16362_s3 + $0x108] sm:$0xff] %vm8411_vm12, %v8376_v57 }
 0x3f9   :  { %8417 = vsyncpa [#allocation4], 1 }

</bundles_post_ra>
